<compile_context>
chip_gen: v7x
topology: tpu7x:2x2x1
jax: 0.10.0
libtpu: 0.0.40
codegen_flags: <defaults>
</compile_context>

<pallas_src>
import functools
import math

import jax
import jax.numpy as jnp
from jax.experimental import pallas as pl
from jax.experimental.pallas import tpu as pltpu

BN_EPS = 1e-5


# --------------------------- in-kernel math helpers ---------------------------
def _erf(x):
    # TODO(synk): lax.erf has no Mosaic lowering; use Abramowitz & Stegun 7.1.26
    # rational approximation (|err| < 1.5e-7, i.e. at f32 epsilon) built only from
    # ops with Pallas TPU lowerings (exp, mul, add, abs, where).
    a1, a2, a3, a4, a5 = 0.254829592, -0.284496736, 1.421413741, -1.453152027, 1.061405429
    p = 0.3275911
    sgn = jnp.where(x >= 0.0, 1.0, -1.0)
    ax = jnp.abs(x)
    t = 1.0 / (1.0 + p * ax)
    poly = ((((a5 * t + a4) * t + a3) * t + a2) * t + a1) * t
    return sgn * (1.0 - poly * jnp.exp(-ax * ax))


def _gelu(x):
    # Exact (erf-based) GELU, matching PyTorch nn.GELU() default.  Kept in f32
    # (v5e has no bf16 VPU/EUP).
    return 0.5 * x * (1.0 + _erf(x * (1.0 / math.sqrt(2.0))))


def _partial_stats(y):
    # Per-channel (sum, sum of squares) of a (rows..., C) tile -> (2, C).
    s = y
    q = y * y
    while s.ndim > 2:
        s = jnp.sum(s, axis=0)
        q = jnp.sum(q, axis=0)
    s = jnp.sum(s, axis=0, keepdims=True)   # (1, C)
    q = jnp.sum(q, axis=0, keepdims=True)   # (1, C)
    return jnp.concatenate([s, q], axis=0)  # (2, C)


# --------------------------------- kernels ------------------------------------
def _dw_gelu_kernel(x_ref, w_ref, b_ref, z_ref, st_ref, pad_ref, *, k, pad_lo):
    # x_ref: (1, H, W, C) one image (NHWC);  w_ref: (k*k, C) taps, row = dy*k + dx
    # z_ref: (1, H, W, C) = GELU(depthwise_conv(x) + b)
    # st_ref: (1, 2, C) per-image partial BN stats of z
    # pad_ref: VMEM scratch (H + k - 1, W + k - 1, C) holding the zero-padded halo.
    _, H, W, C = z_ref.shape

    # Build the 'same' halo in VMEM (replaces the old wrapper-side jnp.pad that cost a
    # full extra HBM write+read of the feature map).
    pad_ref[...] = jnp.zeros_like(pad_ref)
    pad_ref[pad_lo:pad_lo + H, pad_lo:pad_lo + W, :] = x_ref[0]

    w = w_ref[...]
    acc = jnp.zeros((H, W, C), jnp.float32)
    for dy in range(k):                      # k*k shifted multiply-accumulates (VPU)
        for dx in range(k):
            tap = w[dy * k + dx:dy * k + dx + 1, :]            # (1, C)
            acc = acc + pad_ref[dy:dy + H, dx:dx + W, :] * tap
    y = _gelu(acc + b_ref[...])
    z_ref[0] = y
    st_ref[0] = _partial_stats(y)            # fused single-pass sum / sumsq


def _residual_pointwise_kernel(x_ref, z_ref, s1_ref, t1_ref, w_ref, b_ref,
                               y_ref, st_ref):
    # One row-tile of pixels:
    #   u = x + BN1(GELU(depthwise(x)))   (BN1 applied as a precomputed affine)
    #   y = GELU(u @ W_pw + b)            (1x1 conv == per-pixel matmul, bf16 MXU)
    u = x_ref[...] + s1_ref[...] * z_ref[...] + t1_ref[...]
    y = jnp.dot(u.astype(jnp.bfloat16), w_ref[...],
                preferred_element_type=jnp.float32) + b_ref[...]
    y = _gelu(y)
    y_ref[...] = y
    st_ref[0] = _partial_stats(y)


def _affine_kernel(y_ref, s_ref, t_ref, o_ref):
    # BN2 apply: per-channel scale/shift on a row-tile.
    o_ref[...] = s_ref[...] * y_ref[...] + t_ref[...]


# --------------------------------- wrappers -----------------------------------
# Tiles here are tiny relative to VMEM (well under the v7x 64 MiB budget even with
# double buffering), so the default scoped VMEM limit is left untouched.
_PAR1 = pltpu.CompilerParams(dimension_semantics=("parallel",))


def _pick_row_tile(m):
    # Prefer 256-row tiles (good MXU M-dim + pipelining granularity); fall back to
    # any sublane-friendly divisor; whole-M as a last (always-correct) resort.
    for t in (256, 512, 128, 64, 32, 16, 8):
        if m % t == 0:
            return t
    return m


def depthwise_gelu(x_nhwc, w_dw, b_dw, *, k):
    # TODO(synk): for very large H the per-image block could be further tiled over H
    # rows with an explicit halo; per-image tiles are plenty small at these sizes.
    N, H, W, C = x_nhwc.shape
    pad_lo = (k - 1) // 2                     # PyTorch 'same' convention
    kernel = functools.partial(_dw_gelu_kernel, k=k, pad_lo=pad_lo)
    return pl.pallas_call(
        kernel,
        out_shape=(jax.ShapeDtypeStruct((N, H, W, C), jnp.float32),
                   jax.ShapeDtypeStruct((N, 2, C), jnp.float32)),
        grid=(N,),
        in_specs=[pl.BlockSpec((1, H, W, C), lambda n: (n, 0, 0, 0)),
                  pl.BlockSpec((k * k, C), lambda n: (0, 0)),
                  pl.BlockSpec((1, C), lambda n: (0, 0))],
        out_specs=(pl.BlockSpec((1, H, W, C), lambda n: (n, 0, 0, 0)),
                   pl.BlockSpec((1, 2, C), lambda n: (n, 0, 0))),
        scratch_shapes=[pltpu.VMEM((H + k - 1, W + k - 1, C), jnp.float32)],
        compiler_params=_PAR1,
    )(x_nhwc, w_dw, b_dw)


def residual_pointwise_gelu(x_flat, z_flat, scale1, shift1, w_pw_bf16, b_pw, *, tm):
    M, C = x_flat.shape
    nt = M // tm
    return pl.pallas_call(
        _residual_pointwise_kernel,
        out_shape=(jax.ShapeDtypeStruct((M, C), jnp.float32),
                   jax.ShapeDtypeStruct((nt, 2, C), jnp.float32)),
        grid=(nt,),
        in_specs=[pl.BlockSpec((tm, C), lambda i: (i, 0)),
                  pl.BlockSpec((tm, C), lambda i: (i, 0)),
                  pl.BlockSpec((1, C), lambda i: (0, 0)),
                  pl.BlockSpec((1, C), lambda i: (0, 0)),
                  pl.BlockSpec((C, C), lambda i: (0, 0)),
                  pl.BlockSpec((1, C), lambda i: (0, 0))],
        out_specs=(pl.BlockSpec((tm, C), lambda i: (i, 0)),
                   pl.BlockSpec((1, 2, C), lambda i: (i, 0, 0))),
        compiler_params=_PAR1,
    )(x_flat, z_flat, scale1, shift1, w_pw_bf16, b_pw)


def bn_affine(y_flat, scale, shift, *, tm):
    M, C = y_flat.shape
    nt = M // tm
    return pl.pallas_call(
        _affine_kernel,
        out_shape=jax.ShapeDtypeStruct((M, C), jnp.float32),
        grid=(nt,),
        in_specs=[pl.BlockSpec((tm, C), lambda i: (i, 0)),
                  pl.BlockSpec((1, C), lambda i: (0, 0)),
                  pl.BlockSpec((1, C), lambda i: (0, 0))],
        out_specs=pl.BlockSpec((tm, C), lambda i: (i, 0)),
        compiler_params=_PAR1,
    )(y_flat, scale, shift)


def _bn_scale_shift(partial_stats, count, gamma, beta):
    # Reduce per-tile (sum, sumsq) partials -> per-channel affine (scale, shift)
    # matching nn.BatchNorm2d train-mode forward (biased var, eps=1e-5).
    tot = jnp.sum(partial_stats, axis=0)                     # (2, C)
    mean = tot[0] / float(count)
    var = jnp.maximum(tot[1] / float(count) - mean * mean, 0.0)
    scale = gamma.reshape(-1) * jax.lax.rsqrt(var + BN_EPS)
    shift = beta.reshape(-1) - mean * scale
    return scale.reshape(1, -1), shift.reshape(1, -1)


# ------------------------------- full forward ---------------------------------
def convmixer_block_forward(x_nchw, params, *, k):
    # Public layout: NCHW (PyTorch).  Internal: NHWC, channels on lanes.
    N, C, H, W = x_nchw.shape
    x_nhwc = jnp.transpose(x_nchw, (0, 2, 3, 1)).astype(jnp.float32)
    M = N * H * W

    # A) depthwise conv + GELU (grid over batch) + partial BN1 stats
    z1, st1 = depthwise_gelu(x_nhwc, params["dw_w"], params["dw_b"], k=k)
    scale1, shift1 = _bn_scale_shift(st1, M, params["dw_gamma"], params["dw_beta"])

    # B) residual + BN1-apply + 1x1 conv (bf16 MXU) + GELU, tiled over pixel rows
    tm = _pick_row_tile(M)
    x_flat = x_nhwc.reshape(M, C)
    z1_flat = z1.reshape(M, C)
    y2, st2 = residual_pointwise_gelu(x_flat, z1_flat, scale1, shift1,
                                      params["pw_w"], params["pw_b"], tm=tm)
    scale2, shift2 = _bn_scale_shift(st2, M, params["pw_gamma"], params["pw_beta"])

    # C) BN2 apply
    out_flat = bn_affine(y2, scale2, shift2, tm=tm)
    return jnp.transpose(out_flat.reshape(N, H, W, C), (0, 3, 1, 2))


# ------------------------------- parameter init --------------------------------
def init_params(key, *, h, k):
    keys = jax.random.split(key, 8)
    f32 = jnp.float32
    nrm = lambda kk, shape, s: (s * jax.random.normal(kk, shape)).astype(f32)
    return {
        # PyTorch depthwise Conv2d(h,h,k,groups=h) weight (h,1,k,k) stored (k*k, h), row=dy*k+dx
        "dw_w": nrm(keys[0], (k * k, h), 0.1),
        "dw_b": nrm(keys[1], (1, h), 0.05),
        "dw_gamma": (1.0 + 0.1 * jax.random.normal(keys[2], (1, h))).astype(f32),
        "dw_beta": nrm(keys[3], (1, h), 0.1),
        # PyTorch pointwise Conv2d(h,h,1) weight (h,h,1,1) stored transposed (h_in, h_out),
        # kept in bf16 for the MXU (f32 accumulation inside the kernel).
        "pw_w": nrm(keys[4], (h, h), 0.1).astype(jnp.bfloat16),
        "pw_b": nrm(keys[5], (1, h), 0.05),
        "pw_gamma": (1.0 + 0.1 * jax.random.normal(keys[6], (1, h))).astype(f32),
        "pw_beta": nrm(keys[7], (1, h), 0.1),
    }


# ------------------------------ pure-JAX reference ------------------------------
def _reference_forward(x_nchw, params, *, k):
    f32 = jnp.float32
    N, C, H, W = x_nchw.shape
    x = jnp.transpose(x_nchw, (0, 2, 3, 1)).astype(f32)
    pad_lo = (k - 1) // 2
    pad_hi = (k - 1) - pad_lo
    xp = jnp.pad(x, ((0, 0), (pad_lo, pad_hi), (pad_lo, pad_hi), (0, 0)))
    w = params["dw_w"]
    acc = jnp.zeros_like(x)
    for dy in range(k):
        for dx in range(k):
            acc = acc + xp[:, dy:dy + H, dx:dx + W, :] * w[dy * k + dx]
    z = jax.nn.gelu(acc + params["dw_b"][0], approximate=False)

    def bn(v, gamma, beta):
        mean = jnp.mean(v, axis=(0, 1, 2), keepdims=True)
        var = jnp.mean((v - mean) ** 2, axis=(0, 1, 2), keepdims=True)
        return (gamma.reshape(1, 1, 1, -1) * (v - mean) * jax.lax.rsqrt(var + BN_EPS)
                + beta.reshape(1, 1, 1, -1))

    u = x + bn(z, params["dw_gamma"], params["dw_beta"])
    y = jnp.einsum("nhwc,cd->nhwd", u, params["pw_w"].astype(f32),
                   precision=jax.lax.Precision.HIGHEST) + params["pw_b"][0]
    y = jax.nn.gelu(y, approximate=False)
    out = bn(y, params["pw_gamma"], params["pw_beta"])
    return jnp.transpose(out, (0, 3, 1, 2))


# ------------------------------------ main -------------------------------------
if __name__ == "__main__":
    # h chosen as a multiple of 128 so channels are lane-dense (no masked stores).
    h, k = 128, 3
    batch, img = 2, 16

    root = jax.random.PRNGKey(0)
    kx, kp = jax.random.split(root)
    x = jax.random.normal(kx, (batch, h, img, img), dtype=jnp.float32)
    params = init_params(kp, h=h, k=k)

    fwd = jax.jit(functools.partial(convmixer_block_forward, k=k))
    out = jax.block_until_ready(fwd(x, params))

    assert out.shape == (batch, h, img, img), out.shape
    assert bool(jnp.all(jnp.isfinite(out)))

    # Compare against a pure-JAX f32 reference.  Loose tolerance covers the intentional
    # bf16 cast of the MXU operands in the pointwise kernel (outputs are O(1) after BN).
    ref = jax.block_until_ready(_reference_forward(x, params, k=k))
    assert bool(jnp.allclose(out, ref, atol=1e-1, rtol=0.0)), float(jnp.max(jnp.abs(out - ref)))

    print("KERNEL_OK")
</pallas_src>

<mosaic_0001>
module attributes {stable_mosaic.version = 11 : i64} {
  func.func @_dw_gelu_kernel(%arg0: i32, %arg1: memref<1x16x16x128xf32, #tpu.memory_space<vmem>>, %arg2: memref<9x128xf32, #tpu.memory_space<vmem>>, %arg3: memref<1x128xf32, #tpu.memory_space<vmem>>, %arg4: memref<1x16x16x128xf32, #tpu.memory_space<vmem>>, %arg5: memref<1x2x128xf32, #tpu.memory_space<vmem>>, %arg6: memref<18x18x128xf32, #tpu.memory_space<vmem>>) attributes {dimension_semantics = [#tpu.dimension_semantics<parallel>], iteration_bounds = array<i64: 2>, scalar_prefetch = 0 : i64, scratch_operands = 1 : i64, tpu.core_type = #tpu.core_type<tc>, window_params = [{transform_indices = @transform_0, window_bounds = array<i64: 1, 16, 16, 128>}, {pipeline_mode = #tpu.pipeline_mode<synchronous>, transform_indices = @transform_1, window_bounds = array<i64: 9, 128>}, {pipeline_mode = #tpu.pipeline_mode<synchronous>, transform_indices = @transform_2, window_bounds = array<i64: 1, 128>}, {transform_indices = @transform_3, window_bounds = array<i64: 1, 16, 16, 128>}, {transform_indices = @transform_4, window_bounds = array<i64: 1, 2, 128>}]} {
    %cst = arith.constant 0.000000e+00 : f32
    %0 = vector.broadcast %cst : f32 to vector<18x18x128xf32>
    %c0 = arith.constant 0 : index
    %c0_0 = arith.constant 0 : index
    %c0_1 = arith.constant 0 : index
    %1 = vector.load %arg6[%c0, %c0_0, %c0_1] : memref<18x18x128xf32, #tpu.memory_space<vmem>>, vector<18x18x128xf32>
    tpu.vector_store %arg6[%c0, %c0_0, %c0_1], %0 {strides = array<i32>} : memref<18x18x128xf32, #tpu.memory_space<vmem>>, vector<18x18x128xf32>,
    %c0_2 = arith.constant 0 : index
    %c0_3 = arith.constant 0 : index
    %c0_4 = arith.constant 0 : index
    %c0_5 = arith.constant 0 : index
    %2 = vector.load %arg1[%c0_2, %c0_3, %c0_4, %c0_5] : memref<1x16x16x128xf32, #tpu.memory_space<vmem>>, vector<1x16x16x128xf32>
    %3 = vector.shape_cast %2 : vector<1x16x16x128xf32> to vector<16x16x128xf32>
    %c1 = arith.constant 1 : index
    %c1_6 = arith.constant 1 : index
    %c0_7 = arith.constant 0 : index
    %4 = vector.load %arg6[%c1, %c1_6, %c0_7] : memref<18x18x128xf32, #tpu.memory_space<vmem>>, vector<16x16x128xf32>
    tpu.vector_store %arg6[%c1, %c1_6, %c0_7], %3 {strides = array<i32>} : memref<18x18x128xf32, #tpu.memory_space<vmem>>, vector<16x16x128xf32>,
    %c0_8 = arith.constant 0 : index
    %c0_9 = arith.constant 0 : index
    %5 = vector.load %arg2[%c0_8, %c0_9] : memref<9x128xf32, #tpu.memory_space<vmem>>, vector<9x128xf32>
    %cst_10 = arith.constant 0.000000e+00 : f32
    %6 = vector.broadcast %cst_10 : f32 to vector<16x16x128xf32>
    %7 = vector.extract_strided_slice %5 {offsets = [0, 0], sizes = [1, 128], strides = [1, 1]} : vector<9x128xf32> to vector<1x128xf32>
    %c0_11 = arith.constant 0 : index
    %c0_12 = arith.constant 0 : index
    %c0_13 = arith.constant 0 : index
    %8 = vector.load %arg6[%c0_11, %c0_12, %c0_13] : memref<18x18x128xf32, #tpu.memory_space<vmem>>, vector<16x16x128xf32>
    %9 = vector.shape_cast %7 : vector<1x128xf32> to vector<1x1x128xf32>
    %10 = vector.broadcast %9 : vector<1x1x128xf32> to vector<16x16x128xf32>
    %11 = arith.mulf %8, %10 : vector<16x16x128xf32>
    %12 = arith.addf %6, %11 : vector<16x16x128xf32>
    %13 = vector.extract_strided_slice %5 {offsets = [1, 0], sizes = [1, 128], strides = [1, 1]} : vector<9x128xf32> to vector<1x128xf32>
    %c0_14 = arith.constant 0 : index
    %c1_15 = arith.constant 1 : index
    %c0_16 = arith.constant 0 : index
    %14 = vector.load %arg6[%c0_14, %c1_15, %c0_16] : memref<18x18x128xf32, #tpu.memory_space<vmem>>, vector<16x16x128xf32>
    %15 = vector.shape_cast %13 : vector<1x128xf32> to vector<1x1x128xf32>
    %16 = vector.broadcast %15 : vector<1x1x128xf32> to vector<16x16x128xf32>
    %17 = arith.mulf %14, %16 : vector<16x16x128xf32>
    %18 = arith.addf %12, %17 : vector<16x16x128xf32>
    %19 = vector.extract_strided_slice %5 {offsets = [2, 0], sizes = [1, 128], strides = [1, 1]} : vector<9x128xf32> to vector<1x128xf32>
    %c0_17 = arith.constant 0 : index
    %c2 = arith.constant 2 : index
    %c0_18 = arith.constant 0 : index
    %20 = vector.load %arg6[%c0_17, %c2, %c0_18] : memref<18x18x128xf32, #tpu.memory_space<vmem>>, vector<16x16x128xf32>
    %21 = vector.shape_cast %19 : vector<1x128xf32> to vector<1x1x128xf32>
    %22 = vector.broadcast %21 : vector<1x1x128xf32> to vector<16x16x128xf32>
    %23 = arith.mulf %20, %22 : vector<16x16x128xf32>
    %24 = arith.addf %18, %23 : vector<16x16x128xf32>
    %25 = vector.extract_strided_slice %5 {offsets = [3, 0], sizes = [1, 128], strides = [1, 1]} : vector<9x128xf32> to vector<1x128xf32>
    %c1_19 = arith.constant 1 : index
    %c0_20 = arith.constant 0 : index
    %c0_21 = arith.constant 0 : index
    %26 = vector.load %arg6[%c1_19, %c0_20, %c0_21] : memref<18x18x128xf32, #tpu.memory_space<vmem>>, vector<16x16x128xf32>
    %27 = vector.shape_cast %25 : vector<1x128xf32> to vector<1x1x128xf32>
    %28 = vector.broadcast %27 : vector<1x1x128xf32> to vector<16x16x128xf32>
    %29 = arith.mulf %26, %28 : vector<16x16x128xf32>
    %30 = arith.addf %24, %29 : vector<16x16x128xf32>
    %31 = vector.extract_strided_slice %5 {offsets = [4, 0], sizes = [1, 128], strides = [1, 1]} : vector<9x128xf32> to vector<1x128xf32>
    %c1_22 = arith.constant 1 : index
    %c1_23 = arith.constant 1 : index
    %c0_24 = arith.constant 0 : index
    %32 = vector.load %arg6[%c1_22, %c1_23, %c0_24] : memref<18x18x128xf32, #tpu.memory_space<vmem>>, vector<16x16x128xf32>
    %33 = vector.shape_cast %31 : vector<1x128xf32> to vector<1x1x128xf32>
    %34 = vector.broadcast %33 : vector<1x1x128xf32> to vector<16x16x128xf32>
    %35 = arith.mulf %32, %34 : vector<16x16x128xf32>
    %36 = arith.addf %30, %35 : vector<16x16x128xf32>
    %37 = vector.extract_strided_slice %5 {offsets = [5, 0], sizes = [1, 128], strides = [1, 1]} : vector<9x128xf32> to vector<1x128xf32>
    %c1_25 = arith.constant 1 : index
    %c2_26 = arith.constant 2 : index
    %c0_27 = arith.constant 0 : index
    %38 = vector.load %arg6[%c1_25, %c2_26, %c0_27] : memref<18x18x128xf32, #tpu.memory_space<vmem>>, vector<16x16x128xf32>
    %39 = vector.shape_cast %37 : vector<1x128xf32> to vector<1x1x128xf32>
    %40 = vector.broadcast %39 : vector<1x1x128xf32> to vector<16x16x128xf32>
    %41 = arith.mulf %38, %40 : vector<16x16x128xf32>
    %42 = arith.addf %36, %41 : vector<16x16x128xf32>
    %43 = vector.extract_strided_slice %5 {offsets = [6, 0], sizes = [1, 128], strides = [1, 1]} : vector<9x128xf32> to vector<1x128xf32>
    %c2_28 = arith.constant 2 : index
    %c0_29 = arith.constant 0 : index
    %c0_30 = arith.constant 0 : index
    %44 = vector.load %arg6[%c2_28, %c0_29, %c0_30] : memref<18x18x128xf32, #tpu.memory_space<vmem>>, vector<16x16x128xf32>
    %45 = vector.shape_cast %43 : vector<1x128xf32> to vector<1x1x128xf32>
    %46 = vector.broadcast %45 : vector<1x1x128xf32> to vector<16x16x128xf32>
    %47 = arith.mulf %44, %46 : vector<16x16x128xf32>
    %48 = arith.addf %42, %47 : vector<16x16x128xf32>
    %49 = vector.extract_strided_slice %5 {offsets = [7, 0], sizes = [1, 128], strides = [1, 1]} : vector<9x128xf32> to vector<1x128xf32>
    %c2_31 = arith.constant 2 : index
    %c1_32 = arith.constant 1 : index
    %c0_33 = arith.constant 0 : index
    %50 = vector.load %arg6[%c2_31, %c1_32, %c0_33] : memref<18x18x128xf32, #tpu.memory_space<vmem>>, vector<16x16x128xf32>
    %51 = vector.shape_cast %49 : vector<1x128xf32> to vector<1x1x128xf32>
    %52 = vector.broadcast %51 : vector<1x1x128xf32> to vector<16x16x128xf32>
    %53 = arith.mulf %50, %52 : vector<16x16x128xf32>
    %54 = arith.addf %48, %53 : vector<16x16x128xf32>
    %55 = vector.extract_strided_slice %5 {offsets = [8, 0], sizes = [1, 128], strides = [1, 1]} : vector<9x128xf32> to vector<1x128xf32>
    %c2_34 = arith.constant 2 : index
    %c2_35 = arith.constant 2 : index
    %c0_36 = arith.constant 0 : index
    %56 = vector.load %arg6[%c2_34, %c2_35, %c0_36] : memref<18x18x128xf32, #tpu.memory_space<vmem>>, vector<16x16x128xf32>
    %57 = vector.shape_cast %55 : vector<1x128xf32> to vector<1x1x128xf32>
    %58 = vector.broadcast %57 : vector<1x1x128xf32> to vector<16x16x128xf32>
    %59 = arith.mulf %56, %58 : vector<16x16x128xf32>
    %60 = arith.addf %54, %59 : vector<16x16x128xf32>
    %c0_37 = arith.constant 0 : index
    %c0_38 = arith.constant 0 : index
    %61 = vector.load %arg3[%c0_37, %c0_38] : memref<1x128xf32, #tpu.memory_space<vmem>>, vector<1x128xf32>
    %62 = vector.shape_cast %61 : vector<1x128xf32> to vector<1x1x128xf32>
    %63 = vector.broadcast %62 : vector<1x1x128xf32> to vector<16x16x128xf32>
    %64 = arith.addf %60, %63 : vector<16x16x128xf32>
    %cst_39 = arith.constant 5.000000e-01 : f32
    %65 = vector.broadcast %cst_39 : f32 to vector<16x16x128xf32>
    %66 = arith.mulf %65, %64 : vector<16x16x128xf32>
    %cst_40 = arith.constant 0.707106769 : f32
    %67 = vector.broadcast %cst_40 : f32 to vector<16x16x128xf32>
    %68 = arith.mulf %64, %67 : vector<16x16x128xf32>
    %cst_41 = arith.constant 0.000000e+00 : f32
    %69 = vector.broadcast %cst_41 : f32 to vector<16x16x128xf32>
    %70 = arith.cmpf oge, %68, %69 : vector<16x16x128xf32>
    %cst_42 = arith.constant 1.000000e+00 : f32
    %cst_43 = arith.constant -1.000000e+00 : f32
    %71 = vector.broadcast %cst_42 : f32 to vector<16x16x128xf32>
    %72 = vector.broadcast %cst_43 : f32 to vector<16x16x128xf32>
    %73 = arith.select %70, %71, %72 : vector<16x16x128xi1>, vector<16x16x128xf32>
    %74 = math.absf %68 : vector<16x16x128xf32>
    %cst_44 = arith.constant 0.327591091 : f32
    %75 = vector.broadcast %cst_44 : f32 to vector<16x16x128xf32>
    %76 = arith.mulf %75, %74 : vector<16x16x128xf32>
    %cst_45 = arith.constant 1.000000e+00 : f32
    %77 = vector.broadcast %cst_45 : f32 to vector<16x16x128xf32>
    %78 = arith.addf %77, %76 : vector<16x16x128xf32>
    %cst_46 = arith.constant 1.000000e+00 : f32
    %79 = vector.broadcast %cst_46 : f32 to vector<16x16x128xf32>
    %80 = arith.divf %79, %78 : vector<16x16x128xf32>
    %cst_47 = arith.constant 1.06140542 : f32
    %81 = vector.broadcast %cst_47 : f32 to vector<16x16x128xf32>
    %82 = arith.mulf %81, %80 : vector<16x16x128xf32>
    %cst_48 = arith.constant -1.45315206 : f32
    %83 = vector.broadcast %cst_48 : f32 to vector<16x16x128xf32>
    %84 = arith.addf %82, %83 : vector<16x16x128xf32>
    %85 = arith.mulf %84, %80 : vector<16x16x128xf32>
    %cst_49 = arith.constant 1.42141378 : f32
    %86 = vector.broadcast %cst_49 : f32 to vector<16x16x128xf32>
    %87 = arith.addf %85, %86 : vector<16x16x128xf32>
    %88 = arith.mulf %87, %80 : vector<16x16x128xf32>
    %cst_50 = arith.constant -0.284496725 : f32
    %89 = vector.broadcast %cst_50 : f32 to vector<16x16x128xf32>
    %90 = arith.addf %88, %89 : vector<16x16x128xf32>
    %91 = arith.mulf %90, %80 : vector<16x16x128xf32>
    %cst_51 = arith.constant 0.254829586 : f32
    %92 = vector.broadcast %cst_51 : f32 to vector<16x16x128xf32>
    %93 = arith.addf %91, %92 : vector<16x16x128xf32>
    %94 = arith.mulf %93, %80 : vector<16x16x128xf32>
    %cst_52 = arith.constant 0.000000e+00 : f32
    %95 = vector.broadcast %cst_52 : f32 to vector<16x16x128xf32>
    %96 = arith.subf %95, %74 : vector<16x16x128xf32>
    %97 = arith.mulf %96, %74 : vector<16x16x128xf32>
    %98 = math.exp %97 : vector<16x16x128xf32>
    %99 = arith.mulf %94, %98 : vector<16x16x128xf32>
    %cst_53 = arith.constant 1.000000e+00 : f32
    %100 = vector.broadcast %cst_53 : f32 to vector<16x16x128xf32>
    %101 = arith.subf %100, %99 : vector<16x16x128xf32>
    %102 = arith.mulf %73, %101 : vector<16x16x128xf32>
    %cst_54 = arith.constant 1.000000e+00 : f32
    %103 = vector.broadcast %cst_54 : f32 to vector<16x16x128xf32>
    %104 = arith.addf %103, %102 : vector<16x16x128xf32>
    %105 = arith.mulf %66, %104 : vector<16x16x128xf32>
    %c0_55 = arith.constant 0 : index
    %c0_56 = arith.constant 0 : index
    %c0_57 = arith.constant 0 : index
    %c0_58 = arith.constant 0 : index
    %106 = vector.load %arg4[%c0_55, %c0_56, %c0_57, %c0_58] : memref<1x16x16x128xf32, #tpu.memory_space<vmem>>, vector<1x16x16x128xf32>
    %107 = vector.shape_cast %106 : vector<1x16x16x128xf32> to vector<16x16x128xf32>
    %108 = vector.shape_cast %105 : vector<16x16x128xf32> to vector<1x16x16x128xf32>
    tpu.vector_store %arg4[%c0_55, %c0_56, %c0_57, %c0_58], %108 {strides = array<i32>} : memref<1x16x16x128xf32, #tpu.memory_space<vmem>>, vector<1x16x16x128xf32>,
    %109 = arith.mulf %105, %105 : vector<16x16x128xf32>
    %cst_59 = arith.constant dense<0.000000e+00> : vector<16x128xf32>
    %110 = vector.multi_reduction <add>, %105, %cst_59 [0] : vector<16x16x128xf32> to vector<16x128xf32>
    %cst_60 = arith.constant dense<0.000000e+00> : vector<16x128xf32>
    %111 = vector.multi_reduction <add>, %109, %cst_60 [0] : vector<16x16x128xf32> to vector<16x128xf32>
    %cst_61 = arith.constant dense<0.000000e+00> : vector<128xf32>
    %112 = vector.multi_reduction <add>, %110, %cst_61 [0] : vector<16x128xf32> to vector<128xf32>
    %113 = vector.shape_cast %112 : vector<128xf32> to vector<1x128xf32>
    %cst_62 = arith.constant dense<0.000000e+00> : vector<128xf32>
    %114 = vector.multi_reduction <add>, %111, %cst_62 [0] : vector<16x128xf32> to vector<128xf32>
    %115 = vector.shape_cast %114 : vector<128xf32> to vector<1x128xf32>
    %116 = tpu.concatenate %113, %115 in 0 : vector<1x128xf32>, vector<1x128xf32> -> vector<2x128xf32>
    %c0_63 = arith.constant 0 : index
    %c0_64 = arith.constant 0 : index
    %c0_65 = arith.constant 0 : index
    %117 = vector.load %arg5[%c0_63, %c0_64, %c0_65] : memref<1x2x128xf32, #tpu.memory_space<vmem>>, vector<1x2x128xf32>
    %118 = vector.shape_cast %117 : vector<1x2x128xf32> to vector<2x128xf32>
    %119 = vector.shape_cast %116 : vector<2x128xf32> to vector<1x2x128xf32>
    tpu.vector_store %arg5[%c0_63, %c0_64, %c0_65], %119 {strides = array<i32>} : memref<1x2x128xf32, #tpu.memory_space<vmem>>, vector<1x2x128xf32>,
    return
  }
  func.func @transform_0(%arg0: i32) -> (i32, i32, i32, i32) {
    %c0_i32 = arith.constant 0 : i32
    %c0_i32_0 = arith.constant 0 : i32
    %c0_i32_1 = arith.constant 0 : i32
    %c0_i32_2 = arith.constant 0 : i32
    return %arg0, %c0_i32, %c0_i32_0, %c0_i32_1 : i32, i32, i32, i32
  }
  func.func @transform_1(%arg0: i32) -> (i32, i32) {
    %c0_i32 = arith.constant 0 : i32
    %c0_i32_0 = arith.constant 0 : i32
    %c0_i32_1 = arith.constant 0 : i32
    return %c0_i32, %c0_i32_0 : i32, i32
  }
  func.func @transform_2(%arg0: i32) -> (i32, i32) {
    %c0_i32 = arith.constant 0 : i32
    %c0_i32_0 = arith.constant 0 : i32
    %c0_i32_1 = arith.constant 0 : i32
    return %c0_i32, %c0_i32_0 : i32, i32
  }
  func.func @transform_3(%arg0: i32) -> (i32, i32, i32, i32) {
    %c0_i32 = arith.constant 0 : i32
    %c0_i32_0 = arith.constant 0 : i32
    %c0_i32_1 = arith.constant 0 : i32
    %c0_i32_2 = arith.constant 0 : i32
    return %arg0, %c0_i32, %c0_i32_0, %c0_i32_1 : i32, i32, i32, i32
  }
  func.func @transform_4(%arg0: i32) -> (i32, i32, i32) {
    %c0_i32 = arith.constant 0 : i32
    %c0_i32_0 = arith.constant 0 : i32
    %c0_i32_1 = arith.constant 0 : i32
    return %arg0, %c0_i32, %c0_i32_0 : i32, i32, i32
  }
}

module attributes {stable_mosaic.version = 11 : i64} {
  func.func @_residual_pointwise_kernel(%arg0: i32, %arg1: memref<256x128xf32, #tpu.memory_space<vmem>>, %arg2: memref<256x128xf32, #tpu.memory_space<vmem>>, %arg3: memref<1x128xf32, #tpu.memory_space<vmem>>, %arg4: memref<1x128xf32, #tpu.memory_space<vmem>>, %arg5: memref<128x128xbf16, #tpu.memory_space<vmem>>, %arg6: memref<1x128xf32, #tpu.memory_space<vmem>>, %arg7: memref<256x128xf32, #tpu.memory_space<vmem>>, %arg8: memref<1x2x128xf32, #tpu.memory_space<vmem>>) attributes {dimension_semantics = [#tpu.dimension_semantics<parallel>], iteration_bounds = array<i64: 2>, scalar_prefetch = 0 : i64, scratch_operands = 0 : i64, tpu.core_type = #tpu.core_type<tc>, window_params = [{transform_indices = @transform_0, window_bounds = array<i64: 256, 128>}, {transform_indices = @transform_1, window_bounds = array<i64: 256, 128>}, {pipeline_mode = #tpu.pipeline_mode<synchronous>, transform_indices = @transform_2, window_bounds = array<i64: 1, 128>}, {pipeline_mode = #tpu.pipeline_mode<synchronous>, transform_indices = @transform_3, window_bounds = array<i64: 1, 128>}, {pipeline_mode = #tpu.pipeline_mode<synchronous>, transform_indices = @transform_4, window_bounds = array<i64: 128, 128>}, {pipeline_mode = #tpu.pipeline_mode<synchronous>, transform_indices = @transform_5, window_bounds = array<i64: 1, 128>}, {transform_indices = @transform_6, window_bounds = array<i64: 256, 128>}, {transform_indices = @transform_7, window_bounds = array<i64: 1, 2, 128>}]} {
    %c0 = arith.constant 0 : index
    %c0_0 = arith.constant 0 : index
    %0 = vector.load %arg1[%c0, %c0_0] : memref<256x128xf32, #tpu.memory_space<vmem>>, vector<256x128xf32>
    %c0_1 = arith.constant 0 : index
    %c0_2 = arith.constant 0 : index
    %1 = vector.load %arg3[%c0_1, %c0_2] : memref<1x128xf32, #tpu.memory_space<vmem>>, vector<1x128xf32>
    %c0_3 = arith.constant 0 : index
    %c0_4 = arith.constant 0 : index
    %2 = vector.load %arg2[%c0_3, %c0_4] : memref<256x128xf32, #tpu.memory_space<vmem>>, vector<256x128xf32>
    %3 = vector.broadcast %1 : vector<1x128xf32> to vector<256x128xf32>
    %4 = arith.mulf %3, %2 : vector<256x128xf32>
    %5 = arith.addf %0, %4 : vector<256x128xf32>
    %c0_5 = arith.constant 0 : index
    %c0_6 = arith.constant 0 : index
    %6 = vector.load %arg4[%c0_5, %c0_6] : memref<1x128xf32, #tpu.memory_space<vmem>>, vector<1x128xf32>
    %7 = vector.broadcast %6 : vector<1x128xf32> to vector<256x128xf32>
    %8 = arith.addf %5, %7 : vector<256x128xf32>
    %9 = arith.truncf %8 : vector<256x128xf32> to vector<256x128xbf16>
    %c0_7 = arith.constant 0 : index
    %c0_8 = arith.constant 0 : index
    %10 = vector.load %arg5[%c0_7, %c0_8] : memref<128x128xbf16, #tpu.memory_space<vmem>>, vector<128x128xbf16>
    %cst = arith.constant dense<0.000000e+00> : vector<256x128xf32>
    %11 = tpu.matmul %9, %10, %cst {dimension_numbers = #tpu.dot_dimension_numbers<[1], [0], [0], [1], [0, 0, 1, 1], [], []>} : vector<256x128xbf16>, vector<128x128xbf16>, vector<256x128xf32> -> vector<256x128xf32>
    %c0_9 = arith.constant 0 : index
    %c0_10 = arith.constant 0 : index
    %12 = vector.load %arg6[%c0_9, %c0_10] : memref<1x128xf32, #tpu.memory_space<vmem>>, vector<1x128xf32>
    %13 = vector.broadcast %12 : vector<1x128xf32> to vector<256x128xf32>
    %14 = arith.addf %11, %13 : vector<256x128xf32>
    %cst_11 = arith.constant 5.000000e-01 : f32
    %15 = vector.broadcast %cst_11 : f32 to vector<256x128xf32>
    %16 = arith.mulf %15, %14 : vector<256x128xf32>
    %cst_12 = arith.constant 0.707106769 : f32
    %17 = vector.broadcast %cst_12 : f32 to vector<256x128xf32>
    %18 = arith.mulf %14, %17 : vector<256x128xf32>
    %cst_13 = arith.constant 0.000000e+00 : f32
    %19 = vector.broadcast %cst_13 : f32 to vector<256x128xf32>
    %20 = arith.cmpf oge, %18, %19 : vector<256x128xf32>
    %cst_14 = arith.constant 1.000000e+00 : f32
    %cst_15 = arith.constant -1.000000e+00 : f32
    %21 = vector.broadcast %cst_14 : f32 to vector<256x128xf32>
    %22 = vector.broadcast %cst_15 : f32 to vector<256x128xf32>
    %23 = arith.select %20, %21, %22 : vector<256x128xi1>, vector<256x128xf32>
    %24 = math.absf %18 : vector<256x128xf32>
    %cst_16 = arith.constant 0.327591091 : f32
    %25 = vector.broadcast %cst_16 : f32 to vector<256x128xf32>
    %26 = arith.mulf %25, %24 : vector<256x128xf32>
    %cst_17 = arith.constant 1.000000e+00 : f32
    %27 = vector.broadcast %cst_17 : f32 to vector<256x128xf32>
    %28 = arith.addf %27, %26 : vector<256x128xf32>
    %cst_18 = arith.constant 1.000000e+00 : f32
    %29 = vector.broadcast %cst_18 : f32 to vector<256x128xf32>
    %30 = arith.divf %29, %28 : vector<256x128xf32>
    %cst_19 = arith.constant 1.06140542 : f32
    %31 = vector.broadcast %cst_19 : f32 to vector<256x128xf32>
    %32 = arith.mulf %31, %30 : vector<256x128xf32>
    %cst_20 = arith.constant -1.45315206 : f32
    %33 = vector.broadcast %cst_20 : f32 to vector<256x128xf32>
    %34 = arith.addf %32, %33 : vector<256x128xf32>
    %35 = arith.mulf %34, %30 : vector<256x128xf32>
    %cst_21 = arith.constant 1.42141378 : f32
    %36 = vector.broadcast %cst_21 : f32 to vector<256x128xf32>
    %37 = arith.addf %35, %36 : vector<256x128xf32>
    %38 = arith.mulf %37, %30 : vector<256x128xf32>
    %cst_22 = arith.constant -0.284496725 : f32
    %39 = vector.broadcast %cst_22 : f32 to vector<256x128xf32>
    %40 = arith.addf %38, %39 : vector<256x128xf32>
    %41 = arith.mulf %40, %30 : vector<256x128xf32>
    %cst_23 = arith.constant 0.254829586 : f32
    %42 = vector.broadcast %cst_23 : f32 to vector<256x128xf32>
    %43 = arith.addf %41, %42 : vector<256x128xf32>
    %44 = arith.mulf %43, %30 : vector<256x128xf32>
    %cst_24 = arith.constant 0.000000e+00 : f32
    %45 = vector.broadcast %cst_24 : f32 to vector<256x128xf32>
    %46 = arith.subf %45, %24 : vector<256x128xf32>
    %47 = arith.mulf %46, %24 : vector<256x128xf32>
    %48 = math.exp %47 : vector<256x128xf32>
    %49 = arith.mulf %44, %48 : vector<256x128xf32>
    %cst_25 = arith.constant 1.000000e+00 : f32
    %50 = vector.broadcast %cst_25 : f32 to vector<256x128xf32>
    %51 = arith.subf %50, %49 : vector<256x128xf32>
    %52 = arith.mulf %23, %51 : vector<256x128xf32>
    %cst_26 = arith.constant 1.000000e+00 : f32
    %53 = vector.broadcast %cst_26 : f32 to vector<256x128xf32>
    %54 = arith.addf %53, %52 : vector<256x128xf32>
    %55 = arith.mulf %16, %54 : vector<256x128xf32>
    %c0_27 = arith.constant 0 : index
    %c0_28 = arith.constant 0 : index
    %56 = vector.load %arg7[%c0_27, %c0_28] : memref<256x128xf32, #tpu.memory_space<vmem>>, vector<256x128xf32>
    tpu.vector_store %arg7[%c0_27, %c0_28], %55 {strides = array<i32>} : memref<256x128xf32, #tpu.memory_space<vmem>>, vector<256x128xf32>,
    %57 = arith.mulf %55, %55 : vector<256x128xf32>
    %cst_29 = arith.constant dense<0.000000e+00> : vector<128xf32>
    %58 = vector.multi_reduction <add>, %55, %cst_29 [0] : vector<256x128xf32> to vector<128xf32>
    %59 = vector.shape_cast %58 : vector<128xf32> to vector<1x128xf32>
    %cst_30 = arith.constant dense<0.000000e+00> : vector<128xf32>
    %60 = vector.multi_reduction <add>, %57, %cst_30 [0] : vector<256x128xf32> to vector<128xf32>
    %61 = vector.shape_cast %60 : vector<128xf32> to vector<1x128xf32>
    %62 = tpu.concatenate %59, %61 in 0 : vector<1x128xf32>, vector<1x128xf32> -> vector<2x128xf32>
    %c0_31 = arith.constant 0 : index
    %c0_32 = arith.constant 0 : index
    %c0_33 = arith.constant 0 : index
    %63 = vector.load %arg8[%c0_31, %c0_32, %c0_33] : memref<1x2x128xf32, #tpu.memory_space<vmem>>, vector<1x2x128xf32>
    %64 = vector.shape_cast %63 : vector<1x2x128xf32> to vector<2x128xf32>
    %65 = vector.shape_cast %62 : vector<2x128xf32> to vector<1x2x128xf32>
    tpu.vector_store %arg8[%c0_31, %c0_32, %c0_33], %65 {strides = array<i32>} : memref<1x2x128xf32, #tpu.memory_space<vmem>>, vector<1x2x128xf32>,
    return
  }
  func.func @transform_0(%arg0: i32) -> (i32, i32) {
    %c0_i32 = arith.constant 0 : i32
    %c0_i32_0 = arith.constant 0 : i32
    return %arg0, %c0_i32 : i32, i32
  }
  func.func @transform_1(%arg0: i32) -> (i32, i32) {
    %c0_i32 = arith.constant 0 : i32
    %c0_i32_0 = arith.constant 0 : i32
    return %arg0, %c0_i32 : i32, i32
  }
  func.func @transform_2(%arg0: i32) -> (i32, i32) {
    %c0_i32 = arith.constant 0 : i32
    %c0_i32_0 = arith.constant 0 : i32
    %c0_i32_1 = arith.constant 0 : i32
    return %c0_i32, %c0_i32_0 : i32, i32
  }
  func.func @transform_3(%arg0: i32) -> (i32, i32) {
    %c0_i32 = arith.constant 0 : i32
    %c0_i32_0 = arith.constant 0 : i32
    %c0_i32_1 = arith.constant 0 : i32
    return %c0_i32, %c0_i32_0 : i32, i32
  }
  func.func @transform_4(%arg0: i32) -> (i32, i32) {
    %c0_i32 = arith.constant 0 : i32
    %c0_i32_0 = arith.constant 0 : i32
    %c0_i32_1 = arith.constant 0 : i32
    return %c0_i32, %c0_i32_0 : i32, i32
  }
  func.func @transform_5(%arg0: i32) -> (i32, i32) {
    %c0_i32 = arith.constant 0 : i32
    %c0_i32_0 = arith.constant 0 : i32
    %c0_i32_1 = arith.constant 0 : i32
    return %c0_i32, %c0_i32_0 : i32, i32
  }
  func.func @transform_6(%arg0: i32) -> (i32, i32) {
    %c0_i32 = arith.constant 0 : i32
    %c0_i32_0 = arith.constant 0 : i32
    return %arg0, %c0_i32 : i32, i32
  }
  func.func @transform_7(%arg0: i32) -> (i32, i32, i32) {
    %c0_i32 = arith.constant 0 : i32
    %c0_i32_0 = arith.constant 0 : i32
    %c0_i32_1 = arith.constant 0 : i32
    return %arg0, %c0_i32, %c0_i32_0 : i32, i32, i32
  }
}

module attributes {stable_mosaic.version = 11 : i64} {
  func.func @_affine_kernel(%arg0: i32, %arg1: memref<256x128xf32, #tpu.memory_space<vmem>>, %arg2: memref<1x128xf32, #tpu.memory_space<vmem>>, %arg3: memref<1x128xf32, #tpu.memory_space<vmem>>, %arg4: memref<256x128xf32, #tpu.memory_space<vmem>>) attributes {dimension_semantics = [#tpu.dimension_semantics<parallel>], iteration_bounds = array<i64: 2>, scalar_prefetch = 0 : i64, scratch_operands = 0 : i64, tpu.core_type = #tpu.core_type<tc>, window_params = [{transform_indices = @transform_0, window_bounds = array<i64: 256, 128>}, {pipeline_mode = #tpu.pipeline_mode<synchronous>, transform_indices = @transform_1, window_bounds = array<i64: 1, 128>}, {pipeline_mode = #tpu.pipeline_mode<synchronous>, transform_indices = @transform_2, window_bounds = array<i64: 1, 128>}, {transform_indices = @transform_3, window_bounds = array<i64: 256, 128>}]} {
    %c0 = arith.constant 0 : index
    %c0_0 = arith.constant 0 : index
    %0 = vector.load %arg2[%c0, %c0_0] : memref<1x128xf32, #tpu.memory_space<vmem>>, vector<1x128xf32>
    %c0_1 = arith.constant 0 : index
    %c0_2 = arith.constant 0 : index
    %1 = vector.load %arg1[%c0_1, %c0_2] : memref<256x128xf32, #tpu.memory_space<vmem>>, vector<256x128xf32>
    %2 = vector.broadcast %0 : vector<1x128xf32> to vector<256x128xf32>
    %3 = arith.mulf %2, %1 : vector<256x128xf32>
    %c0_3 = arith.constant 0 : index
    %c0_4 = arith.constant 0 : index
    %4 = vector.load %arg3[%c0_3, %c0_4] : memref<1x128xf32, #tpu.memory_space<vmem>>, vector<1x128xf32>
    %5 = vector.broadcast %4 : vector<1x128xf32> to vector<256x128xf32>
    %6 = arith.addf %3, %5 : vector<256x128xf32>
    %c0_5 = arith.constant 0 : index
    %c0_6 = arith.constant 0 : index
    %7 = vector.load %arg4[%c0_5, %c0_6] : memref<256x128xf32, #tpu.memory_space<vmem>>, vector<256x128xf32>
    tpu.vector_store %arg4[%c0_5, %c0_6], %6 {strides = array<i32>} : memref<256x128xf32, #tpu.memory_space<vmem>>, vector<256x128xf32>,
    return
  }
  func.func @transform_0(%arg0: i32) -> (i32, i32) {
    %c0_i32 = arith.constant 0 : i32
    %c0_i32_0 = arith.constant 0 : i32
    return %arg0, %c0_i32 : i32, i32
  }
  func.func @transform_1(%arg0: i32) -> (i32, i32) {
    %c0_i32 = arith.constant 0 : i32
    %c0_i32_0 = arith.constant 0 : i32
    %c0_i32_1 = arith.constant 0 : i32
    return %c0_i32, %c0_i32_0 : i32, i32
  }
  func.func @transform_2(%arg0: i32) -> (i32, i32) {
    %c0_i32 = arith.constant 0 : i32
    %c0_i32_0 = arith.constant 0 : i32
    %c0_i32_1 = arith.constant 0 : i32
    return %c0_i32, %c0_i32_0 : i32, i32
  }
  func.func @transform_3(%arg0: i32) -> (i32, i32) {
    %c0_i32 = arith.constant 0 : i32
    %c0_i32_0 = arith.constant 0 : i32
    return %arg0, %c0_i32 : i32, i32
  }
}

</mosaic_0001>

<bundles_post_ra>
// kernel: convmixer_block_forward.5
= control target key start
LH: loop header
LB: loop body
LE: loop exit
PB: predicated region body
PF: predicated region fallthrough
CT: control target
= control target key end

     0   :  { %8 = vsyncpa [#allocation3], 0  ;;  %s785_s0 = inlined_call_operand.vmem [shape: f32[512,128], index: 0, kind: input, shape index: {}]   ;;  %s786_s1 = inlined_call_operand.vmem [shape: f32[1,128], index: 1, kind: input, shape index: {}]   ;;  %s787_s2 = inlined_call_operand.vmem [shape: f32[1,128], index: 2, kind: input, shape index: {}]   ;;  %s788_s3 = inlined_call_operand.hbm [shape: f32[512,128], index: 3, kind: output, shape index: {}]  }
   0x1   :  { %10 = vsyncpa [#allocation3 + $0x1], 0  ;;  %s533_s12 = smov 0   ;;  %s535_s13 = smov 0  }
   0x2   :  { %s537_s14 = smov 0   ;;  %s539_s15 = smov 0  }
   0x3 LB: > { %s554_s16 = sadd.s32 4294967295, %s508_s15   ;;  %s390_s17 = sadd.s32 4294967294, %s508_s15   ;;  %s508_s15 = sphi %s539_s15, %s794_s15   ;;  %s504_s14 = sphi %s537_s14, %s793_s14   ;;  %s500_s13 = sphi %s535_s13, %s792_s13   ;;  %s496_s12 = sphi %s533_s12, %s791_s12  }
   0x4   : > { %s558_s18 = sadd.s32 1, %s508_s15   ;;  %s91_s19 = sadd.s32 1, %s504_s14 }
   0x5   : > { %s88_s20 = ssub.s32 %s508_s15, %s558_s18  ;;  %p101_p0 = scmp.ne.s32.totalorder %s504_s14, %s500_s13 }
   0x6   : > { %p89_p1 = scmp.eq.s32.totalorder %s88_s20, 0  ;;  %p102_p2 = scmp.eq.s32.totalorder %s554_s16, 1 }
   0x7   : > { %p107_p3 = scmp.ne.s32.totalorder %s500_s13, %s496_s12  ;;  %p108_p4 = scmp.eq.s32.totalorder %s390_s17, 1 }
   0x8   : > { %s569_s21 = scalar_select %p89_p1, %s504_s14, %s91_s19  }
   0x9   : > { %p571_p5 = por %p102_p2, %p101_p0  ;;  %p575_p6 = por %p108_p4, %p107_p3 }
   0xa   : > { %p393_p7 = scmp.ge.s32.totalorder %s508_s15, 1  ;;  %p141_p8 = scmp.lt.s32.totalorder %s508_s15, 3 }
   0xc   : > { %p142_p9 = pnand %p393_p7, %p141_p8 }
   0xd   : > { %s395_s24 = sshll.u32 (!%p142_p9), %s554_s16, 5  ;;  %s162_s25 = sand.u32 (!%p142_p9), 1, %s500_s13   ;;  %v586_v0 = vld [vmem:[%s786_s1] ss:$0 sm:$0xff] (!%p142_p9) }
   0xe   : > { %145 = sbr.rel (%p142_p9) target bundleno = 62 (0x3e), region = 32  ;;  %p166_p10 = scmp.lt.s32.totalorder (!%p142_p9), %s395_s24, 63  ;;  %v600_v1 = vld [vmem:[%s787_s2] ss:$0 sm:$0xff] (!%p142_p9) }
   0xf   : > { %s590_s29 = sshll.u32 (!%p142_p9), %s162_s25, 8  ;;  %s404_s9 = sshll.u32 (!%p142_p9), %s554_s16, 12 }
  0x10   : > { %s632_s8 = scalar_lea.vmem (!%p142_p9), [#allocation2], %s590_s29  ;;  %s732_s17 = scalar_lea.hbm (!%p142_p9), %s788_s3, %s404_s9 }
  0x11   : > { %s328_s10 = sshll.u32 (!%p142_p9), %s632_s8, 4  ;;  %s744_s19 = scalar_lea.sflag (!%p142_p9), [#allocation3], %s162_s25  ;;  %s734_s10 = int_to_ptr.vmem [resolvable:$true] %s328_s10 }
  0x12   : > { %s446_s20 = scalar_lea.vmem (!%p142_p9), %s734_s10, 4096 }
  0x13   : > { %p447_p11 = scmp.ne.s32.totalorder (!%p142_p9), %s734_s10, %s446_s20 }
  0x15   : > { %s796_s24 = smov (!%p166_p10, %s395_s24), 63  ;;  %p448_p12 = pnand %p447_p11, %p571_p5 }
  0x16   : > { %s396_s26 = sshll.u32 %s796_s24, 3  ;;  %s510_s24 = smov [#allocation2]  }
  0x17   : > { %s595_s5 = scalar_lea.vmem %s785_s0, %s396_s26  ;;  %p449_p13 = pneg %p448_p12 }
  0x18   : > { %v173_v2 = vld [vmem:[%s595_s5] sm:$0xff]  ;;  %v174_v3 = vld [vmem:[%s595_s5 + $0x8] sm:$0xff]  ;;  %v175_v4 = vld [vmem:[%s595_s5 + $0x10] sm:$0xff]  ;;  %s450_s26 = sshll.u32 %s510_s24, 4  ;;  %s451_s26 = int_to_ptr.vmem [resolvable:$false] %s450_s26 }
  0x19   : > { %v211_v5 = vmul.f32 %v586_v0, %v173_v2  ;;  %v212_v6 = vmul.f32 %v586_v0, %v174_v3  ;;  %v213_v7 = vmul.f32 %v586_v0, %v175_v4  ;;  %v176_v8 = vld [vmem:[%s595_s5 + $0x18] sm:$0xff]  ;;  %v177_v9 = vld [vmem:[%s595_s5 + $0x20] sm:$0xff]  ;;  %v178_v10 = vld [vmem:[%s595_s5 + $0x28] sm:$0xff]  ;;  %s452_s27 = scalar_lea.vmem %s451_s26, 8192  ;;  %p453_p0 = scmp.lt.s32.totalorder %s734_s10, %s451_s26 }
  0x1a   : > { %v214_v11 = vmul.f32 %v586_v0, %v176_v8  ;;  %v215_v12 = vmul.f32 %v586_v0, %v177_v9  ;;  %v216_v13 = vmul.f32 %v586_v0, %v178_v10  ;;  %v179_v14 = vld [vmem:[%s595_s5 + $0x30] sm:$0xff]  ;;  %v180_v15 = vld [vmem:[%s595_s5 + $0x38] sm:$0xff]  ;;  %v181_v16 = vld [vmem:[%s595_s5 + $0x40] sm:$0xff]  ;;  %p454_p1 = scmp.lt.s32.totalorder %s452_s27, %s446_s20 }
  0x1b   : > { %v250_v17 = vadd.f32 %v600_v1, %v211_v5  ;;  %v251_v18 = vadd.f32 %v600_v1, %v212_v6  ;;  %v252_v19 = vadd.f32 %v600_v1, %v213_v7  ;;  %v217_v20 = vmul.f32 %v586_v0, %v179_v14  ;;  %v182_v21 = vld [vmem:[%s595_s5 + $0x48] sm:$0xff]  ;;  %v183_v22 = vld [vmem:[%s595_s5 + $0x50] sm:$0xff]  ;;  %v184_v23 = vld [vmem:[%s595_s5 + $0x58] sm:$0xff] }
  0x1c   : > { %v253_v24 = vadd.f32 %v600_v1, %v214_v11  ;;  %v254_v25 = vadd.f32 %v600_v1, %v215_v12  ;;  %v255_v26 = vadd.f32 %v600_v1, %v216_v13  ;;  %v218_v27 = vmul.f32 %v586_v0, %v180_v15  ;;  %v185_v28 = vld [vmem:[%s595_s5 + $0x60] sm:$0xff]  ;;  %v186_v29 = vld [vmem:[%s595_s5 + $0x68] sm:$0xff]  ;;  %v187_v30 = vld [vmem:[%s595_s5 + $0x70] sm:$0xff]  ;;  %p455_p2 = por %p454_p1, %p453_p0 }
  0x1d   : > { %282 = vst [vmem:[%s632_s8] sm:$0xff] %v250_v17  ;;  %283 = vst [vmem:[%s632_s8 + $0x8] sm:$0xff] %v251_v18  ;;  %v256_v31 = vadd.f32 %v600_v1, %v217_v20  ;;  %v219_v32 = vmul.f32 %v586_v0, %v181_v16  ;;  %v220_v33 = vmul.f32 %v586_v0, %v182_v21  ;;  %v188_v35 = vld [vmem:[%s595_s5 + $0x78] sm:$0xff]  ;;  %v189_v40 = vld [vmem:[%s595_s5 + $0x80] sm:$0xff] }
  0x1e   : > { %284 = vst [vmem:[%s632_s8 + $0x10] sm:$0xff] %v252_v19  ;;  %v221_v34 = vmul.f32 %v586_v0, %v183_v22  ;;  %285 = vst [vmem:[%s632_s8 + $0x18] sm:$0xff] %v253_v24  ;;  %v257_v36 = vadd.f32 %v600_v1, %v218_v27  ;;  %v222_v37 = vmul.f32 %v586_v0, %v184_v23  ;;  %v190_v41 = vld [vmem:[%s595_s5 + $0x88] sm:$0xff]  ;;  %v191_v42 = vld [vmem:[%s595_s5 + $0x90] sm:$0xff]  ;;  %p456_p3 = pnand %p455_p2, %p449_p13 }
  0x1f   : > { %286 = vst [vmem:[%s632_s8 + $0x20] sm:$0xff] %v254_v25  ;;  %287 = vst [vmem:[%s632_s8 + $0x28] sm:$0xff] %v255_v26  ;;  %v223_v38 = vmul.f32 %v586_v0, %v185_v28  ;;  %v224_v39 = vmul.f32 %v586_v0, %v186_v29  ;;  %v258_v43 = vadd.f32 %v600_v1, %v219_v32  ;;  %v192_v47 = vld [vmem:[%s595_s5 + $0x98] sm:$0xff]  ;;  %v193_v48 = vld [vmem:[%s595_s5 + $0xa0] sm:$0xff] }
  0x20   : > { %288 = vst [vmem:[%s632_s8 + $0x30] sm:$0xff] %v256_v31  ;;  %v259_v44 = vadd.f32 %v600_v1, %v220_v33  ;;  %v260_v45 = vadd.f32 %v600_v1, %v221_v34  ;;  %v225_v46 = vmul.f32 %v586_v0, %v187_v30  ;;  %v194_v49 = vld [vmem:[%s595_s5 + $0xa8] sm:$0xff]  ;;  %289 = vst [vmem:[%s632_s8 + $0x38] sm:$0xff] %v257_v36  ;;  %v195_v54 = vld [vmem:[%s595_s5 + $0xb0] sm:$0xff] }
  0x21   : > { %v261_v50 = vadd.f32 %v600_v1, %v222_v37  ;;  %v262_v51 = vadd.f32 %v600_v1, %v223_v38  ;;  %v263_v52 = vadd.f32 %v600_v1, %v224_v39  ;;  %v226_v53 = vmul.f32 %v586_v0, %v188_v35  ;;  %290 = vst [vmem:[%s632_s8 + $0x40] sm:$0xff] %v258_v43  ;;  %v196_v59 = vld [vmem:[%s595_s5 + $0xb8] sm:$0xff]  ;;  %v197_v2 = vld [vmem:[%s595_s5 + $0xc0] sm:$0xff]  ;;  %v198_v3 = vld [vmem:[%s595_s5 + $0xc8] sm:$0xff] }
  0x22   : > { %291 = vst [vmem:[%s632_s8 + $0x48] sm:$0xff] %v259_v44  ;;  %292 = vst [vmem:[%s632_s8 + $0x50] sm:$0xff] %v260_v45  ;;  %v264_v55 = vadd.f32 %v600_v1, %v225_v46  ;;  %v227_v56 = vmul.f32 %v586_v0, %v189_v40  ;;  %v228_v57 = vmul.f32 %v586_v0, %v190_v41  ;;  %v199_v4 = vld [vmem:[%s595_s5 + $0xd0] sm:$0xff]  ;;  %v200_v9 = vld [vmem:[%s595_s5 + $0xd8] sm:$0xff] }
  0x23   : > { %v229_v58 = vmul.f32 %v586_v0, %v191_v42  ;;  %293 = vst [vmem:[%s632_s8 + $0x58] sm:$0xff] %v261_v50  ;;  %294 = vst [vmem:[%s632_s8 + $0x60] sm:$0xff] %v262_v51  ;;  %v265_v60 = vadd.f32 %v600_v1, %v226_v53  ;;  %v230_v61 = vmul.f32 %v586_v0, %v192_v47  ;;  %v201_v10 = vld [vmem:[%s595_s5 + $0xe0] sm:$0xff]  ;;  %v202_v11 = vld [vmem:[%s595_s5 + $0xe8] sm:$0xff] }
  0x24   : > { %295 = vst [vmem:[%s632_s8 + $0x68] sm:$0xff] %v263_v52  ;;  %v231_v62 = vmul.f32 %v586_v0, %v193_v48  ;;  %v232_v63 = vmul.f32 %v586_v0, %v194_v49  ;;  %296 = vst [vmem:[%s632_s8 + $0x70] sm:$0xff] %v264_v55  ;;  %v266_v5 = vadd.f32 %v600_v1, %v227_v56  ;;  %v203_v16 = vld [vmem:[%s595_s5 + $0xf0] sm:$0xff]  ;;  %v204_v21 = vld [vmem:[%s595_s5 + $0xf8] sm:$0xff] }
  0x25   : > { %v267_v6 = vadd.f32 %v600_v1, %v228_v57  ;;  %v268_v7 = vadd.f32 %v600_v1, %v229_v58  ;;  %v233_v8 = vmul.f32 %v586_v0, %v195_v54  ;;  %297 = vst [vmem:[%s632_s8 + $0x78] sm:$0xff] %v265_v60  ;;  %v269_v12 = vadd.f32 %v600_v1, %v230_v61 }
  0x26   : > { %v270_v13 = vadd.f32 %v600_v1, %v231_v62  ;;  %v271_v14 = vadd.f32 %v600_v1, %v232_v63  ;;  %v234_v15 = vmul.f32 %v586_v0, %v196_v59  ;;  %298 = vst [vmem:[%s632_s8 + $0x80] sm:$0xff] %v266_v5  ;;  %v235_v18 = vmul.f32 %v586_v0, %v197_v2 }
  0x27   : > { %299 = vst [vmem:[%s632_s8 + $0x88] sm:$0xff] %v267_v6  ;;  %300 = vst [vmem:[%s632_s8 + $0x90] sm:$0xff] %v268_v7  ;;  %v272_v17 = vadd.f32 %v600_v1, %v233_v8  ;;  %v236_v19 = vmul.f32 %v586_v0, %v198_v3  ;;  %v237_v20 = vmul.f32 %v586_v0, %v199_v4 }
  0x28   : > { %301 = vst [vmem:[%s632_s8 + $0x98] sm:$0xff] %v269_v12  ;;  %302 = vst [vmem:[%s632_s8 + $0xa0] sm:$0xff] %v270_v13  ;;  %v273_v22 = vadd.f32 %v600_v1, %v234_v15  ;;  %v238_v23 = vmul.f32 %v586_v0, %v200_v9  ;;  %v239_v24 = vmul.f32 %v586_v0, %v201_v10 }
  0x29   : > { %303 = vst [vmem:[%s632_s8 + $0xa8] sm:$0xff] %v271_v14  ;;  %v240_v25 = vmul.f32 %v586_v0, %v202_v11  ;;  %304 = vst [vmem:[%s632_s8 + $0xb0] sm:$0xff] %v272_v17  ;;  %v274_v26 = vadd.f32 %v600_v1, %v235_v18  ;;  %v275_v27 = vadd.f32 %v600_v1, %v236_v19 }
  0x2a   : > { %v276_v28 = vadd.f32 %v600_v1, %v237_v20  ;;  %v241_v29 = vmul.f32 %v586_v0, %v203_v16  ;;  %305 = vst [vmem:[%s632_s8 + $0xb8] sm:$0xff] %v273_v22  ;;  %v277_v30 = vadd.f32 %v600_v1, %v238_v23  ;;  %v278_v31 = vadd.f32 %v600_v1, %v239_v24 }
  0x2b   : > { %v279_v32 = vadd.f32 %v600_v1, %v240_v25  ;;  %v242_v33 = vmul.f32 %v586_v0, %v204_v21  ;;  %306 = vst [vmem:[%s632_s8 + $0xc0] sm:$0xff] %v274_v26  ;;  %307 = vst [vmem:[%s632_s8 + $0xc8] sm:$0xff] %v275_v27 }
  0x2c   : > { %308 = vst [vmem:[%s632_s8 + $0xd0] sm:$0xff] %v276_v28  ;;  %v280_v34 = vadd.f32 %v600_v1, %v241_v29  ;;  %309 = vst [vmem:[%s632_s8 + $0xd8] sm:$0xff] %v277_v30 }
  0x2d   : > { %310 = vst [vmem:[%s632_s8 + $0xe0] sm:$0xff] %v278_v31  ;;  %311 = vst [vmem:[%s632_s8 + $0xe8] sm:$0xff] %v279_v32  ;;  %v281_v0 = vadd.f32 %v600_v1, %v242_v33 }
  0x2e   : > { %312 = vst [vmem:[%s632_s8 + $0xf0] sm:$0xff] %v280_v34 }
  0x2f   : > { %313 = vst [vmem:[%s632_s8 + $0xf8] sm:$0xff] %v281_v0 }
  0x30   : > { %459 = shalt.err (!%p456_p3)
}
  0x31   : > { %s460_s25 = scalar_lea.hbm %s732_s17, 4096  ;;  %s464_s30 = scalar_lea.hbm %s788_s3, 8192 }
  0x32   : > { %p461_p4 = scmp.ne.s32.totalorder %s732_s17, %s460_s25  ;;  %p465_p9 = scmp.lt.u32.totalorder %s732_s17, %s788_s3 }
  0x33   : > { %p466_p10 = scmp.lt.u32.totalorder %s464_s30, %s460_s25  ;;  %p468_p12 = scmp.lt.u32.totalorder %s460_s25, %s732_s17 }
  0x34   : > { %p462_p7 = pnand %p461_p4, %p571_p5 }
  0x35   : > { %p467_p11 = por %p466_p10, %p465_p9 }
  0x36   : > { %p463_p8 = pneg %p462_p7 }
  0x37   : > { %p469_p13 = por %p468_p12, %p467_p11 }
  0x39   : > { %p470_p0 = pnand %p469_p13, %p463_p8 }
  0x3b   : > { %473 = shalt.err (!%p470_p0)
}
  0x3c   : > { %s511_s6 = smov 128   ;;  %s512_s7 = smov 8  }
  0x3d   : > { %405 = dma.vmem_to_hbm [thread:$0]  (%p571_p5), %s734_s10, 4096, %s732_s17, %s744_s19, %s511_s6, %s511_s6, %s512_s7  }
  0x3e PF: > { %p411_p1 = scmp.ge.s32.totalorder %s508_s15, 2  ;;  %s343_s8 = sand.u32 1, %s496_s12  }
  0x3f   : > { %s344_s9 = scalar_lea.sflag [#allocation3], %s343_s8 }
  0x40   : > { %p408_p2 = pnand %p411_p1, %p575_p6 }
  0x42   : > { %491 = dma.done.wait (!%p408_p2), %s344_s9, 4096  }
  0x43   : > { %493 = vsyncadd (!%p408_p2), %s344_s9, 4294963200  ;;  %p13_p3 = scmp.ge.s32.totalorder %s558_s18, 4   ;;  %s791_s12 = smov %s500_s13 }
  0x44   : > { %s792_s13 = smov %s504_s14  ;;  %s793_s14 = smov %s569_s21 }
  0x45   : > { %s794_s15 = smov %s558_s18  ;;  %15 = sbr.rel (!%p13_p3) target bundleno = 3 (0x3), region = 67 }
  0x4c   :  { %349 = vsyncpa [#allocation3], 1 }
  0x4d   :  { %351 = vsyncpa [#allocation3 + $0x1], 1 }

// kernel: convmixer_block_forward.4
= control target key start
LH: loop header
LB: loop body
LE: loop exit
PB: predicated region body
PF: predicated region fallthrough
CT: control target
= control target key end

     0   :  { %s2157_s24 = smov 0   ;;  %s3241_s0 = inlined_call_operand.vmem [shape: f32[512,128], index: 0, kind: input, shape index: {}]   ;;  %s3242_s1 = inlined_call_operand.vmem [shape: f32[512,128], index: 1, kind: input, shape index: {}]   ;;  %s3243_s2 = inlined_call_operand.vmem [shape: f32[1,128], index: 2, kind: input, shape index: {}]   ;;  %s3244_s3 = inlined_call_operand.vmem [shape: f32[1,128], index: 3, kind: input, shape index: {}]   ;;  %s3245_s4 = inlined_call_operand.vmem [shape: bf16[128,128], index: 4, kind: input, shape index: {}]   ;;  %s3246_s5 = inlined_call_operand.vmem [shape: f32[1,128], index: 5, kind: input, shape index: {}]   ;;  %s3247_s6 = inlined_call_operand.vmem [shape: f32[512,128], index: 6, kind: output, shape index: {0}]   ;;  %s3248_s7 = inlined_call_operand.vmem [shape: f32[2,2,128], index: 7, kind: output, shape index: {1}]  }
   0x1 LB: > { %s2163_s25 = sadd.s32 4294967295, %s2114_s24   ;;  %p1846_p0 = scmp.ge.s32.totalorder %s2114_s24, 1  ;;  %s2114_s24 = sphi %s2157_s24, %s18_s24  }
   0x2   : > { %p252_p1 = scmp.lt.s32.totalorder %s2114_s24, 3 }
   0x4   : > { %p253_p2 = pnand %p1846_p0, %p252_p1 }
   0x6   : > { %256 = sbr.rel (%p253_p2) target bundleno = 553 (0x229), region = 44 }
   0xd   : > { %v1964_v0 = vld [vmem:[%s3245_s4] sm:$0xff]   ;;  %s1847_s28 = sshll.u32 %s2163_s25, 5  ;;  %v1965_v1 = vld [vmem:[%s3245_s4 + $0x8] sm:$0xff]   ;;  %v1966_v2 = vld [vmem:[%s3245_s4 + $0x10] sm:$0xff]   ;;  %p311_p4 = scmp.lt.s32.totalorder %s2163_s25, 1 }
   0xe   : > { %p294_p3 = scmp.lt.s32.totalorder %s1847_s28, 63  ;;  %1891 = vmatprep.subr.bf16.mxu0 %v1964_v0  ;;  %1939 = vmatprep.subr.bf16.mxu1 %v1964_v0  ;;  %v1967_v3 = vld [vmem:[%s3245_s4 + $0x18] sm:$0xff]   ;;  %v2198_v5 = vld [vmem:[%s3243_s2] ss:$0 sm:$0xff]  ;;  %v1969_v33 = vld [vmem:[%s3245_s4 + $0x28] sm:$0xff]  }
   0xf   : > { %1892 = vmatpush3.bf16.msra.mxu0 %v1964_v0  ;;  %1947 = vmatpush3.bf16.msra.mxu1 %v1964_v0  ;;  %v2210_v13 = vld [vmem:[%s3244_s3] ss:$0 sm:$0xff]  ;;  %v1970_v52 = vld [vmem:[%s3245_s4 + $0x30] sm:$0xff]   ;;  %s3269_s25 = smov (!%p311_p4, %s2163_s25), 1 }
  0x10   : > { %s3267_s28 = smov (!%p294_p3, %s1847_s28), 63  ;;  %1893 = vmatprep.subr.bf16.mxu0 %v1965_v1  ;;  %1940 = vmatprep.subr.bf16.mxu1 %v1965_v1  ;;  %v1968_v17 = vld [vmem:[%s3245_s4 + $0x20] sm:$0xff]   ;;  %s1853_s17 = sshll.u32 %s3269_s25, 1 }
  0x11   : > { %s2177_s10 = sshll.u32 %s3267_s28, 3  ;;  %s314_s20 = scalar_lea.vmem %s3248_s7, %s1853_s17 }
  0x12   : > { %s2183_s13 = scalar_lea.vmem %s3241_s0, %s2177_s10  ;;  %s2189_s16 = scalar_lea.vmem %s3242_s1, %s2177_s10 }
  0x13   : > { %1894 = vmatpush3.bf16.msra.mxu0 %v1965_v1  ;;  %1948 = vmatpush3.bf16.msra.mxu1 %v1965_v1  ;;  %v316_v4 = vld [vmem:[%s2183_s13] sm:$0xff]  ;;  %v317_v6 = vld [vmem:[%s2183_s13 + $0x8] sm:$0xff]  ;;  %v351_v21 = vld [vmem:[%s2189_s16 + $0x10] sm:$0xff]  ;;  %s2534_s15 = scalar_lea.vmem %s3247_s6, %s2177_s10 }
  0x14   : > { %1895 = vmatprep.subr.bf16.mxu0 %v1966_v2  ;;  %1941 = vmatprep.subr.bf16.mxu1 %v1966_v2  ;;  %v349_v7 = vld [vmem:[%s2189_s16] sm:$0xff]  ;;  %v350_v8 = vld [vmem:[%s2189_s16 + $0x8] sm:$0xff]  ;;  %v352_v23 = vld [vmem:[%s2189_s16 + $0x18] sm:$0xff]  ;;  %v389_v31 = vmul.f32 %v2198_v5, %v351_v21 }
  0x15   : > { %v387_v9 = vmul.f32 %v2198_v5, %v349_v7  ;;  %v388_v10 = vmul.f32 %v2198_v5, %v350_v8  ;;  %v332_v11 = vld [vmem:[%s2183_s13 + $0x80] sm:$0xff]  ;;  %v333_v14 = vld [vmem:[%s2183_s13 + $0x88] sm:$0xff]  ;;  %v367_v27 = vld [vmem:[%s2189_s16 + $0x90] sm:$0xff]  ;;  %v390_v37 = vmul.f32 %v2198_v5, %v352_v23 }
  0x16   : > { %v365_v12 = vld [vmem:[%s2189_s16 + $0x80] sm:$0xff]  ;;  %v366_v15 = vld [vmem:[%s2189_s16 + $0x88] sm:$0xff]  ;;  %v368_v28 = vld [vmem:[%s2189_s16 + $0x98] sm:$0xff]  ;;  %v405_v40 = vmul.f32 %v2198_v5, %v367_v27 }
  0x17   : > { %1896 = vmatpush3.bf16.msra.mxu0 %v1966_v2  ;;  %1949 = vmatpush3.bf16.msra.mxu1 %v1966_v2  ;;  %v403_v16 = vmul.f32 %v2198_v5, %v365_v12  ;;  %v419_v18 = vadd.f32 %v387_v9, %v316_v4  ;;  %v420_v19 = vadd.f32 %v388_v10, %v317_v6  ;;  %v353_v29 = vld [vmem:[%s2189_s16 + $0x20] sm:$0xff]  ;;  %v354_v32 = vld [vmem:[%s2189_s16 + $0x28] sm:$0xff]  ;;  %v318_v36 = vld [vmem:[%s2183_s13 + $0x10] sm:$0xff] }
  0x18   : > { %1897 = vmatprep.subr.bf16.mxu0 %v1967_v3  ;;  %1942 = vmatprep.subr.bf16.mxu1 %v1967_v3  ;;  %v404_v20 = vmul.f32 %v2198_v5, %v366_v15  ;;  %v369_v38 = vld [vmem:[%s2189_s16 + $0xa0] sm:$0xff]  ;;  %v319_v39 = vld [vmem:[%s2183_s13 + $0x18] sm:$0xff]  ;;  %v406_v41 = vmul.f32 %v2198_v5, %v368_v28  ;;  %v391_v42 = vmul.f32 %v2198_v5, %v353_v29  ;;  %v370_v43 = vld [vmem:[%s2189_s16 + $0xa8] sm:$0xff] }
  0x19   : > { %v435_v22 = vadd.f32 %v403_v16, %v332_v11  ;;  %v458_v24 = vadd.f32 %v2210_v13, %v419_v18  ;;  %v459_v25 = vadd.f32 %v2210_v13, %v420_v19  ;;  %v334_v45 = vld [vmem:[%s2183_s13 + $0x90] sm:$0xff]  ;;  %v335_v46 = vld [vmem:[%s2183_s13 + $0x98] sm:$0xff]  ;;  %v320_v47 = vld [vmem:[%s2183_s13 + $0x20] sm:$0xff]  ;;  %v392_v48 = vmul.f32 %v2198_v5, %v354_v32 }
  0x1a   : > { %v436_v26 = vadd.f32 %v404_v20, %v333_v14  ;;  %v421_v49 = vadd.f32 %v389_v31, %v318_v36  ;;  %v321_v50 = vld [vmem:[%s2183_s13 + $0x28] sm:$0xff]  ;;  %v407_v51 = vmul.f32 %v2198_v5, %v369_v38  ;;  %v422_v53 = vadd.f32 %v390_v37, %v319_v39  ;;  %v336_v54 = vld [vmem:[%s2183_s13 + $0xa0] sm:$0xff]  ;;  %v355_v60 = vld [vmem:[%s2189_s16 + $0x30] sm:$0xff] }
  0x1b   : > { %1898 = vmatpush3.bf16.msra.mxu0 %v1967_v3  ;;  %1950 = vmatpush3.bf16.msra.mxu1 %v1967_v3  ;;  %v474_v30 = vadd.f32 %v2210_v13, %v435_v22  ;;  %v490_v34 = vpack.c.bf16 %v459_v25, %v458_v24  ;;  %v337_v55 = vld [vmem:[%s2183_s13 + $0xa8] sm:$0xff]  ;;  %v408_v56 = vmul.f32 %v2198_v5, %v370_v43  ;;  %v356_v61 = vld [vmem:[%s2189_s16 + $0x38] sm:$0xff]  ;;  %v371_v63 = vld [vmem:[%s2189_s16 + $0xb0] sm:$0xff] }
  0x1c   : > { %1899 = vmatprep.subr.bf16.mxu0 %v1968_v17  ;;  %1943 = vmatprep.subr.bf16.mxu1 %v1968_v17  ;;  %v475_v35 = vadd.f32 %v2210_v13, %v436_v26  ;;  %v437_v57 = vadd.f32 %v405_v40, %v334_v45  ;;  %v438_v58 = vadd.f32 %v406_v41, %v335_v46  ;;  %v372_v3 = vld [vmem:[%s2189_s16 + $0xb8] sm:$0xff]  ;;  %v357_v4 = vld [vmem:[%s2189_s16 + $0x40] sm:$0xff]  ;;  %v358_v6 = vld [vmem:[%s2189_s16 + $0x48] sm:$0xff] }
  0x1d   : > { %1907 = vmatprep.mubr.bf16.mxu0 %v490_v34  ;;  %v423_v59 = vadd.f32 %v391_v42, %v320_v47  ;;  %v424_v62 = vadd.f32 %v392_v48, %v321_v50  ;;  %v2257_v0 = vadd.f32 %v2210_v13, %v421_v49  ;;  %v439_v1 = vadd.f32 %v407_v51, %v336_v54  ;;  %v1971_v7 = vld [vmem:[%s3245_s4 + $0x38] sm:$0xff]   ;;  %v373_v11 = vld [vmem:[%s2189_s16 + $0xc0] sm:$0xff]  ;;  %v322_v16 = vld [vmem:[%s2183_s13 + $0x30] sm:$0xff] }
  0x1e   : > { %v498_v44 = vpack.c.bf16 %v475_v35, %v474_v30  ;;  %v440_v2 = vadd.f32 %v408_v56, %v337_v55  ;;  %v461_v8 = vadd.f32 %v2210_v13, %v422_v53  ;;  %v393_v9 = vmul.f32 %v2198_v5, %v355_v60  ;;  %v374_v19 = vld [vmem:[%s2189_s16 + $0xc8] sm:$0xff]  ;;  %v338_v21 = vld [vmem:[%s2183_s13 + $0xb0] sm:$0xff]  ;;  %v339_v27 = vld [vmem:[%s2183_s13 + $0xb8] sm:$0xff] }
  0x1f   : > { %1900 = vmatpush3.bf16.msra.mxu0 %v1968_v17  ;;  %1951 = vmatpush3.bf16.msra.mxu1 %v1968_v17  ;;  %v394_v10 = vmul.f32 %v2198_v5, %v356_v61  ;;  %v476_v12 = vadd.f32 %v2210_v13, %v437_v57  ;;  %v477_v14 = vadd.f32 %v2210_v13, %v438_v58  ;;  %v323_v17 = vld [vmem:[%s2183_s13 + $0x38] sm:$0xff]  ;;  %v324_v28 = vld [vmem:[%s2183_s13 + $0x40] sm:$0xff]  ;;  %v325_v29 = vld [vmem:[%s2183_s13 + $0x48] sm:$0xff] }
  0x20   : > { %1901 = vmatprep.subr.bf16.mxu0 %v1969_v33  ;;  %1944 = vmatprep.subr.bf16.mxu1 %v1969_v33  ;;  %v2272_v15 = vadd.f32 %v2210_v13, %v423_v59  ;;  %v409_v18 = vmul.f32 %v2198_v5, %v371_v63  ;;  %v463_v20 = vadd.f32 %v2210_v13, %v424_v62  ;;  %v341_v34 = vld [vmem:[%s2183_s13 + $0xc8] sm:$0xff]  ;;  %v359_v39 = vld [vmem:[%s2189_s16 + $0x50] sm:$0xff]  ;;  %v360_v40 = vld [vmem:[%s2189_s16 + $0x58] sm:$0xff] }
  0x21   : > { %1923 = vmatprep.mubr.bf16.mxu1 %v498_v44  ;;  %v410_v22 = vmul.f32 %v2198_v5, %v372_v3  ;;  %v395_v23 = vmul.f32 %v2198_v5, %v357_v4  ;;  %v396_v24 = vmul.f32 %v2198_v5, %v358_v6  ;;  %v478_v25 = vadd.f32 %v2210_v13, %v439_v1  ;;  %v375_v45 = vld [vmem:[%s2189_s16 + $0xd0] sm:$0xff]  ;;  %v376_v46 = vld [vmem:[%s2189_s16 + $0xd8] sm:$0xff]  ;;  %v361_v47 = vld [vmem:[%s2189_s16 + $0x60] sm:$0xff] }
  0x22   : > { %v479_v26 = vadd.f32 %v2210_v13, %v440_v2  ;;  %v411_v30 = vmul.f32 %v2198_v5, %v373_v11  ;;  %v425_v31 = vadd.f32 %v393_v9, %v322_v16  ;;  %v426_v32 = vadd.f32 %v394_v10, %v323_v17  ;;  %v326_v53 = vld [vmem:[%s2183_s13 + $0x50] sm:$0xff]  ;;  %v362_v56 = vld [vmem:[%s2189_s16 + $0x68] sm:$0xff]  ;;  %v327_v58 = vld [vmem:[%s2183_s13 + $0x58] sm:$0xff] }
  0x23   : > { %1902 = vmatpush3.bf16.msra.mxu0 %v1969_v33  ;;  %1952 = vmatpush3.bf16.msra.mxu1 %v1969_v33  ;;  %v340_v33 = vld [vmem:[%s2183_s13 + $0xc0] sm:$0xff]  ;;  %v412_v35 = vmul.f32 %v2198_v5, %v374_v19  ;;  %v491_v36 = vpack.c.bf16 %v461_v8, %v2257_v0  ;;  %v499_v37 = vpack.c.bf16 %v477_v14, %v476_v12  ;;  %v378_v63 = vld [vmem:[%s2189_s16 + $0xe8] sm:$0xff]  ;;  %v342_v3 = vld [vmem:[%s2183_s13 + $0xd0] sm:$0xff] }
  0x24   : > { %1903 = vmatprep.subr.bf16.mxu0 %v1970_v52  ;;  %1945 = vmatprep.subr.bf16.mxu1 %v1970_v52  ;;  %v441_v38 = vadd.f32 %v409_v18, %v338_v21  ;;  %v492_v41 = vpack.c.bf16 %v463_v20, %v2272_v15  ;;  %v442_v42 = vadd.f32 %v410_v22, %v339_v27  ;;  %v377_v62 = vld [vmem:[%s2189_s16 + $0xe0] sm:$0xff]  ;;  %v343_v4 = vld [vmem:[%s2183_s13 + $0xd8] sm:$0xff]  ;;  %v329_v12 = vld [vmem:[%s2183_s13 + $0x68] sm:$0xff] }
  0x25   : > { %v427_v43 = vadd.f32 %v395_v23, %v324_v28  ;;  %v428_v44 = vadd.f32 %v396_v24, %v325_v29  ;;  %v500_v48 = vpack.c.bf16 %v479_v26, %v478_v25  ;;  %v443_v49 = vadd.f32 %v411_v30, %v340_v33  ;;  %v328_v6 = vld [vmem:[%s2183_s13 + $0x60] sm:$0xff]  ;;  %v345_v15 = vld [vmem:[%s2183_s13 + $0xe8] sm:$0xff]  ;;  %v363_v24 = vld [vmem:[%s2189_s16 + $0x70] sm:$0xff] }
  0x26   : > { %v444_v50 = vadd.f32 %v412_v35, %v341_v34  ;;  %v464_v51 = vadd.f32 %v2210_v13, %v425_v31  ;;  %v397_v54 = vmul.f32 %v2198_v5, %v359_v39  ;;  %v398_v55 = vmul.f32 %v2198_v5, %v360_v40  ;;  %v344_v14 = vld [vmem:[%s2183_s13 + $0xe0] sm:$0xff]  ;;  %v364_v29 = vld [vmem:[%s2189_s16 + $0x78] sm:$0xff]  ;;  %v379_v30 = vld [vmem:[%s2189_s16 + $0xf0] sm:$0xff] }
  0x27   : > { %1904 = vmatpush3.bf16.msra.mxu0 %v1970_v52  ;;  %1953 = vmatpush3.bf16.msra.mxu1 %v1970_v52  ;;  %v465_v52 = vadd.f32 %v2210_v13, %v426_v32  ;;  %v480_v57 = vadd.f32 %v2210_v13, %v441_v38  ;;  %v413_v59 = vmul.f32 %v2198_v5, %v375_v45  ;;  %v380_v31 = vld [vmem:[%s2189_s16 + $0xf8] sm:$0xff]  ;;  %v330_v38 = vld [vmem:[%s2183_s13 + $0x70] sm:$0xff] }
  0x28   : > { %1905 = vmatprep.subr.bf16.mxu0 %v1971_v7  ;;  %1946 = vmatprep.subr.bf16.mxu1 %v1971_v7  ;;  %v414_v60 = vmul.f32 %v2198_v5, %v376_v46  ;;  %v399_v61 = vmul.f32 %v2198_v5, %v361_v47  ;;  %v481_v0 = vadd.f32 %v2210_v13, %v442_v42  ;;  %v331_v45 = vld [vmem:[%s2183_s13 + $0x78] sm:$0xff]  ;;  %v346_v46 = vld [vmem:[%s2183_s13 + $0xf0] sm:$0xff] }
  0x29   : > { %v466_v1 = vadd.f32 %v2210_v13, %v427_v43  ;;  %v467_v2 = vadd.f32 %v2210_v13, %v428_v44  ;;  %v483_v8 = vadd.f32 %v2210_v13, %v444_v50  ;;  %v400_v9 = vmul.f32 %v2198_v5, %v362_v56  ;;  %v347_v47 = vld [vmem:[%s2183_s13 + $0xf8] sm:$0xff] }
  0x2a   : > { %v429_v10 = vadd.f32 %v397_v54, %v326_v53  ;;  %v430_v11 = vadd.f32 %v398_v55, %v327_v58  ;;  %v415_v16 = vmul.f32 %v2198_v5, %v377_v62  ;;  %v416_v17 = vmul.f32 %v2198_v5, %v378_v63 }
  0x2b   : > { %1906 = vmatpush3.bf16.msra.mxu0 %v1971_v7  ;;  %1954 = vmatpush3.bf16.msra.mxu1 %v1971_v7  ;;  %v482_v7 = vadd.f32 %v2210_v13, %v443_v49  ;;  %v445_v18 = vadd.f32 %v413_v59, %v342_v3  ;;  %v446_v19 = vadd.f32 %v414_v60, %v343_v4 }
  0x2c   : > { %v431_v20 = vadd.f32 %v399_v61, %v328_v6  ;;  %v493_v21 = vpack.c.bf16 %v465_v52, %v464_v51  ;;  %v501_v22 = vpack.c.bf16 %v481_v0, %v480_v57  ;;  %v494_v23 = vpack.c.bf16 %v467_v2, %v466_v1  ;;  %v2353_v61 = vld [vmem:[%s3246_s5] ss:$0 sm:$0xff] }
  0x2d   : > { %v502_v25 = vpack.c.bf16 %v483_v8, %v482_v7  ;;  %v432_v26 = vadd.f32 %v400_v9, %v329_v12  ;;  %v447_v27 = vadd.f32 %v415_v16, %v344_v14  ;;  %v448_v28 = vadd.f32 %v416_v17, %v345_v15 }
  0x2e   : > { %1908 = vmatmul.mubr.bf16.vlgmr.msra.gmra.mrb[0].mxu0 %v491_v36  ;;  %1924 = vmatmul.mubr.bf16.vlgmr.msra.gmra.mrb[0].mxu1 %v499_v37  ;;  %v468_v32 = vadd.f32 %v2210_v13, %v429_v10  ;;  %v469_v33 = vadd.f32 %v2210_v13, %v430_v11  ;;  %v484_v34 = vadd.f32 %v2210_v13, %v445_v18 }
  0x2f   : > { %1911 = vmatprep.mubr.bf16.mxu0 %v492_v41  ;;  %1927 = vmatprep.mubr.bf16.mxu1 %v500_v48  ;;  %v485_v35 = vadd.f32 %v2210_v13, %v446_v19  ;;  %v470_v36 = vadd.f32 %v2210_v13, %v431_v20  ;;  %v401_v37 = vmul.f32 %v2198_v5, %v363_v24 }
  0x30   : > { %v402_v39 = vmul.f32 %v2198_v5, %v364_v29  ;;  %v417_v40 = vmul.f32 %v2198_v5, %v379_v30  ;;  %v418_v41 = vmul.f32 %v2198_v5, %v380_v31  ;;  %v471_v42 = vadd.f32 %v2210_v13, %v432_v26 }
  0x31   : > { %v486_v43 = vadd.f32 %v2210_v13, %v447_v27  ;;  %v487_v44 = vadd.f32 %v2210_v13, %v448_v28  ;;  %v495_v48 = vpack.c.bf16 %v469_v33, %v468_v32  ;;  %v433_v49 = vadd.f32 %v401_v37, %v330_v38 }
  0x32   : > { %v503_v50 = vpack.c.bf16 %v485_v35, %v484_v34  ;;  %v434_v51 = vadd.f32 %v402_v39, %v331_v45  ;;  %v449_v52 = vadd.f32 %v417_v40, %v346_v46  ;;  %v450_v53 = vadd.f32 %v418_v41, %v347_v47 }
  0x33   : > { %v496_v54 = vpack.c.bf16 %v471_v42, %v470_v36  ;;  %v504_v55 = vpack.c.bf16 %v487_v44, %v486_v43  ;;  %v472_v5 = vadd.f32 %v2210_v13, %v433_v49 }
  0x34   : > { %v473_v56 = vadd.f32 %v2210_v13, %v434_v51  ;;  %v488_v57 = vadd.f32 %v2210_v13, %v449_v52  ;;  %v489_v58 = vadd.f32 %v2210_v13, %v450_v53 }
  0x36   : > { %1912 = vmatmul.mubr.bf16.gmra.mrb[4].mxu0 %v493_v21  ;;  %1928 = vmatmul.mubr.bf16.gmra.mrb[4].mxu1 %v501_v22  ;;  %v497_v59 = vpack.c.bf16 %v473_v56, %v472_v5  ;;  %v505_v60 = vpack.c.bf16 %v489_v58, %v488_v57 }
  0x37   : > { %1915 = vmatprep.mubr.bf16.mxu0 %v494_v23  ;;  %1931 = vmatprep.mubr.bf16.mxu1 %v502_v25 }
  0x3e   : > { %1916 = vmatmul.mubr.bf16.gmra.mrb[8].mxu0 %v495_v48  ;;  %1932 = vmatmul.mubr.bf16.gmra.mrb[8].mxu1 %v503_v50 }
  0x3f   : > { %1919 = vmatprep.mubr.bf16.mxu0 %v496_v54  ;;  %1935 = vmatprep.mubr.bf16.mxu1 %v504_v55 }
  0x46   : > { %1920 = vmatmul.mubr.bf16.gmra.mrb[12].mxu0 %v497_v59  ;;  %1936 = vmatmul.mubr.bf16.gmra.mrb[12].mxu1 %v505_v60  ;;  %v3249_v59 = vmov -1.0  }
 0x101   : > { %v1909_v62 = vpop.f32.mrb[0].mxu0  ;;  %v1925_v63 = vpop.f32.mrb[0].mxu1 }
 0x102   : > { %v620_v0 = vadd.f32 %v1909_v62, %v2353_v61  ;;  %v684_v1 = vadd.f32 %v1925_v63, %v2353_v61  ;;  %v611_v2 = vpop.f32.mrb[1].mxu0  ;;  %v675_v3 = vpop.f32.mrb[1].mxu1 }
 0x103   : > { %v612_v13 = vadd.f32 %v2353_v61, %v611_v2  ;;  %v676_v4 = vadd.f32 %v2353_v61, %v675_v3  ;;  %v1910_v6 = vpop.f32.mrb[2].mxu0  ;;  %v1926_v7 = vpop.f32.mrb[2].mxu1 }
 0x104   : > { %v772_v8 = vmul.f32 0.70710677, %v620_v0  ;;  %v2359_v9 = vmul.f32 0.70710677, %v684_v1  ;;  %v614_v16 = vpop.f32.mrb[3].mxu0  ;;  %v678_v22 = vpop.f32.mrb[3].mxu1  ;;  %v2377_v33 = vadd.f32 %v1910_v6, %v2353_v61  ;;  %v2393_v43 = vadd.f32 %v1926_v7, %v2353_v61 }
 0x105   : > { %v2361_v10 = vmul.f32 0.70710677, %v612_v13  ;;  %v2365_v15 = vmul.f32 0.70710677, %v676_v4  ;;  %v2385_v40 = vmul.f32 0.5, %v620_v0  ;;  %v2387_v41 = vmul.f32 0.5, %v684_v1 }
 0x106   : > { %v868_v11 = vand.u32 2147483647, %v772_v8  ;;  %v884_v12 = vand.u32 2147483647, %v2359_v9  ;;  %v2390_v42 = vmul.f32 0.70710677, %v2377_v33  ;;  %v2400_v47 = vadd.f32 %v2353_v61, %v614_v16 }
 0x107   : > { %v866_v14 = vand.u32 2147483647, %v2361_v10  ;;  %v882_v28 = vand.u32 2147483647, %v2365_v15  ;;  %vm804_vm0 = vcmp.ge.f32.partialorder %v772_v8, 0.0  ;;  %v2397_v45 = vmul.f32 0.5, %v612_v13 }
 0x108   : > { %v900_v17 = vmul.f32 0.3275911, %v868_v11  ;;  %v1316_v18 = vsub.f32 0.0, %v868_v11  ;;  %v916_v19 = vmul.f32 0.3275911, %v884_v12  ;;  %v1332_v20 = vsub.f32 0.0, %v884_v12 }
 0x109   : > { %v898_v21 = vmul.f32 0.3275911, %v866_v14  ;;  %v2367_v25 = vpop.f32.mrb[4].mxu0  ;;  %v2369_v26 = vpop.f32.mrb[4].mxu1  ;;  %v1314_v27 = vsub.f32 0.0, %v866_v14  ;;  %v1330_v38 = vsub.f32 0.0, %v882_v28  ;;  %v2426_v13 = vadd.f32 %v2353_v61, %v678_v22 }
 0x10a   : > { %v932_v23 = vadd.f32 1.0, %v900_v17  ;;  %v948_v24 = vadd.f32 1.0, %v916_v19  ;;  %v2372_v29 = vpop.f32.mrb[5].mxu0  ;;  %v2374_v30 = vpop.f32.mrb[5].mxu1  ;;  %v1348_v31 = vmul.f32 %v1316_v18, %v868_v11  ;;  %v1364_v36 = vmul.f32 %v1332_v20, %v884_v12 }
 0x10b   : > { %v930_v32 = vadd.f32 1.0, %v898_v21  ;;  %v2379_v34 = vpop.f32.mrb[6].mxu0  ;;  %v2381_v35 = vpop.f32.mrb[6].mxu1  ;;  %v914_v37 = vmul.f32 0.3275911, %v882_v28  ;;  %v1346_v49 = vmul.f32 %v1314_v27, %v866_v14  ;;  %v2403_v52 = vmul.f32 0.5, %v676_v4 }
 0x10c   : > { %1972 = vrcp.f32 %v932_v23  ;;  %v2383_v39 = vpop.f32.mrb[7].mxu0  ;;  %v2395_v44 = vpop.f32.mrb[7].mxu1  ;;  %v1382_v48 = vmul.f32 1.442695, %v1348_v31  ;;  %v869_v50 = vand.u32 2147483647, %v2390_v42  ;;  %v1362_v53 = vmul.f32 %v1330_v38, %v882_v28 }
 0x10d   : > { %1974 = vrcp.f32 %v948_v24  ;;  %v946_v46 = vadd.f32 1.0, %v914_v37  ;;  %v1414_v51 = vmul.f32 1.442695, %v1364_v36  ;;  %v2406_v54 = vmul.f32 0.70710677, %v2393_v43 }
 0x10e   : > { %1976 = vrcp.f32 %v930_v32  ;;  %vm820_vm1 = vcmp.ge.f32.partialorder %v2359_v9, 0.0  ;;  %v901_v5 = vmul.f32 0.3275911, %v869_v50  ;;  %v1317_v56 = vsub.f32 0.0, %v869_v50 }
 0x10f   : > { %1978 = vrcp.f32 %v946_v46  ;;  %v2417_v60 = vsel %vm804_vm0, 1.0, %v3249_v59  ;;  %v885_v62 = vand.u32 2147483647, %v2406_v54  ;;  %v2421_v63 = vmul.f32 0.70710677, %v2400_v47 }
 0x110   : > { %v1378_v1 = vmul.f32 1.442695, %v1346_v49  ;;  %v933_v2 = vadd.f32 1.0, %v901_v5  ;;  %v1349_v3 = vmul.f32 %v1317_v56, %v869_v50  ;;  %1980 = vpow2.f32 %v1382_v48 }
 0x111   : > { %v2408_v55 = vpop.f32.mrb[8].mxu0  ;;  %v2411_v57 = vpop.f32.mrb[8].mxu1  ;;  %v1410_v7 = vmul.f32 1.442695, %v1362_v53  ;;  %v917_v8 = vmul.f32 0.3275911, %v885_v62 }
 0x112   : > { %v2413_v58 = vpop.f32.mrb[9].mxu0  ;;  %v2423_v0 = vpop.f32.mrb[9].mxu1  ;;  %v867_v11 = vand.u32 2147483647, %v2421_v63  ;;  %v2438_v14 = vsel %vm820_vm1, 1.0, %v3249_v59  ;;  %1982 = vrcp.f32 %v933_v2  ;;  %v1333_v17 = vsub.f32 0.0, %v885_v62 }
 0x113   : > { %v2428_v4 = vpop.f32.mrb[10].mxu0  ;;  %v2430_v6 = vpop.f32.mrb[10].mxu1  ;;  %v1384_v16 = vmul.f32 1.442695, %v1349_v3  ;;  %1984 = vpow2.f32 %v1414_v51  ;;  %v949_v22 = vadd.f32 1.0, %v917_v8  ;;  %vm802_vm2 = vcmp.ge.f32.partialorder %v2361_v10, 0.0 }
 0x114   : > { %3251 = vst [vmem:[#allocation2_spill] sm:$0xff] %v2428_v4  ;;  %3252 = vst [vmem:[#allocation3_spill] sm:$0xff] %v2430_v6  ;;  %v2440_v18 = vpop.f32.mrb[11].mxu0  ;;  %v2442_v19 = vpop.f32.mrb[11].mxu1  ;;  %v899_v23 = vmul.f32 0.3275911, %v867_v11  ;;  %1986 = vpow2.f32 %v1378_v1  ;;  %v1365_v38 = vmul.f32 %v1333_v17, %v885_v62  ;;  %v2468_v3 = vadd.f32 %v2367_v25, %v2353_v61 }
 0x115   : > { %3253 = vst [vmem:[#allocation4_spill] sm:$0xff] %v2440_v18  ;;  %3254 = vst [vmem:[#allocation5_spill] sm:$0xff] %v2442_v19  ;;  %v1315_v9 = vsub.f32 0.0, %v867_v11  ;;  %v2449_v27 = vmul.f32 0.70710677, %v2426_v13  ;;  %1988 = vrcp.f32 %v949_v22  ;;  %vm818_vm3 = vcmp.ge.f32.partialorder %v2365_v15, 0.0 }
 0x116   : > { %v2433_v12 = vpop.eup %1972  ;;  %v931_v31 = vadd.f32 1.0, %v899_v23  ;;  %1990 = vpow2.f32 %v1410_v7  ;;  %v1416_v8 = vmul.f32 1.442695, %v1365_v38  ;;  %v2476_v25 = vmul.f32 0.70710677, %v2468_v3 }
 0x117   : > { %v2444_v20 = vpop.eup %1974  ;;  %v1028_v21 = vmul.f32 1.0614054, %v2433_v12  ;;  %v883_v46 = vand.u32 2147483647, %v2449_v27  ;;  %1992 = vpow2.f32 %v1384_v16  ;;  %v1347_v50 = vmul.f32 %v1315_v9, %v867_v11 }
 0x118   : > { %v1044_v24 = vmul.f32 1.0614054, %v2444_v20  ;;  %v2454_v36 = vpop.eup %1976  ;;  %1994 = vrcp.f32 %v931_v31  ;;  %v2495_v10 = vsel %vm818_vm3, 1.0, %v3249_v59  ;;  %v2505_v15 = vand.u32 2147483647, %v2476_v25 }
 0x119   : > { %v1060_v28 = vadd.f32 -1.4531521, %v1028_v21  ;;  %v2452_v32 = vpop.f32.mrb[12].mxu0  ;;  %v1026_v49 = vmul.f32 1.0614054, %v2454_v36  ;;  %v2459_v51 = vpop.f32.mrb[12].mxu1 }
 0x11a   : > { %3255 = vst [vmem:[#allocation6_spill] sm:$0xff] %v2452_v32  ;;  %v1076_v37 = vadd.f32 -1.4531521, %v1044_v24  ;;  %3256 = vst [vmem:[#allocation7_spill] sm:$0xff] %v2459_v51  ;;  %v2461_v53 = vpop.eup %1978  ;;  %v915_v56 = vmul.f32 0.3275911, %v883_v46 }
 0x11b   : > { %v1092_v48 = vmul.f32 %v2433_v12, %v1060_v28  ;;  %v1058_v62 = vadd.f32 -1.4531521, %v1026_v49  ;;  %v1042_v2 = vmul.f32 1.0614054, %v2461_v53  ;;  %v1331_v16 = vsub.f32 0.0, %v883_v46  ;;  %v1981_v17 = vpop.eup %1980 }
 0x11c   : > { %v1108_v5 = vmul.f32 %v2444_v20, %v1076_v37  ;;  %v947_v11 = vadd.f32 1.0, %v915_v56  ;;  %v1380_v24 = vmul.f32 1.442695, %v1347_v50  ;;  %v2472_v9 = vpop.eup %1982  ;;  %v2483_v50 = vsel %vm802_vm2, 1.0, %v3249_v59 }
 0x11d   : > { %v1124_v1 = vadd.f32 1.4214138, %v1092_v48  ;;  %v1090_v22 = vmul.f32 %v2454_v36, %v1058_v62  ;;  %v1074_v23 = vadd.f32 -1.4531521, %v1042_v2  ;;  %v1363_v31 = vmul.f32 %v1331_v16, %v883_v46  ;;  %v1985_v37 = vpop.eup %1984  ;;  %v2485_v46 = vpop.f32.mrb[13].mxu0 }
 0x11e   : > { %v1140_v7 = vadd.f32 1.4214138, %v1108_v5  ;;  %1996 = vrcp.f32 %v947_v11  ;;  %v1029_v5 = vmul.f32 1.0614054, %v2472_v9  ;;  %v1987_v56 = vpop.eup %1986  ;;  %3257 = vst [vmem:[#allocation8_spill] sm:$0xff] %v2485_v46  ;;  %vm805_vm4 = vcmp.ge.f32.partialorder %v2390_v42, 0.0 }
 0x11f   : > { %v1156_v21 = vmul.f32 %v2433_v12, %v1124_v1  ;;  %v1122_v48 = vadd.f32 1.4214138, %v1090_v22  ;;  %v1106_v49 = vmul.f32 %v2461_v53, %v1074_v23  ;;  %1998 = vpow2.f32 %v1416_v8  ;;  %v2487_v2 = vpop.eup %1988 }
 0x120   : > { %v1172_v28 = vmul.f32 %v2444_v20, %v1140_v7  ;;  %v1412_v62 = vmul.f32 1.442695, %v1363_v31  ;;  %v1991_v22 = vpop.eup %1990  ;;  %v1045_v8 = vmul.f32 1.0614054, %v2487_v2  ;;  %2000 = vpow2.f32 %v1380_v24 }
 0x121   : > { %v1188_v38 = vadd.f32 -0.28449672, %v1156_v21  ;;  %v1154_v11 = vmul.f32 %v2454_v36, %v1122_v48  ;;  %v1138_v16 = vadd.f32 1.4214138, %v1106_v49  ;;  %v1061_v21 = vadd.f32 -1.4531521, %v1029_v5 }
 0x122   : > { %v1204_v1 = vadd.f32 -0.28449672, %v1172_v28  ;;  %v2498_v28 = vpop.eup %1992  ;;  %2002 = vpow2.f32 %v1412_v62  ;;  %vm821_vm5 = vcmp.ge.f32.partialorder %v2406_v54, 0.0  ;;  %v741_v54 = vmul.f32 0.5, %v2377_v33 }
 0x123   : > { %v1220_v7 = vmul.f32 %v2433_v12, %v1188_v38  ;;  %v1186_v46 = vadd.f32 -0.28449672, %v1154_v11  ;;  %v1170_v38 = vmul.f32 %v2461_v53, %v1138_v16  ;;  %v1093_v48 = vmul.f32 %v2472_v9, %v1061_v21  ;;  %v2502_v49 = vpop.eup %1994 }
 0x124   : > { %v1236_v23 = vmul.f32 %v2444_v20, %v1204_v1  ;;  %v1077_v1 = vadd.f32 -1.4531521, %v1045_v8  ;;  %v1027_v16 = vmul.f32 1.0614054, %v2502_v49  ;;  %v904_v21 = vmul.f32 0.3275911, %v2505_v15 }
 0x125   : > { %v1252_v31 = vadd.f32 0.2548296, %v1220_v7  ;;  %v1218_v24 = vmul.f32 %v2454_v36, %v1186_v46  ;;  %v1202_v51 = vadd.f32 -0.28449672, %v1170_v38  ;;  %v1125_v32 = vadd.f32 1.4214138, %v1093_v48 }
 0x126   : > { %v1268_v5 = vadd.f32 0.2548296, %v1236_v23  ;;  %v1109_v11 = vmul.f32 %v2487_v2, %v1077_v1  ;;  %v1059_v48 = vadd.f32 -1.4531521, %v1027_v16  ;;  %vm803_vm6 = vcmp.ge.f32.partialorder %v2421_v63, 0.0 }
 0x127   : > { %v1284_v59 = vmul.f32 %v2433_v12, %v1252_v31  ;;  %v1250_v23 = vadd.f32 0.2548296, %v1218_v24  ;;  %v1234_v8 = vmul.f32 %v2461_v53, %v1202_v51  ;;  %v1157_v12 = vmul.f32 %v2472_v9, %v1125_v32  ;;  %v2522_v32 = vpop.f32.mrb[13].mxu1 }
 0x128   : > { %v1300_v7 = vmul.f32 %v2444_v20, %v1268_v5  ;;  %v2516_v31 = vpop.eup %1996  ;;  %v1141_v38 = vadd.f32 1.4214138, %v1109_v11  ;;  %v936_v20 = vadd.f32 1.0, %v904_v21  ;;  %v757_v33 = vmul.f32 0.5, %v2393_v43 }
 0x129   : > { %v1444_v62 = vmul.f32 %v1981_v17, %v1284_v59  ;;  %v1282_v19 = vmul.f32 %v2454_v36, %v1250_v23  ;;  %v1266_v1 = vadd.f32 0.2548296, %v1234_v8  ;;  %v1189_v18 = vadd.f32 -0.28449672, %v1157_v12  ;;  %v1999_v6 = vpop.eup %1998 }
 0x12a   : > { %v1460_v46 = vmul.f32 %v1985_v37, %v1300_v7  ;;  %v1173_v59 = vmul.f32 %v2487_v2, %v1141_v38  ;;  %v1091_v17 = vmul.f32 %v2502_v49, %v1059_v48  ;;  %v1043_v51 = vmul.f32 1.0614054, %v2516_v31  ;;  %v2001_v11 = vpop.eup %2000 }
 0x12b   : > { %v1476_v5 = vsub.f32 1.0, %v1444_v62  ;;  %v1442_v24 = vmul.f32 %v1987_v56, %v1282_v19  ;;  %v1298_v7 = vmul.f32 %v2461_v53, %v1266_v1  ;;  %v1221_v36 = vmul.f32 %v2472_v9, %v1189_v18 }
 0x12c   : > { %v1492_v4 = vsub.f32 1.0, %v1460_v46  ;;  %v1205_v21 = vadd.f32 -0.28449672, %v1173_v59  ;;  %v1123_v62 = vadd.f32 1.4214138, %v1091_v17  ;;  %v2528_v48 = vpop.eup %2002  ;;  %2004 = vrcp.f32 %v936_v20 }
 0x12d   : > { %v1508_v37 = vmul.f32 %v1476_v5, %v2417_v60  ;;  %v1075_v23 = vadd.f32 -1.4531521, %v1043_v51  ;;  %v1474_v12 = vsub.f32 1.0, %v1442_v24  ;;  %v1458_v46 = vmul.f32 %v1991_v22, %v1298_v7  ;;  %v2544_v5 = vpop.f32.mrb[14].mxu0 }
 0x12e   : > { %v1524_v16 = vmul.f32 %v1492_v4, %v2438_v14  ;;  %v1253_v38 = vadd.f32 0.2548296, %v1221_v36  ;;  %v1237_v18 = vmul.f32 %v2487_v2, %v1205_v21  ;;  %v1155_v4 = vmul.f32 %v2502_v49, %v1123_v62 }
 0x12f   : > { %v1540_v8 = vadd.f32 1.0, %v1508_v37  ;;  %v1107_v14 = vmul.f32 %v2516_v31, %v1075_v23  ;;  %v1506_v53 = vmul.f32 %v1474_v12, %v2483_v50  ;;  %v1490_v56 = vsub.f32 1.0, %v1458_v46 }
 0x130   : > { %v1556_v60 = vadd.f32 1.0, %v1524_v16  ;;  %v1285_v22 = vmul.f32 %v2472_v9, %v1253_v38  ;;  %v1269_v59 = vadd.f32 0.2548296, %v1237_v18  ;;  %v1187_v17 = vadd.f32 -0.28449672, %v1155_v4 }
 0x131   : > { %v2540_v19 = vmul.f32 %v1540_v8, %v2385_v40  ;;  %v1139_v51 = vadd.f32 1.4214138, %v1107_v14  ;;  %v1538_v37 = vadd.f32 1.0, %v1506_v53  ;;  %v1522_v24 = vmul.f32 %v1490_v56, %v2495_v10 }
 0x132   : > { %v1588_v1 = vmul.f32 %v1556_v60, %v2387_v41  ;;  %v3258_v7 = vmov -1.0   ;;  %v1445_v50 = vmul.f32 %v2498_v28, %v1285_v22  ;;  %v1301_v9 = vmul.f32 %v2487_v2, %v1269_v59 }
 0x133   : > { %1604 = vst [vmem:[%s2534_s15 + $0x10] sm:$0xff] %v2540_v19  ;;  %v837_v40 = vsel %vm805_vm4, 1.0, %v3258_v7  ;;  %v1219_v41 = vmul.f32 %v2502_v49, %v1187_v17  ;;  %v1171_v36 = vmul.f32 %v2516_v31, %v1139_v51  ;;  %v2560_v16 = vadd.f32 %v2369_v26, %v2353_v61  ;;  %v2593_v51 = vpop.f32.mrb[14].mxu1 }
 0x134   : > { %1620 = vst [vmem:[%s2534_s15 + $0x90] sm:$0xff] %v1588_v1  ;;  %v2563_v10 = vmul.f32 %v1538_v37, %v2397_v45  ;;  %v1554_v42 = vadd.f32 1.0, %v1522_v24  ;;  %v1477_v21 = vsub.f32 1.0, %v1445_v50  ;;  %v1461_v28 = vmul.f32 %v1999_v6, %v1301_v9 }
 0x135   : > { %v1251_v62 = vadd.f32 0.2548296, %v1219_v41  ;;  %v1203_v2 = vadd.f32 -0.28449672, %v1171_v36  ;;  %v2571_v26 = vadd.f32 %v2353_v61, %v2372_v29  ;;  %v853_v20 = vsel %vm821_vm5, 1.0, %v3258_v7 }
 0x136   : > { %1602 = vst [vmem:[%s2534_s15] sm:$0xff] %v2563_v10  ;;  %v1586_v23 = vmul.f32 %v1554_v42, %v2403_v52  ;;  %v1509_v8 = vmul.f32 %v1477_v21, %v837_v40  ;;  %v1493_v12 = vsub.f32 1.0, %v1461_v28  ;;  %v2579_v38 = vmul.f32 0.70710677, %v2560_v16  ;;  %v2595_v37 = vpop.eup %2004 }
 0x137   : > { %v1283_v45 = vmul.f32 %v2502_v49, %v1251_v62  ;;  %v1235_v46 = vmul.f32 %v2516_v31, %v1203_v2  ;;  %v1320_v49 = vsub.f32 0.0, %v2505_v15  ;;  %v2585_v14 = vmul.f32 0.70710677, %v2571_v26 }
 0x138   : > { %1618 = vst [vmem:[%s2534_s15 + $0x80] sm:$0xff] %v1586_v23  ;;  %v1541_v6 = vadd.f32 1.0, %v1509_v8  ;;  %v1525_v52 = vmul.f32 %v1493_v12, %v853_v20  ;;  %v888_v4 = vand.u32 2147483647, %v2579_v38  ;;  %v835_v63 = vsel %vm803_vm6, 1.0, %v3258_v7 }
 0x139   : > { %v1443_v29 = vmul.f32 %v2001_v11, %v1283_v45  ;;  %v1267_v60 = vadd.f32 0.2548296, %v1235_v46  ;;  %vm819_vm7 = vcmp.ge.f32.partialorder %v2449_v27, 0.0  ;;  %v1352_v43 = vmul.f32 %v1320_v49, %v2505_v15 }
 0x13a   : > { %v1573_v18 = vmul.f32 %v1541_v6, %v741_v54  ;;  %v1557_v53 = vadd.f32 1.0, %v1525_v52  ;;  %v920_v11 = vmul.f32 0.3275911, %v888_v4  ;;  %v870_v40 = vand.u32 2147483647, %v2585_v14  ;;  %v2622_v6 = vpop.f32.mrb[15].mxu0 }
 0x13b   : > { %v1475_v56 = vsub.f32 1.0, %v1443_v29  ;;  %v1299_v22 = vmul.f32 %v2516_v31, %v1267_v60  ;;  %v739_v31 = vmul.f32 0.5, %v2400_v47  ;;  %v1032_v41 = vmul.f32 1.0614054, %v2595_v37 }
 0x13c   : > { %1605 = vst [vmem:[%s2534_s15 + $0x18] sm:$0xff] %v1573_v18  ;;  %v1589_v1 = vmul.f32 %v1557_v53, %v757_v33  ;;  %v952_v24 = vadd.f32 1.0, %v920_v11  ;;  %v755_v27 = vmul.f32 0.5, %v2426_v13  ;;  %v902_v36 = vmul.f32 0.3275911, %v870_v40 }
 0x13d   : > { %v1507_v59 = vmul.f32 %v1475_v56, %v835_v63  ;;  %v1459_v17 = vmul.f32 %v2528_v48, %v1299_v22  ;;  %v851_v48 = vsel %vm819_vm7, 1.0, %v3258_v7  ;;  %v1064_v15 = vadd.f32 -1.4531521, %v1032_v41 }
 0x13e   : > { %1621 = vst [vmem:[%s2534_s15 + $0x98] sm:$0xff] %v1589_v1  ;;  %2006 = vrcp.f32 %v952_v24  ;;  %v2606_v28 = vadd.f32 %v2353_v61, %v2374_v30  ;;  %v1634_v47 = vmul.f32 %v2563_v10, %v2563_v10  ;;  %v1390_v62 = vmul.f32 1.442695, %v1352_v43 }
 0x13f   : > { %v1539_v50 = vadd.f32 1.0, %v1507_v59  ;;  %v1491_v9 = vsub.f32 1.0, %v1459_v17  ;;  %v1336_v2 = vsub.f32 0.0, %v888_v4  ;;  %v934_v23 = vadd.f32 1.0, %v902_v36 }
 0x140   : > { %v1096_v45 = vmul.f32 %v2595_v37, %v1064_v15  ;;  %v1636_v46 = vmul.f32 %v2540_v19, %v2540_v19  ;;  %v2616_v30 = vmul.f32 0.70710677, %v2606_v28  ;;  %v2620_v54 = vadd.f32 %v2379_v34, %v2353_v61 }
 0x141   : > { %v1571_v42 = vmul.f32 %v1539_v50, %v739_v31  ;;  %v1523_v21 = vmul.f32 %v1491_v9, %v851_v48  ;;  %2008 = vrcp.f32 %v934_v23  ;;  %v1637_v60 = vmul.f32 %v1573_v18, %v1573_v18 }
 0x142   : > { %v1128_v29 = vadd.f32 1.4214138, %v1096_v45  ;;  %2010 = vpow2.f32 %v1390_v62  ;;  %v1368_v49 = vmul.f32 %v1336_v2, %v888_v4  ;;  %v886_v33 = vand.u32 2147483647, %v2616_v30  ;;  %v2639_v4 = vpop.f32.mrb[15].mxu1 }
 0x143   : > { %1603 = vst [vmem:[%s2534_s15 + $0x8] sm:$0xff] %v1571_v42  ;;  %v1635_v8 = vmul.f32 %v1571_v42, %v1571_v42  ;;  %v1666_v13 = vadd.f32 %v1571_v42, %v2563_v10  ;;  %v1555_v12 = vadd.f32 1.0, %v1523_v21  ;;  %v1318_v22 = vsub.f32 0.0, %v870_v40 }
 0x144   : > { %v1160_v56 = vmul.f32 %v2595_v37, %v1128_v29  ;;  %v918_v34 = vmul.f32 0.3275911, %v886_v33  ;;  %v2631_v11 = vmul.f32 0.70710677, %v2620_v54  ;;  %v2637_v59 = vadd.f32 %v2381_v35, %v2353_v61 }
 0x145   : > { %v1667_v20 = vadd.f32 %v1666_v13, %v2540_v19  ;;  %v1703_v10 = vadd.f32 %v1635_v8, %v1634_v47  ;;  %v1587_v52 = vmul.f32 %v1555_v12, %v755_v27  ;;  %v1422_v43 = vmul.f32 1.442695, %v1368_v49 }
 0x146   : > { %v1192_v19 = vadd.f32 -0.28449672, %v1160_v56  ;;  %v950_v24 = vadd.f32 1.0, %v918_v34  ;;  %vm808_vm8 = vcmp.ge.f32.partialorder %v2476_v25, 0.0  ;;  %v1350_v9 = vmul.f32 %v1318_v22, %v870_v40 }
 0x147   : > { %v1704_v53 = vadd.f32 %v1703_v10, %v1636_v46  ;;  %1619 = vst [vmem:[%s2534_s15 + $0x88] sm:$0xff] %v1587_v52  ;;  %v2628_v63 = vadd.f32 %v1667_v20, %v1573_v18  ;;  %v873_v18 = vand.u32 2147483647, %v2631_v11  ;;  %v744_v41 = vmul.f32 0.5, %v2468_v3 }
 0x148   : > { %v2641_v17 = vpop.eup %2006  ;;  %v1224_v31 = vmul.f32 %v2595_v37, %v1192_v19  ;;  %2012 = vrcp.f32 %v950_v24  ;;  %v2649_v36 = vmul.f32 0.70710677, %v2637_v59  ;;  %v2653_v42 = vadd.f32 %v2353_v61, %v2383_v39 }
 0x149   : > { %v2633_v1 = vadd.f32 %v1704_v53, %v1637_v60  ;;  %v1048_v50 = vmul.f32 1.0614054, %v2641_v17  ;;  %v905_v35 = vmul.f32 0.3275911, %v873_v18  ;;  %v840_v25 = vsel %vm808_vm8, 1.0, %v3258_v7 }
 0x14a   : > { %v1256_v27 = vadd.f32 0.2548296, %v1224_v31  ;;  %v2659_v15 = vmul.f32 0.5, %v2560_v16  ;;  %2014 = vpow2.f32 %v1422_v43  ;;  %v1386_v2 = vmul.f32 1.442695, %v1350_v9 }
 0x14b   : > { %v1080_v48 = vadd.f32 -1.4531521, %v1048_v50  ;;  %v2655_v21 = vpop.eup %2008  ;;  %v937_v3 = vadd.f32 1.0, %v905_v35  ;;  %v1334_v8 = vsub.f32 0.0, %v886_v33  ;;  %v1321_v39 = vsub.f32 0.0, %v873_v18 }
 0x14c   : > { %v1288_v40 = vmul.f32 %v2595_v37, %v1256_v27  ;;  %v1030_v62 = vmul.f32 1.0614054, %v2655_v21  ;;  %v2011_v23 = vpop.eup %2010  ;;  %v889_v13 = vand.u32 2147483647, %v2649_v36  ;;  %v2666_v16 = vmul.f32 0.70710677, %v2653_v42 }
 0x14d   : > { %v1112_v47 = vmul.f32 %v2641_v17, %v1080_v48  ;;  %2016 = vrcp.f32 %v937_v3  ;;  %vm824_vm9 = vcmp.ge.f32.partialorder %v2579_v38, 0.0  ;;  %v2670_v37 = vmul.f32 0.5, %v2571_v26 }
 0x14e   : > { %v1448_v12 = vmul.f32 %v2011_v23, %v1288_v40  ;;  %v1062_v46 = vadd.f32 -1.4531521, %v1030_v62  ;;  %v921_v20 = vmul.f32 0.3275911, %v889_v13  ;;  %v2674_v10 = vadd.f32 %v2353_v61, %v2395_v44 }
 0x14f   : > { %v1144_v45 = vadd.f32 1.4214138, %v1112_v47  ;;  %vm806_vm10 = vcmp.ge.f32.partialorder %v2585_v14, 0.0  ;;  %2018 = vpow2.f32 %v1386_v2  ;;  %v1366_v49 = vmul.f32 %v1334_v8, %v886_v33 }
 0x150   : > { %v1480_v52 = vsub.f32 1.0, %v1448_v12  ;;  %v1094_v60 = vmul.f32 %v2655_v21, %v1062_v46  ;;  %v953_v53 = vadd.f32 1.0, %v921_v20  ;;  %v2680_v56 = vand.u32 2147483647, %v2666_v16 }
 0x151   : > { %v1176_v29 = vmul.f32 %v2641_v17, %v1144_v45  ;;  %v1353_v19 = vmul.f32 %v1321_v39, %v873_v18  ;;  %v1337_v44 = vsub.f32 0.0, %v889_v13  ;;  %v2686_v31 = vmul.f32 0.70710677, %v2674_v10 }
 0x152   : > { %v1512_v26 = vmul.f32 %v1480_v52, %v840_v25  ;;  %v1126_v34 = vadd.f32 1.4214138, %v1094_v60  ;;  %v2682_v43 = vpop.eup %2012  ;;  %2020 = vrcp.f32 %v953_v53  ;;  %v903_v24 = vmul.f32 0.3275911, %v2680_v56 }
 0x153   : > { %v1208_v22 = vadd.f32 -0.28449672, %v1176_v29  ;;  %v1046_v35 = vmul.f32 1.0614054, %v2682_v43  ;;  %v856_v18 = vsel %vm824_vm9, 1.0, %v3258_v7  ;;  %v838_v48 = vsel %vm806_vm10, 1.0, %v3258_v7 }
 0x154   : > { %v1544_v50 = vadd.f32 1.0, %v1512_v26  ;;  %v1158_v9 = vmul.f32 %v2655_v21, %v1126_v34  ;;  %v2015_v27 = vpop.eup %2014  ;;  %v1418_v25 = vmul.f32 1.442695, %v1366_v49  ;;  %v935_v3 = vadd.f32 1.0, %v903_v24 }
 0x155   : > { %v1240_v33 = vmul.f32 %v2641_v17, %v1208_v22  ;;  %v1078_v2 = vadd.f32 -1.4531521, %v1046_v35  ;;  %v1392_v8 = vmul.f32 1.442695, %v1353_v19  ;;  %v1369_v39 = vmul.f32 %v1337_v44, %v889_v13 }
 0x156   : > { %v2697_v40 = vmul.f32 %v1544_v50, %v744_v41  ;;  %v1190_v62 = vadd.f32 -0.28449672, %v1158_v9  ;;  %2022 = vrcp.f32 %v935_v3  ;;  %v887_v12 = vand.u32 2147483647, %v2686_v31 }
 0x157   : > { %v1272_v47 = vadd.f32 0.2548296, %v1240_v33  ;;  %v2699_v23 = vpop.eup %2016  ;;  %v2707_v45 = vmul.f32 0.5, %v2606_v28  ;;  %v1110_v41 = vmul.f32 %v2682_v43, %v1078_v2  ;;  %vm822_vm11 = vcmp.ge.f32.partialorder %v2616_v30, 0.0 }
 0x158   : > { %1608 = vst [vmem:[%s2534_s15 + $0x30] sm:$0xff] %v2697_v40  ;;  %v1222_v14 = vmul.f32 %v2655_v21, %v1190_v62  ;;  %2024 = vpow2.f32 %v1418_v25  ;;  %v2712_v46 = vmul.f32 0.5, %v2620_v54  ;;  %v1033_v13 = vmul.f32 1.0614054, %v2699_v23 }
 0x159   : > { %v1304_v38 = vmul.f32 %v2641_v17, %v1272_v47  ;;  %v919_v20 = vmul.f32 0.3275911, %v887_v12  ;;  %v1142_v60 = vadd.f32 1.4214138, %v1110_v41  ;;  %v2717_v17 = vadd.f32 %v2408_v55, %v2353_v61  ;;  %v2019_v28 = vpop.eup %2018 }
 0x15a   : > { %v1254_v29 = vadd.f32 0.2548296, %v1222_v14  ;;  %v1065_v49 = vadd.f32 -1.4531521, %v1033_v13  ;;  %2026 = vpow2.f32 %v1392_v8  ;;  %v1424_v53 = vmul.f32 1.442695, %v1369_v39 }
 0x15b   : > { %v1464_v52 = vmul.f32 %v2015_v27, %v1304_v38  ;;  %v951_v26 = vadd.f32 1.0, %v919_v20  ;;  %v1174_v54 = vmul.f32 %v2682_v43, %v1142_v60  ;;  %v1319_v19 = vsub.f32 0.0, %v2680_v56 }
 0x15c   : > { %v1286_v34 = vmul.f32 %v2655_v21, %v1254_v29  ;;  %v2722_v44 = vpop.eup %2020  ;;  %v1097_v24 = vmul.f32 %v2699_v23, %v1065_v49  ;;  %v1335_v50 = vsub.f32 0.0, %v887_v12  ;;  %v2726_v55 = vmul.f32 0.70710677, %v2717_v17 }
 0x15d   : > { %v1496_v22 = vsub.f32 1.0, %v1464_v52  ;;  %2028 = vrcp.f32 %v951_v26  ;;  %v1206_v35 = vadd.f32 -0.28449672, %v1174_v54  ;;  %v1049_v27 = vmul.f32 1.0614054, %v2722_v44 }
 0x15e   : > { %v1446_v9 = vmul.f32 %v2019_v28, %v1286_v34  ;;  %vm809_vm12 = vcmp.ge.f32.partialorder %v2631_v11, 0.0  ;;  %v1129_v21 = vadd.f32 1.4214138, %v1097_v24  ;;  %2030 = vpow2.f32 %v1424_v53 }
 0x15f   : > { %v1528_v33 = vmul.f32 %v1496_v22, %v856_v18  ;;  %v2731_v25 = vand.u32 2147483647, %v2726_v55  ;;  %v1238_v62 = vmul.f32 %v2682_v43, %v1206_v35  ;;  %v1081_v2 = vadd.f32 -1.4531521, %v1049_v27 }
 0x160   : > { %v1478_v47 = vsub.f32 1.0, %v1446_v9  ;;  %v2734_v8 = vpop.eup %2022  ;;  %v1161_v18 = vmul.f32 %v2699_v23, %v1129_v21  ;;  %v1351_v39 = vmul.f32 %v1319_v19, %v2680_v56  ;;  %v1367_v38 = vmul.f32 %v1335_v50, %v887_v12 }
 0x161   : > { %v1560_v3 = vadd.f32 1.0, %v1528_v33  ;;  %v908_v14 = vmul.f32 0.3275911, %v2731_v25  ;;  %v1270_v20 = vadd.f32 0.2548296, %v1238_v62  ;;  %v1113_v52 = vmul.f32 %v2722_v44, %v1081_v2 }
 0x162   : > { %v1510_v13 = vmul.f32 %v1478_v47, %v838_v48  ;;  %v2025_v29 = vpop.eup %2024  ;;  %v1193_v60 = vadd.f32 -0.28449672, %v1161_v18  ;;  %v1031_v28 = vmul.f32 1.0614054, %v2734_v8  ;;  %v2744_v53 = vadd.f32 %v2411_v57, %v2353_v61 }
 0x163   : > { %v1592_v41 = vmul.f32 %v1560_v3, %v2659_v15  ;;  %v940_v49 = vadd.f32 1.0, %v908_v14  ;;  %v854_v12 = vsel %vm822_vm11, 1.0, %v3258_v7  ;;  %v1302_v15 = vmul.f32 %v2682_v43, %v1270_v20 }
 0x164   : > { %v1542_v56 = vadd.f32 1.0, %v1510_v13  ;;  %v1145_v48 = vadd.f32 1.4214138, %v1113_v52  ;;  %v2027_v26 = vpop.eup %2026  ;;  %v1225_v22 = vmul.f32 %v2699_v23, %v1193_v60  ;;  %v1063_v34 = vadd.f32 -1.4531521, %v1031_v28 }
 0x165   : > { %1624 = vst [vmem:[%s2534_s15 + $0xb0] sm:$0xff] %v1592_v41  ;;  %v1388_v54 = vmul.f32 1.442695, %v1351_v39  ;;  %2032 = vrcp.f32 %v940_v49  ;;  %v1462_v57 = vmul.f32 %v2025_v29, %v1302_v15  ;;  %v841_v24 = vsel %vm809_vm12, 1.0, %v3258_v7 }
 0x166   : > { %v1574_v19 = vmul.f32 %v1542_v56, %v2670_v37  ;;  %v1177_v30 = vmul.f32 %v2722_v44, %v1145_v48  ;;  %v1257_v43 = vadd.f32 0.2548296, %v1225_v22  ;;  %v1095_v33 = vmul.f32 %v2734_v8, %v1063_v34 }
 0x167   : > { %v2757_v50 = vpop.eup %2028  ;;  %v1420_v9 = vmul.f32 1.442695, %v1367_v38  ;;  %v2761_v35 = vmul.f32 0.70710677, %v2744_v53  ;;  %v1494_v21 = vsub.f32 1.0, %v1462_v57  ;;  %2034 = vpow2.f32 %v1388_v54 }
 0x168   : > { %1606 = vst [vmem:[%s2534_s15 + $0x20] sm:$0xff] %v1574_v19  ;;  %v1638_v27 = vmul.f32 %v1574_v19, %v1574_v19  ;;  %v2765_v37 = vadd.f32 %v2628_v63, %v1574_v19  ;;  %v1209_v3 = vadd.f32 -0.28449672, %v1177_v30  ;;  %v2031_v11 = vpop.eup %2030  ;;  %v1289_v47 = vmul.f32 %v2699_v23, %v1257_v43 }
 0x169   : > { %v1127_v62 = vadd.f32 1.4214138, %v1095_v33  ;;  %v1047_v2 = vmul.f32 1.0614054, %v2757_v50  ;;  %v1526_v39 = vmul.f32 %v1494_v21, %v854_v12  ;;  %v1324_v14 = vsub.f32 0.0, %v2731_v25 }
 0x16a   : > { %v2770_v18 = vadd.f32 %v2633_v1, %v1638_v27  ;;  %v1241_v38 = vmul.f32 %v2722_v44, %v1209_v3  ;;  %v1449_v41 = vmul.f32 %v2027_v26, %v1289_v47  ;;  %v892_v20 = vand.u32 2147483647, %v2761_v35 }
 0x16b   : > { %v1159_v63 = vmul.f32 %v2734_v8, %v1127_v62  ;;  %v1079_v13 = vadd.f32 -1.4531521, %v1047_v2  ;;  %v1558_v52 = vadd.f32 1.0, %v1526_v39  ;;  %vm825_vm13 = vcmp.ge.f32.partialorder %v2649_v36, 0.0 }
 0x16c   : > { %v1273_v23 = vadd.f32 0.2548296, %v1241_v38  ;;  %2036 = vpow2.f32 %v1420_v9  ;;  %v1481_v29 = vsub.f32 1.0, %v1449_v41  ;;  %v924_v28 = vmul.f32 0.3275911, %v892_v20 }
 0x16d   : > { %v1191_v1 = vadd.f32 -0.28449672, %v1159_v63  ;;  %v1111_v60 = vmul.f32 %v2757_v50, %v1079_v13  ;;  %v1590_v49 = vmul.f32 %v1558_v52, %v2707_v45  ;;  %v1356_v12 = vmul.f32 %v1324_v14, %v2731_v25 }
 0x16e   : > { %v1305_v56 = vmul.f32 %v2722_v44, %v1273_v23  ;;  %v2783_v15 = vadd.f32 %v2353_v61, %v2413_v58  ;;  %v1513_v26 = vmul.f32 %v1481_v29, %v841_v24  ;;  %v956_v54 = vadd.f32 1.0, %v924_v28 }
 0x16f   : > { %v2785_v48 = vpop.eup %2032  ;;  %v1223_v22 = vmul.f32 %v2734_v8, %v1191_v1  ;;  %v1143_v34 = vadd.f32 1.4214138, %v1111_v60  ;;  %1622 = vst [vmem:[%s2534_s15 + $0xa0] sm:$0xff] %v1590_v49  ;;  %v857_v45 = vsel %vm825_vm13, 1.0, %v3258_v7  ;;  %v2795_v25 = vadd.f32 %v2353_v61, %v2423_v0 }
 0x170   : > { %v1465_v19 = vmul.f32 %v2031_v11, %v1305_v56  ;;  %v1036_v44 = vmul.f32 1.0614054, %v2785_v48  ;;  %v1545_v58 = vadd.f32 1.0, %v1513_v26  ;;  %2038 = vrcp.f32 %v956_v54 }
 0x171   : > { %v1255_v57 = vadd.f32 0.2548296, %v1223_v22  ;;  %v1175_v24 = vmul.f32 %v2757_v50, %v1143_v34  ;;  %vm807_vm14 = vcmp.ge.f32.partialorder %v2666_v16, 0.0  ;;  %v1398_v33 = vmul.f32 1.442695, %v1356_v12  ;;  %v2035_v36 = vpop.eup %2034 }
 0x172   : > { %v1497_v30 = vsub.f32 1.0, %v1465_v19  ;;  %v1068_v43 = vadd.f32 -1.4531521, %v1036_v44  ;;  %v2800_v9 = vmul.f32 %v1545_v58, %v2712_v46  ;;  %v2804_v61 = vmul.f32 0.70710677, %v2783_v15 }
 0x173   : > { %v1287_v27 = vmul.f32 %v2734_v8, %v1255_v57  ;;  %v1207_v21 = vadd.f32 -0.28449672, %v1175_v24  ;;  %v1340_v11 = vsub.f32 0.0, %v892_v20  ;;  %v2808_v47 = vmul.f32 0.70710677, %v2795_v25 }
 0x174   : > { %v1529_v0 = vmul.f32 %v1497_v30, %v857_v45  ;;  %v1100_v3 = vmul.f32 %v2785_v48, %v1068_v43  ;;  %1609 = vst [vmem:[%s2534_s15 + $0x38] sm:$0xff] %v2800_v9  ;;  %v761_v16 = vmul.f32 0.5, %v2637_v59  ;;  %v839_v46 = vsel %vm807_vm14, 1.0, %v3258_v7  ;;  %v2836_v24 = vld [vmem:[%s3246_s5] ss:$0 sm:$0xff] }
 0x175   : > { %v1447_v62 = vmul.f32 %v2035_v36, %v1287_v27  ;;  %v1239_v8 = vmul.f32 %v2757_v50, %v1207_v21  ;;  %vm823_vm15 = vcmp.ge.f32.partialorder %v2686_v31, 0.0  ;;  %v874_v14 = vand.u32 2147483647, %v2804_v61  ;;  %v3259_v30 = vld [vmem:[#allocation2_spill] sm:$0xff] }
 0x176   : > { %v2037_v2 = vpop.eup %2036  ;;  %v1561_v39 = vadd.f32 1.0, %v1529_v0  ;;  %v1132_v38 = vadd.f32 1.4214138, %v1100_v3  ;;  %2040 = vpow2.f32 %v1398_v33  ;;  %v890_v13 = vand.u32 2147483647, %v2808_v47 }
 0x177   : > { %v1479_v41 = vsub.f32 1.0, %v1447_v62  ;;  %v1271_v63 = vadd.f32 0.2548296, %v1239_v8  ;;  %v1372_v23 = vmul.f32 %v1340_v11, %v892_v20  ;;  %v906_v29 = vmul.f32 0.3275911, %v874_v14 }
 0x178   : > { %v1593_v52 = vmul.f32 %v1561_v39, %v761_v16  ;;  %v1164_v59 = vmul.f32 %v2785_v48, %v1132_v38  ;;  %v922_v28 = vmul.f32 0.3275911, %v890_v13  ;;  %v743_v49 = vmul.f32 0.5, %v2653_v42 }
 0x179   : > { %v1511_v1 = vmul.f32 %v1479_v41, %v839_v46  ;;  %v1303_v60 = vmul.f32 %v2757_v50, %v1271_v63  ;;  %v759_v56 = vmul.f32 0.5, %v2674_v10  ;;  %v938_v26 = vadd.f32 1.0, %v906_v29 }
 0x17a   : > { %1625 = vst [vmem:[%s2534_s15 + $0xb8] sm:$0xff] %v1593_v52  ;;  %v1196_v12 = vadd.f32 -0.28449672, %v1164_v59  ;;  %v2823_v22 = vpop.eup %2038  ;;  %v855_v54 = vsel %vm823_vm15, 1.0, %v3258_v7  ;;  %v954_v45 = vadd.f32 1.0, %v922_v28  ;;  %v1640_v42 = vmul.f32 %v2697_v40, %v2697_v40  ;;  %v3260_v28 = vld [vmem:[#allocation3_spill] sm:$0xff] }
 0x17b   : > { %v1543_v34 = vadd.f32 1.0, %v1511_v1  ;;  %v1463_v20 = vmul.f32 %v2037_v2, %v1303_v60  ;;  %v1052_v19 = vmul.f32 1.0614054, %v2823_v22  ;;  %v1430_v44 = vmul.f32 1.442695, %v1372_v23 }
 0x17c   : > { %v1228_v50 = vmul.f32 %v2785_v48, %v1196_v12  ;;  %2042 = vrcp.f32 %v938_v26  ;;  %vm812_vm0 = vcmp.ge.f32.partialorder %v2726_v55, 0.0  ;;  %v2840_v43 = vadd.f32 %v2836_v24, %v3259_v30 }
 0x17d   : > { %v1575_v10 = vmul.f32 %v1543_v34, %v743_v49  ;;  %v1495_v58 = vsub.f32 1.0, %v1463_v20  ;;  %2044 = vrcp.f32 %v954_v45  ;;  %v1084_v31 = vadd.f32 -1.4531521, %v1052_v19 }
 0x17e   : > { %v1260_v57 = vadd.f32 0.2548296, %v1228_v50  ;;  %v1322_v21 = vsub.f32 0.0, %v874_v14  ;;  %2046 = vpow2.f32 %v1430_v44  ;;  %v2847_v11 = vmul.f32 0.70710677, %v2840_v43 }
 0x17f   : > { %1607 = vst [vmem:[%s2534_s15 + $0x28] sm:$0xff] %v1575_v10  ;;  %v1639_v33 = vmul.f32 %v1575_v10, %v1575_v10  ;;  %v1670_v36 = vadd.f32 %v2765_v37, %v1575_v10  ;;  %v1527_v27 = vmul.f32 %v1495_v58, %v855_v54  ;;  %v1116_v3 = vmul.f32 %v2823_v22, %v1084_v31 }
 0x180   : > { %v1292_v0 = vmul.f32 %v2785_v48, %v1260_v57  ;;  %v2041_v16 = vpop.eup %2040  ;;  %v1338_v2 = vsub.f32 0.0, %v890_v13  ;;  %v1641_v37 = vmul.f32 %v2800_v9, %v2800_v9  ;;  %v2854_v48 = vand.u32 2147483647, %v2847_v11 }
 0x181   : > { %v1671_v46 = vadd.f32 %v1670_v36, %v2697_v40  ;;  %v1707_v62 = vadd.f32 %v2770_v18, %v1639_v33  ;;  %v1559_v8 = vadd.f32 1.0, %v1527_v27  ;;  %v1148_v38 = vadd.f32 1.4214138, %v1116_v3 }
 0x182   : > { %v1452_v39 = vmul.f32 %v2041_v16, %v1292_v0  ;;  %v1354_v52 = vmul.f32 %v1322_v21, %v874_v14  ;;  %v909_v23 = vmul.f32 0.3275911, %v2854_v48  ;;  %v844_v29 = vsel %vm812_vm0, 1.0, %v3258_v7 }
 0x183   : > { %v1708_v41 = vadd.f32 %v1707_v62, %v1640_v42  ;;  %v2856_v63 = vmul.f32 %v1559_v8, %v759_v56  ;;  %v2859_v59 = vadd.f32 %v1671_v46, %v2800_v9  ;;  %v1180_v18 = vmul.f32 %v2823_v22, %v1148_v38 }
 0x184   : > { %v1484_v40 = vsub.f32 1.0, %v1452_v39  ;;  %v1370_v60 = vmul.f32 %v1338_v2, %v890_v13  ;;  %v2872_v14 = vadd.f32 %v2836_v24, %v3260_v28  ;;  %v748_v49 = vmul.f32 0.5, %v2717_v17  ;;  %v3261_v13 = vld [vmem:[#allocation4_spill] sm:$0xff] }
 0x185   : > { %1623 = vst [vmem:[%s2534_s15 + $0xa8] sm:$0xff] %v2856_v63  ;;  %v2868_v1 = vadd.f32 %v1708_v41, %v1641_v37  ;;  %v1212_v12 = vadd.f32 -0.28449672, %v1180_v18  ;;  %v941_v26 = vadd.f32 1.0, %v909_v23  ;;  %v1394_v55 = vmul.f32 1.442695, %v1354_v52 }
 0x186   : > { %v2874_v9 = vpop.eup %2042  ;;  %v1516_v56 = vmul.f32 %v1484_v40, %v844_v29  ;;  %v2881_v20 = vmul.f32 0.70710677, %v2872_v14  ;;  %v2885_v45 = vadd.f32 %v2836_v24, %v3261_v13  ;;  %v1426_v42 = vmul.f32 1.442695, %v1370_v60 }
 0x187   : > { %v2877_v34 = vpop.eup %2044  ;;  %v1034_v54 = vmul.f32 1.0614054, %v2874_v9  ;;  %v1244_v19 = vmul.f32 %v2823_v22, %v1212_v12  ;;  %2048 = vrcp.f32 %v941_v26  ;;  %v764_v30 = vmul.f32 0.5, %v2744_v53  ;;  %v3262_v53 = vld [vmem:[#allocation5_spill] sm:$0xff] }
 0x188   : > { %v1548_v50 = vadd.f32 1.0, %v1516_v56  ;;  %v1050_v17 = vmul.f32 1.0614054, %v2877_v34  ;;  %v2047_v10 = vpop.eup %2046  ;;  %v893_v36 = vand.u32 2147483647, %v2881_v20  ;;  %vm828_vm1 = vcmp.ge.f32.partialorder %v2761_v35, 0.0 }
 0x189   : > { %v1066_v44 = vadd.f32 -1.4531521, %v1034_v54  ;;  %v1276_v57 = vadd.f32 0.2548296, %v1244_v19  ;;  %v2895_v27 = vmul.f32 0.70710677, %v2885_v45  ;;  %2050 = vpow2.f32 %v1394_v55 }
 0x18a   : > { %v2889_v58 = vmul.f32 %v1548_v50, %v748_v49  ;;  %v1082_v31 = vadd.f32 -1.4531521, %v1050_v17  ;;  %2052 = vpow2.f32 %v1426_v42  ;;  %v925_v16 = vmul.f32 0.3275911, %v893_v36 }
 0x18b   : > { %v1098_v33 = vmul.f32 %v2874_v9, %v1066_v44  ;;  %v1308_v21 = vmul.f32 %v2823_v22, %v1276_v57  ;;  %v2904_v46 = vadd.f32 %v2836_v24, %v3262_v53  ;;  %v1325_v2 = vsub.f32 0.0, %v2854_v48 }
 0x18c   : > { %1612 = vst [vmem:[%s2534_s15 + $0x50] sm:$0xff] %v2889_v58  ;;  %v1114_v0 = vmul.f32 %v2877_v34, %v1082_v31  ;;  %v875_v37 = vand.u32 2147483647, %v2895_v27  ;;  %v860_v35 = vsel %vm828_vm1, 1.0, %v3258_v7  ;;  %v2910_v22 = vmul.f32 0.5, %v2783_v15 }
 0x18d   : > { %v1130_v3 = vadd.f32 1.4214138, %v1098_v33  ;;  %v1468_v62 = vmul.f32 %v2047_v10, %v1308_v21  ;;  %v957_v38 = vadd.f32 1.0, %v925_v16  ;;  %v2914_v52 = vmul.f32 0.5, %v2795_v25 }
 0x18e   : > { %v1146_v8 = vadd.f32 1.4214138, %v1114_v0  ;;  %v907_v18 = vmul.f32 0.3275911, %v875_v37  ;;  %vm810_vm2 = vcmp.ge.f32.partialorder %v2804_v61, 0.0  ;;  %v1357_v49 = vmul.f32 %v1325_v2, %v2854_v48  ;;  %v3263_v48 = vld [vmem:[#allocation6_spill] sm:$0xff] }
 0x18f   : > { %v1162_v39 = vmul.f32 %v2874_v9, %v1130_v3  ;;  %v1500_v41 = vsub.f32 1.0, %v1468_v62  ;;  %2054 = vrcp.f32 %v957_v38  ;;  %v2919_v29 = vmul.f32 0.70710677, %v2904_v46 }
 0x190   : > { %v1178_v40 = vmul.f32 %v2877_v34, %v1146_v8  ;;  %v939_v56 = vadd.f32 1.0, %v907_v18  ;;  %vm826_vm3 = vcmp.ge.f32.partialorder %v2808_v47, 0.0  ;;  %v1341_v26 = vsub.f32 0.0, %v893_v36 }
 0x191   : > { %v1194_v23 = vadd.f32 -0.28449672, %v1162_v39  ;;  %v2921_v60 = vpop.eup %2048  ;;  %v1532_v15 = vmul.f32 %v1500_v41, %v860_v35  ;;  %v842_v54 = vsel %vm810_vm2, 1.0, %v3258_v7  ;;  %v891_v19 = vand.u32 2147483647, %v2919_v29  ;;  %v3264_v39 = vld [vmem:[#allocation7_spill] sm:$0xff] }
 0x192   : > { %v1210_v28 = vadd.f32 -0.28449672, %v1178_v40  ;;  %v1037_v12 = vmul.f32 1.0614054, %v2921_v60  ;;  %2056 = vrcp.f32 %v939_v56  ;;  %v2932_v17 = vadd.f32 %v2836_v24, %v3263_v48 }
 0x193   : > { %v1226_v25 = vmul.f32 %v2874_v9, %v1194_v23  ;;  %v1564_v61 = vadd.f32 1.0, %v1532_v15  ;;  %v2051_v44 = vpop.eup %2050  ;;  %v858_v42 = vsel %vm826_vm3, 1.0, %v3258_v7  ;;  %v1400_v57 = vmul.f32 1.442695, %v1357_v49 }
 0x194   : > { %v1242_v55 = vmul.f32 %v2877_v34, %v1210_v28  ;;  %v1069_v50 = vadd.f32 -1.4531521, %v1037_v12  ;;  %v2053_v31 = vpop.eup %2052  ;;  %v1373_v0 = vmul.f32 %v1341_v26, %v893_v36  ;;  %v923_v3 = vmul.f32 0.3275911, %v891_v19 }
 0x195   : > { %v1258_v13 = vadd.f32 0.2548296, %v1226_v25  ;;  %v2934_v47 = vmul.f32 %v1564_v61, %v764_v30  ;;  %v2943_v53 = vmul.f32 0.5, %v2840_v43  ;;  %v1323_v30 = vsub.f32 0.0, %v875_v37 }
 0x196   : > { %v1274_v10 = vadd.f32 0.2548296, %v1242_v55  ;;  %v1101_v21 = vmul.f32 %v2921_v60, %v1069_v50  ;;  %v2946_v62 = vmul.f32 0.70710677, %v2932_v17  ;;  %vm813_vm4 = vcmp.ge.f32.partialorder %v2847_v11, 0.0 }
 0x197   : > { %v1290_v33 = vmul.f32 %v2874_v9, %v1258_v13  ;;  %1628 = vst [vmem:[%s2534_s15 + $0xd0] sm:$0xff] %v2934_v47  ;;  %v955_v9 = vadd.f32 1.0, %v923_v3  ;;  %2058 = vpow2.f32 %v1400_v57  ;;  %v2952_v38 = vadd.f32 %v2836_v24, %v3264_v39 }
 0x198   : > { %v1306_v16 = vmul.f32 %v2877_v34, %v1274_v10  ;;  %v1133_v2 = vadd.f32 1.4214138, %v1101_v21  ;;  %v880_v36 = vand.u32 2147483647, %v2946_v62  ;;  %v1432_v40 = vmul.f32 1.442695, %v1373_v0 }
 0x199   : > { %v1450_v8 = vmul.f32 %v2051_v44, %v1290_v33  ;;  %v2954_v34 = vpop.eup %2054  ;;  %2060 = vrcp.f32 %v955_v9  ;;  %v1355_v15 = vmul.f32 %v1323_v30, %v875_v37  ;;  %v845_v56 = vsel %vm813_vm4, 1.0, %v3258_v7 }
 0x19a   : > { %v1466_v35 = vmul.f32 %v2053_v31, %v1306_v16  ;;  %v1165_v41 = vmul.f32 %v2921_v60, %v1133_v2  ;;  %v1053_v23 = vmul.f32 1.0614054, %v2954_v34  ;;  %v912_v28 = vmul.f32 0.3275911, %v880_v36 }
 0x19b   : > { %v1482_v43 = vsub.f32 1.0, %v1450_v8  ;;  %v1339_v12 = vsub.f32 0.0, %v891_v19  ;;  %v2964_v50 = vmul.f32 0.70710677, %v2952_v38  ;;  %2062 = vpow2.f32 %v1432_v40 }
 0x19c   : > { %v1498_v18 = vsub.f32 1.0, %v1466_v35  ;;  %v1197_v25 = vadd.f32 -0.28449672, %v1165_v41  ;;  %v2961_v26 = vpop.eup %2056  ;;  %v1085_v55 = vadd.f32 -1.4531521, %v1053_v23  ;;  %v944_v13 = vadd.f32 1.0, %v912_v28 }
 0x19d   : > { %v1514_v49 = vmul.f32 %v1482_v43, %v842_v54  ;;  %v1035_v54 = vmul.f32 1.0614054, %v2961_v26  ;;  %v1396_v10 = vmul.f32 1.442695, %v1355_v15  ;;  %v1371_v33 = vmul.f32 %v1339_v12, %v891_v19  ;;  %v3265_v15 = vld [vmem:[#allocation8_spill] sm:$0xff] }
 0x19e   : > { %v1530_v61 = vmul.f32 %v1498_v18, %v858_v42  ;;  %v1229_v37 = vmul.f32 %v2921_v60, %v1197_v25  ;;  %v1117_v11 = vmul.f32 %v2954_v34, %v1085_v55  ;;  %2064 = vrcp.f32 %v944_v13 }
 0x19f   : > { %v1546_v48 = vadd.f32 1.0, %v1514_v49  ;;  %v1067_v31 = vadd.f32 -1.4531521, %v1035_v54  ;;  %v1328_v3 = vsub.f32 0.0, %v880_v36  ;;  %v2974_v16 = vand.u32 2147483647, %v2964_v50 }
 0x1a0   : > { %v1562_v44 = vadd.f32 1.0, %v1530_v61  ;;  %v1261_v57 = vadd.f32 0.2548296, %v1229_v37  ;;  %v1149_v0 = vadd.f32 1.4214138, %v1117_v11  ;;  %2066 = vpow2.f32 %v1396_v10 }
 0x1a1   : > { %v1578_v42 = vmul.f32 %v1546_v48, %v2910_v22  ;;  %v1099_v22 = vmul.f32 %v2961_v26, %v1067_v31  ;;  %v2059_v9 = vpop.eup %2058  ;;  %v928_v35 = vmul.f32 0.3275911, %v2974_v16  ;;  %v1428_v41 = vmul.f32 1.442695, %v1371_v33 }
 0x1a2   : > { %v2971_v21 = vmul.f32 %v1562_v44, %v2914_v52  ;;  %v1293_v2 = vmul.f32 %v2921_v60, %v1261_v57  ;;  %v2985_v52 = vmul.f32 0.5, %v2872_v14  ;;  %v1181_v19 = vmul.f32 %v2954_v34, %v1149_v0 }
 0x1a3   : > { %1610 = vst [vmem:[%s2534_s15 + $0x40] sm:$0xff] %v1578_v42  ;;  %v1642_v30 = vmul.f32 %v1578_v42, %v1578_v42  ;;  %v2978_v8 = vadd.f32 %v2859_v59, %v1578_v42  ;;  %v2989_v39 = vpop.eup %2060  ;;  %v1131_v60 = vadd.f32 1.4214138, %v1099_v22  ;;  %v960_v23 = vadd.f32 1.0, %v928_v35 }
 0x1a4   : > { %1626 = vst [vmem:[%s2534_s15 + $0xc0] sm:$0xff] %v2971_v21  ;;  %v1453_v43 = vmul.f32 %v2059_v9, %v1293_v2  ;;  %v1213_v40 = vadd.f32 -0.28449672, %v1181_v19  ;;  %v1051_v18 = vmul.f32 1.0614054, %v2989_v39  ;;  %v2997_v14 = vadd.f32 %v2836_v24, %v3265_v15 }
 0x1a5   : > { %v2992_v59 = vadd.f32 %v2868_v1, %v1642_v30  ;;  %vm829_vm5 = vcmp.ge.f32.partialorder %v2881_v20, 0.0  ;;  %v1163_v49 = vmul.f32 %v2961_v26, %v1131_v60  ;;  %v1360_v25 = vmul.f32 %v1328_v3, %v880_v36  ;;  %v2063_v55 = vpop.eup %2062 }
 0x1a6   : > { %v1485_v28 = vsub.f32 1.0, %v1453_v43  ;;  %v1245_v1 = vmul.f32 %v2954_v34, %v1213_v40  ;;  %v3003_v12 = vmul.f32 0.5, %v2885_v45  ;;  %v1083_v61 = vadd.f32 -1.4531521, %v1051_v18 }
 0x1a7   : > { %2068 = vrcp.f32 %v960_v23  ;;  %v1195_v48 = vadd.f32 -0.28449672, %v1163_v49  ;;  %v3006_v37 = vmul.f32 0.70710677, %v2997_v14  ;;  %v3010_v54 = vadd.f32 %v2836_v24, %v2522_v32 }
 0x1a8   : > { %v1517_v13 = vmul.f32 %v1485_v28, %v845_v56  ;;  %v3012_v20 = vpop.eup %2064  ;;  %v861_v36 = vsel %vm829_vm5, 1.0, %v3258_v7  ;;  %v1277_v44 = vadd.f32 0.2548296, %v1245_v1  ;;  %v1115_v45 = vmul.f32 %v2989_v39, %v1083_v61 }
 0x1a9   : > { %2070 = vpow2.f32 %v1428_v41  ;;  %v1227_v10 = vmul.f32 %v2961_v26, %v1195_v48  ;;  %v1040_v56 = vmul.f32 1.0614054, %v3012_v20  ;;  %v1406_v42 = vmul.f32 1.442695, %v1360_v25 }
 0x1aa   : > { %v1549_v11 = vadd.f32 1.0, %v1517_v13  ;;  %v1309_v57 = vmul.f32 %v2954_v34, %v1277_v44  ;;  %v1147_v31 = vadd.f32 1.4214138, %v1115_v45  ;;  %v1344_v32 = vsub.f32 0.0, %v2974_v16  ;;  %v2067_v22 = vpop.eup %2066 }
 0x1ab   : > { %v3021_v33 = vand.u32 2147483647, %v3006_v37  ;;  %v1259_v3 = vadd.f32 0.2548296, %v1227_v10  ;;  %v1072_v30 = vadd.f32 -1.4531521, %v1040_v56  ;;  %v3031_v9 = vmul.f32 %v2889_v58, %v2889_v58 }
 0x1ac   : > { %v3024_v0 = vmul.f32 %v1549_v11, %v2943_v53  ;;  %v3027_v2 = vmul.f32 0.70710677, %v3010_v54  ;;  %v1469_v34 = vmul.f32 %v2063_v55, %v1309_v57  ;;  %v1179_v19 = vmul.f32 %v2989_v39, %v1147_v31 }
 0x1ad   : > { %v910_v35 = vmul.f32 0.3275911, %v3021_v33  ;;  %vm811_vm6 = vcmp.ge.f32.partialorder %v2895_v27, 0.0  ;;  %v1291_v53 = vmul.f32 %v2961_v26, %v1259_v3  ;;  %v3040_v43 = vmul.f32 0.5, %v2904_v46 }
 0x1ae   : > { %1613 = vst [vmem:[%s2534_s15 + $0x58] sm:$0xff] %v3024_v0  ;;  %v1104_v60 = vmul.f32 %v3012_v20, %v1072_v30  ;;  %v1501_v41 = vsub.f32 1.0, %v1469_v34  ;;  %v1211_v40 = vadd.f32 -0.28449672, %v1179_v19  ;;  %v1376_v18 = vmul.f32 %v1344_v32, %v2974_v16 }
 0x1af   : > { %v942_v23 = vadd.f32 1.0, %v910_v35  ;;  %v1451_v15 = vmul.f32 %v2067_v22, %v1291_v53  ;;  %2072 = vpow2.f32 %v1406_v42  ;;  %v894_v49 = vand.u32 2147483647, %v3027_v2 }
 0x1b0   : > { %v1136_v28 = vadd.f32 1.4214138, %v1104_v60  ;;  %v1533_v27 = vmul.f32 %v1501_v41, %v861_v36  ;;  %v843_v26 = vsel %vm811_vm6, 1.0, %v3258_v7  ;;  %v1243_v46 = vmul.f32 %v2989_v39, %v1211_v40 }
 0x1b1   : > { %v3045_v25 = vpop.eup %2068  ;;  %2074 = vrcp.f32 %v942_v23  ;;  %v1483_v1 = vsub.f32 1.0, %v1451_v15  ;;  %v926_v16 = vmul.f32 0.3275911, %v894_v49  ;;  %vm827_vm7 = vcmp.ge.f32.partialorder %v2919_v29, 0.0 }
 0x1b2   : > { %v1168_v61 = vmul.f32 %v3012_v20, %v1136_v28  ;;  %v1056_v55 = vmul.f32 1.0614054, %v3045_v25  ;;  %v1565_v48 = vadd.f32 1.0, %v1533_v27  ;;  %v1275_v44 = vadd.f32 0.2548296, %v1243_v46 }
 0x1b3   : > { %v2071_v13 = vpop.eup %2070  ;;  %v1438_v45 = vmul.f32 1.442695, %v1376_v18  ;;  %v1515_v11 = vmul.f32 %v1483_v1, %v843_v26  ;;  %v958_v56 = vadd.f32 1.0, %v926_v16  ;;  %vm816_vm8 = vcmp.ge.f32.partialorder %v2946_v62, 0.0 }
 0x1b4   : > { %v1200_v36 = vadd.f32 -0.28449672, %v1168_v61  ;;  %v1088_v10 = vadd.f32 -1.4531521, %v1056_v55  ;;  %v3053_v42 = vmul.f32 %v1565_v48, %v2985_v52  ;;  %v1307_v57 = vmul.f32 %v2989_v39, %v1275_v44 }
 0x1b5   : > { %v3059_v31 = vadd.f32 %v2836_v24, %v2544_v5  ;;  %v1547_v32 = vadd.f32 1.0, %v1515_v11  ;;  %2076 = vrcp.f32 %v958_v56  ;;  %v859_v52 = vsel %vm827_vm7, 1.0, %v3258_v7 }
 0x1b6   : > { %v1232_v3 = vmul.f32 %v3012_v20, %v1200_v36  ;;  %v1120_v30 = vmul.f32 %v3045_v25, %v1088_v10  ;;  %1629 = vst [vmem:[%s2534_s15 + $0xd8] sm:$0xff] %v3053_v42  ;;  %v1467_v39 = vmul.f32 %v2071_v13, %v1307_v57  ;;  %2078 = vpow2.f32 %v1438_v45 }
 0x1b7   : > { %v1326_v22 = vsub.f32 0.0, %v3021_v33  ;;  %v1579_v5 = vmul.f32 %v1547_v32, %v3003_v12  ;;  %v3071_v35 = vmul.f32 0.70710677, %v3059_v31  ;;  %v1645_v53 = vmul.f32 %v3024_v0, %v3024_v0 }
 0x1b8   : > { %v1264_v34 = vadd.f32 0.2548296, %v1232_v3  ;;  %v1152_v19 = vadd.f32 1.4214138, %v1120_v30  ;;  %v1499_v60 = vsub.f32 1.0, %v1467_v39  ;;  %v848_v29 = vsel %vm816_vm8, 1.0, %v3258_v7 }
 0x1b9   : > { %v1342_v41 = vsub.f32 0.0, %v894_v49  ;;  %v2073_v40 = vpop.eup %2072  ;;  %1611 = vst [vmem:[%s2534_s15 + $0x48] sm:$0xff] %v1579_v5  ;;  %v1643_v18 = vmul.f32 %v1579_v5, %v1579_v5  ;;  %v1674_v23 = vadd.f32 %v2978_v8, %v1579_v5  ;;  %v1358_v26 = vmul.f32 %v1326_v22, %v3021_v33 }
 0x1ba   : > { %v1296_v12 = vmul.f32 %v3012_v20, %v1264_v34  ;;  %v1184_v15 = vmul.f32 %v3045_v25, %v1152_v19  ;;  %v1531_v27 = vmul.f32 %v1499_v60, %v859_v52  ;;  %v3086_v46 = vand.u32 2147483647, %v3071_v35 }
 0x1bb   : > { %v3082_v28 = vpop.eup %2074  ;;  %v3090_v62 = vadd.f32 %v2836_v24, %v2593_v51  ;;  %v1675_v1 = vadd.f32 %v1674_v23, %v2889_v58  ;;  %v1711_v8 = vadd.f32 %v2992_v59, %v1643_v18  ;;  %v1374_v13 = vmul.f32 %v1342_v41, %v894_v49 }
 0x1bc   : > { %v1456_v61 = vmul.f32 %v2073_v40, %v1296_v12  ;;  %v1216_v20 = vadd.f32 -0.28449672, %v1184_v15  ;;  %v1563_v55 = vadd.f32 1.0, %v1531_v27  ;;  %v1038_v16 = vmul.f32 1.0614054, %v3082_v28 }
 0x1bd   : > { %v913_v33 = vmul.f32 0.3275911, %v3086_v46  ;;  %v1712_v48 = vadd.f32 %v1711_v8, %v3031_v9  ;;  %v3099_v51 = vadd.f32 %v1675_v1, %v3024_v0  ;;  %v1402_v11 = vmul.f32 1.442695, %v1358_v26 }
 0x1be   : > { %v1488_v44 = vsub.f32 1.0, %v1456_v61  ;;  %v1248_v45 = vmul.f32 %v3045_v25, %v1216_v20  ;;  %v3102_v58 = vmul.f32 %v1563_v55, %v3040_v43  ;;  %v1070_v59 = vadd.f32 -1.4531521, %v1038_v16 }
 0x1bf   : > { %v945_v36 = vadd.f32 1.0, %v913_v33  ;;  %v3104_v10 = vpop.eup %2076  ;;  %v3106_v57 = vadd.f32 %v1712_v48, %v1645_v53  ;;  %v3109_v9 = vmul.f32 0.70710677, %v3090_v62  ;;  %v3117_v3 = vadd.f32 %v2836_v24, %v2622_v6 }
 0x1c0   : > { %v1520_v49 = vmul.f32 %v1488_v44, %v848_v29  ;;  %v1280_v56 = vadd.f32 0.2548296, %v1248_v45  ;;  %v2079_v32 = vpop.eup %2078  ;;  %1627 = vst [vmem:[%s2534_s15 + $0xc8] sm:$0xff] %v3102_v58  ;;  %v1102_v0 = vmul.f32 %v3082_v28, %v1070_v59  ;;  %v1054_v43 = vmul.f32 1.0614054, %v3104_v10 }
 0x1c1   : > { %2080 = vrcp.f32 %v945_v36  ;;  %v752_v30 = vmul.f32 0.5, %v2932_v17  ;;  %v1434_v22 = vmul.f32 1.442695, %v1374_v13  ;;  %vm832_vm9 = vcmp.ge.f32.partialorder %v2964_v50, 0.0 }
 0x1c2   : > { %v1552_v52 = vadd.f32 1.0, %v1520_v49  ;;  %v1312_v39 = vmul.f32 %v3045_v25, %v1280_v56  ;;  %v1134_v5 = vadd.f32 1.4214138, %v1102_v0  ;;  %v1086_v34 = vadd.f32 -1.4531521, %v1054_v43 }
 0x1c3   : > { %2082 = vpow2.f32 %v1402_v11  ;;  %v897_v60 = vand.u32 2147483647, %v3109_v9  ;;  %v3128_v17 = vmul.f32 0.70710677, %v3117_v3  ;;  %v864_v41 = vsel %vm832_vm9, 1.0, %v3258_v7 }
 0x1c4   : > { %v3122_v19 = vmul.f32 %v1552_v52, %v752_v30  ;;  %v1472_v53 = vmul.f32 %v2079_v32, %v1312_v39  ;;  %v1166_v29 = vmul.f32 %v3082_v28, %v1134_v5  ;;  %v1118_v6 = vmul.f32 %v3104_v10, %v1086_v34 }
 0x1c5   : > { %2084 = vpow2.f32 %v1434_v22  ;;  %v929_v50 = vmul.f32 0.3275911, %v897_v60  ;;  %v1329_v23 = vsub.f32 0.0, %v3086_v46  ;;  %v879_v27 = vand.u32 2147483647, %v3128_v17 }
 0x1c6   : > { %1616 = vst [vmem:[%s2534_s15 + $0x70] sm:$0xff] %v3122_v19  ;;  %v1504_v25 = vsub.f32 1.0, %v1472_v53  ;;  %v1198_v40 = vadd.f32 -0.28449672, %v1166_v29  ;;  %v1150_v18 = vadd.f32 1.4214138, %v1118_v6  ;;  %v3139_v8 = vadd.f32 %v2836_v24, %v2639_v4 }
 0x1c7   : > { %v961_v15 = vadd.f32 1.0, %v929_v50  ;;  %v768_v61 = vmul.f32 0.5, %v2952_v38  ;;  %v911_v55 = vmul.f32 0.3275911, %v879_v27  ;;  %v1361_v48 = vmul.f32 %v1329_v23, %v3086_v46 }
 0x1c8   : > { %v1536_v12 = vmul.f32 %v1504_v25, %v864_v41  ;;  %v1230_v26 = vmul.f32 %v3082_v28, %v1198_v40  ;;  %v1182_v1 = vmul.f32 %v3104_v10, %v1150_v18  ;;  %v3151_v38 = vmul.f32 0.70710677, %v3139_v8 }
 0x1c9   : > { %2086 = vrcp.f32 %v961_v15  ;;  %v943_v59 = vadd.f32 1.0, %v911_v55  ;;  %vm814_vm10 = vcmp.ge.f32.partialorder %v3006_v37, 0.0  ;;  %v1345_v49 = vsub.f32 0.0, %v897_v60 }
 0x1ca   : > { %v1568_v20 = vadd.f32 1.0, %v1536_v12  ;;  %v1262_v13 = vadd.f32 0.2548296, %v1230_v26  ;;  %v1214_v33 = vadd.f32 -0.28449672, %v1182_v1  ;;  %v846_v22 = vsel %vm814_vm10, 1.0, %v3258_v7 }
 0x1cb   : > { %v3142_v16 = vpop.eup %2080  ;;  %2088 = vrcp.f32 %v943_v59  ;;  %v1408_v32 = vmul.f32 1.442695, %v1361_v48  ;;  %v895_v0 = vand.u32 2147483647, %v3151_v38  ;;  %vm830_vm11 = vcmp.ge.f32.partialorder %v3027_v2, 0.0 }
 0x1cc   : > { %v3145_v44 = vmul.f32 %v1568_v20, %v768_v61  ;;  %v1041_v45 = vmul.f32 1.0614054, %v3142_v16  ;;  %v1294_v4 = vmul.f32 %v3082_v28, %v1262_v13  ;;  %v1246_v24 = vmul.f32 %v3104_v10, %v1214_v33 }
 0x1cd   : > { %v2083_v11 = vpop.eup %2082  ;;  %v927_v39 = vmul.f32 0.3275911, %v895_v0  ;;  %v1377_v5 = vmul.f32 %v1345_v49, %v897_v60  ;;  %2090 = vpow2.f32 %v1408_v32  ;;  %v750_v25 = vmul.f32 0.5, %v2997_v14 }
 0x1ce   : > { %1632 = vst [vmem:[%s2534_s15 + $0xf0] sm:$0xff] %v3145_v44  ;;  %v1073_v36 = vadd.f32 -1.4531521, %v1041_v45  ;;  %v1454_v46 = vmul.f32 %v2083_v11, %v1294_v4  ;;  %v1278_v56 = vadd.f32 0.2548296, %v1246_v24  ;;  %v1327_v41 = vsub.f32 0.0, %v879_v27 }
 0x1cf   : > { %v2085_v43 = vpop.eup %2084  ;;  %v959_v29 = vadd.f32 1.0, %v927_v39  ;;  %v862_v23 = vsel %vm830_vm11, 1.0, %v3258_v7  ;;  %v1440_v12 = vmul.f32 1.442695, %v1377_v5  ;;  %v766_v61 = vmul.f32 0.5, %v3010_v54 }
 0x1d0   : > { %v1105_v28 = vmul.f32 %v3142_v16, %v1073_v36  ;;  %v1486_v30 = vsub.f32 1.0, %v1454_v46  ;;  %v1310_v52 = vmul.f32 %v3104_v10, %v1278_v56  ;;  %v1359_v20 = vmul.f32 %v1327_v41, %v879_v27 }
 0x1d1   : > { %2092 = vrcp.f32 %v959_v29  ;;  %v1343_v55 = vsub.f32 0.0, %v895_v0  ;;  %vm817_vm12 = vcmp.ge.f32.partialorder %v3071_v35, 0.0  ;;  %v753_v35 = vmul.f32 0.5, %v3059_v31 }
 0x1d2   : > { %v1137_v37 = vadd.f32 1.4214138, %v1105_v28  ;;  %v1518_v34 = vmul.f32 %v1486_v30, %v846_v22  ;;  %v1470_v53 = vmul.f32 %v2085_v43, %v1310_v52  ;;  %2094 = vpow2.f32 %v1440_v12 }
 0x1d3   : > { %v2087_v6 = vpop.eup %2086  ;;  %v1375_v56 = vmul.f32 %v1343_v55, %v895_v0  ;;  %v849_v22 = vsel %vm817_vm12, 1.0, %v3258_v7  ;;  %vm833_vm13 = vcmp.ge.f32.partialorder %v3109_v9, 0.0  ;;  %vm815_vm14 = vcmp.ge.f32.partialorder %v3128_v17, 0.0 }
 0x1d4   : > { %v1169_v50 = vmul.f32 %v3142_v16, %v1137_v37  ;;  %v1550_v40 = vadd.f32 1.0, %v1518_v34  ;;  %v1502_v10 = vsub.f32 1.0, %v1470_v53  ;;  %v1057_v18 = vmul.f32 1.0614054, %v2087_v6 }
 0x1d5   : > { %v2089_v1 = vpop.eup %2088  ;;  %vm831_vm15 = vcmp.ge.f32.partialorder %v3151_v38, 0.0  ;;  %vm1740_vm0 = vcmask 1040384  }
 0x1d6   : > { %v1201_v2 = vadd.f32 -0.28449672, %v1169_v50  ;;  %v1582_v60 = vmul.f32 %v1550_v40, %v750_v25  ;;  %v1534_v15 = vmul.f32 %v1502_v10, %v862_v23  ;;  %v1089_v26 = vadd.f32 -1.4531521, %v1057_v18 }
 0x1d7   : > { %v1039_v4 = vmul.f32 1.0614054, %v2089_v1  ;;  %v2091_v49 = vpop.eup %2090 }
 0x1d8   : > { %v1233_v14 = vmul.f32 %v3142_v16, %v1201_v2  ;;  %1614 = vst [vmem:[%s2534_s15 + $0x60] sm:$0xff] %v1582_v60  ;;  %v1646_v13 = vmul.f32 %v1582_v60, %v1582_v60  ;;  %v3168_v33 = vadd.f32 %v3099_v51, %v1582_v60  ;;  %v1566_v48 = vadd.f32 1.0, %v1534_v15 }
 0x1d9   : > { %v1121_v45 = vmul.f32 %v2087_v6, %v1089_v26  ;;  %v1071_v36 = vadd.f32 -1.4531521, %v1039_v4  ;;  %v1404_v51 = vmul.f32 1.442695, %v1359_v20  ;;  %v865_v26 = vsel %vm833_vm13, 1.0, %v3258_v7 }
 0x1da   : > { %v1265_v59 = vadd.f32 0.2548296, %v1233_v14  ;;  %v3171_v24 = vadd.f32 %v3106_v57, %v1646_v13  ;;  %v3173_v11 = vmul.f32 %v1566_v48, %v766_v61  ;;  %v769_v13 = vmul.f32 0.5, %v3090_v62 }
 0x1db   : > { %v1153_v54 = vadd.f32 1.4214138, %v1121_v45  ;;  %v1103_v43 = vmul.f32 %v2089_v1, %v1071_v36  ;;  %v2093_v28 = vpop.eup %2092  ;;  %2096 = vpow2.f32 %v1404_v51  ;;  %v751_v36 = vmul.f32 0.5, %v3117_v3 }
 0x1dc   : > { %v1297_v27 = vmul.f32 %v3142_v16, %v1265_v59  ;;  %1630 = vst [vmem:[%s2534_s15 + $0xe0] sm:$0xff] %v3173_v11  ;;  %v1055_v39 = vmul.f32 1.0614054, %v2093_v28  ;;  %v1436_v16 = vmul.f32 1.442695, %v1375_v56  ;;  %v2095_v0 = vpop.eup %2094  ;;  %v863_v51 = vsel %vm831_vm15, 1.0, %v3258_v7 }
 0x1dd   : > { %v1185_v46 = vmul.f32 %v2087_v6, %v1153_v54  ;;  %v1135_v52 = vadd.f32 1.4214138, %v1103_v43  ;;  %v847_v54 = vsel %vm815_vm14, 1.0, %v3258_v7 }
 0x1de   : > { %v1457_v32 = vmul.f32 %v2091_v49, %v1297_v27  ;;  %v1087_v53 = vadd.f32 -1.4531521, %v1055_v39  ;;  %2098 = vpow2.f32 %v1436_v16 }
 0x1df   : > { %v1217_v30 = vadd.f32 -0.28449672, %v1185_v46  ;;  %v1167_v34 = vmul.f32 %v2089_v1, %v1135_v52 }
 0x1e0   : > { %v1489_v57 = vsub.f32 1.0, %v1457_v32  ;;  %v1119_v41 = vmul.f32 %v2093_v28, %v1087_v53 }
 0x1e1   : > { %v1249_v37 = vmul.f32 %v2087_v6, %v1217_v30  ;;  %v1199_v50 = vadd.f32 -0.28449672, %v1167_v34  ;;  %v767_v30 = vmul.f32 0.5, %v3139_v8  ;;  %v2102_v34 = vld [vmem:[%s2534_s15 + $0x88] sm:$0xff] }
 0x1e2   : > { %v1521_v5 = vmul.f32 %v1489_v57, %v849_v22  ;;  %v1151_v23 = vadd.f32 1.4214138, %v1119_v41  ;;  %v1651_v53 = vmul.f32 %v2102_v34, %v2102_v34 }
 0x1e3   : > { %v1281_v29 = vadd.f32 0.2548296, %v1249_v37  ;;  %v1231_v18 = vmul.f32 %v2089_v1, %v1199_v50  ;;  %v2101_v37 = vld [vmem:[%s2534_s15 + $0x80] sm:$0xff] }
 0x1e4   : > { %v1553_v25 = vadd.f32 1.0, %v1521_v5  ;;  %v1183_v60 = vmul.f32 %v2093_v28, %v1151_v23 }
 0x1e5   : > { %v1313_v40 = vmul.f32 %v2087_v6, %v1281_v29  ;;  %v1263_v12 = vadd.f32 0.2548296, %v1231_v18  ;;  %v2097_v14 = vpop.eup %2096 }
 0x1e6   : > { %v1585_v10 = vmul.f32 %v1553_v25, %v753_v35  ;;  %v1215_v31 = vadd.f32 -0.28449672, %v1183_v60  ;;  %v2104_v25 = vld [vmem:[%s2534_s15 + $0x98] sm:$0xff] }
 0x1e7   : > { %v1473_v2 = vmul.f32 %v2095_v0, %v1313_v40  ;;  %v1295_v61 = vmul.f32 %v2089_v1, %v1263_v12  ;;  %v1653_v50 = vmul.f32 %v2104_v25, %v2104_v25  ;;  %v1655_v12 = vmul.f32 %v2856_v63, %v2856_v63 }
 0x1e8   : > { %1617 = vst [vmem:[%s2534_s15 + $0x78] sm:$0xff] %v1585_v10  ;;  %v1247_v55 = vmul.f32 %v2093_v28, %v1215_v31  ;;  %v2099_v59 = vpop.eup %2098  ;;  %v1649_v52 = vmul.f32 %v1585_v10, %v1585_v10 }
 0x1e9   : > { %v1505_v15 = vsub.f32 1.0, %v1473_v2  ;;  %v1455_v6 = vmul.f32 %v2097_v14, %v1295_v61 }
 0x1ea   : > { %v1279_v45 = vadd.f32 0.2548296, %v1247_v55 }
 0x1eb   : > { %v1537_v20 = vmul.f32 %v1505_v15, %v865_v26  ;;  %v1487_v9 = vsub.f32 1.0, %v1455_v6  ;;  %v2106_v26 = vld [vmem:[%s2534_s15 + $0xb0] sm:$0xff] }
 0x1ec   : > { %v1311_v27 = vmul.f32 %v2093_v28, %v1279_v45  ;;  %v1648_v28 = vmul.f32 %v3122_v19, %v3122_v19  ;;  %v1656_v61 = vmul.f32 %v2106_v26, %v2106_v26 }
 0x1ed   : > { %v1569_v48 = vadd.f32 1.0, %v1537_v20  ;;  %v1519_v1 = vmul.f32 %v1487_v9, %v847_v54  ;;  %v2107_v20 = vld [vmem:[%s2534_s15 + $0xb8] sm:$0xff] }
 0x1ee   : > { %v1471_v49 = vmul.f32 %v2099_v59, %v1311_v27  ;;  %v1657_v6 = vmul.f32 %v2107_v20, %v2107_v20  ;;  %v1659_v59 = vmul.f32 %v3102_v58, %v3102_v58 }
 0x1ef   : > { %v3186_v4 = vmul.f32 %v1569_v48, %v769_v13  ;;  %v1551_v17 = vadd.f32 1.0, %v1519_v1  ;;  %v1658_v48 = vmul.f32 %v2971_v21, %v2971_v21  ;;  %v1660_v1 = vmul.f32 %v2934_v47, %v2934_v47 }
 0x1f0   : > { %v1503_v46 = vsub.f32 1.0, %v1471_v49 }
 0x1f1   : > { %1633 = vst [vmem:[%s2534_s15 + $0xf8] sm:$0xff] %v3186_v4  ;;  %v1583_v62 = vmul.f32 %v1551_v17, %v751_v36  ;;  %v1661_v17 = vmul.f32 %v3053_v42, %v3053_v42 }
 0x1f2   : > { %v1535_v43 = vmul.f32 %v1503_v46, %v863_v51 }
 0x1f3   : > { %1615 = vst [vmem:[%s2534_s15 + $0x68] sm:$0xff] %v1583_v62  ;;  %v1647_v56 = vmul.f32 %v1583_v62, %v1583_v62  ;;  %v1678_v32 = vadd.f32 %v3168_v33, %v1583_v62  ;;  %v1650_v33 = vmul.f32 %v2101_v37, %v2101_v37  ;;  %v1662_v62 = vmul.f32 %v3173_v11, %v3173_v11 }
 0x1f4   : > { %v1567_v57 = vadd.f32 1.0, %v1535_v43 }
 0x1f5   : > { %v1679_v3 = vadd.f32 %v1678_v32, %v3122_v19  ;;  %v1715_v38 = vadd.f32 %v3171_v24, %v1647_v56  ;;  %v2103_v24 = vld [vmem:[%s2534_s15 + $0x90] sm:$0xff] }
 0x1f6   : > { %v1599_v22 = vmul.f32 %v1567_v57, %v767_v30  ;;  %v1652_v0 = vmul.f32 %v2103_v24, %v2103_v24 }
 0x1f7   : > { %v1680_v7 = vadd.f32 %v1679_v3, %v1585_v10  ;;  %v1716_v39 = vadd.f32 %v1715_v38, %v1648_v28  ;;  %v2105_v10 = vld [vmem:[%s2534_s15 + $0xa0] sm:$0xff] }
 0x1f8   : > { %1631 = vst [vmem:[%s2534_s15 + $0xe8] sm:$0xff] %v1599_v22  ;;  %v1654_v18 = vmul.f32 %v2105_v10, %v2105_v10  ;;  %v1663_v51 = vmul.f32 %v1599_v22, %v1599_v22 }
 0x1f9   : > { %v1681_v16 = vadd.f32 %v2101_v37, %v1680_v7  ;;  %v1717_v5 = vadd.f32 %v1716_v39, %v1649_v52 }
 0x1fb   : > { %v1682_v19 = vadd.f32 %v2102_v34, %v1681_v16  ;;  %v1718_v29 = vadd.f32 %v1717_v5, %v1650_v33 }
 0x1fd   : > { %v1683_v8 = vadd.f32 %v2103_v24, %v1682_v19  ;;  %v1719_v35 = vadd.f32 %v1718_v29, %v1651_v53 }
 0x1ff   : > { %v1684_v41 = vadd.f32 %v2104_v25, %v1683_v8  ;;  %v1720_v40 = vadd.f32 %v1719_v35, %v1652_v0 }
 0x201   : > { %v1685_v23 = vadd.f32 %v2105_v10, %v1684_v41  ;;  %v1721_v2 = vadd.f32 %v1720_v40, %v1653_v50 }
 0x203   : > { %v1722_v60 = vadd.f32 %v1721_v2, %v1654_v18  ;;  %v1686_v15 = vadd.f32 %v1685_v23, %v2856_v63 }
 0x205   : > { %v1687_v31 = vadd.f32 %v2106_v26, %v1686_v15  ;;  %v1723_v14 = vadd.f32 %v1722_v60, %v1655_v12 }
 0x207   : > { %v1688_v55 = vadd.f32 %v2107_v20, %v1687_v31  ;;  %v1724_v13 = vadd.f32 %v1723_v14, %v1656_v61 }
 0x209   : > { %v1689_v9 = vadd.f32 %v1688_v55, %v2971_v21  ;;  %v1725_v45 = vadd.f32 %v1724_v13, %v1657_v6 }
 0x20b   : > { %v1690_v54 = vadd.f32 %v1689_v9, %v3102_v58  ;;  %v1726_v63 = vadd.f32 %v1725_v45, %v1658_v48 }
 0x20d   : > { %v1691_v27 = vadd.f32 %v1690_v54, %v2934_v47  ;;  %v1727_v36 = vadd.f32 %v1726_v63, %v1659_v59  ;;  %v1664_v47 = vmul.f32 %v3145_v44, %v3145_v44 }
 0x20f   : > { %v1692_v49 = vadd.f32 %v1691_v27, %v3053_v42  ;;  %v1728_v21 = vadd.f32 %v1727_v36, %v1660_v1  ;;  %v1665_v42 = vmul.f32 %v3186_v4, %v3186_v4 }
 0x211   : > { %v1693_v46 = vadd.f32 %v1692_v49, %v3173_v11  ;;  %v1729_v58 = vadd.f32 %v1728_v21, %v1661_v17 }
 0x213   : > { %v1694_v56 = vadd.f32 %v1693_v46, %v1599_v22  ;;  %v1730_v32 = vadd.f32 %v1729_v58, %v1662_v62 }
 0x215   : > { %v1695_v43 = vadd.f32 %v1694_v56, %v3145_v44  ;;  %v1731_v28 = vadd.f32 %v1730_v32, %v1663_v51 }
 0x217   : > { %v1696_v3 = vadd.f32 %v1695_v43, %v3186_v4  ;;  %v1732_v38 = vadd.f32 %v1731_v28, %v1664_v47 }
 0x219   : > { %v1697_v30 = vrot.slane %v1696_v3, 4  ;;  %v1733_v57 = vadd.f32 %v1732_v38, %v1665_v42 }
 0x21b   : > { %v1698_v11 = vadd.f32 %v1697_v30, %v1696_v3  ;;  %v1734_v52 = vrot.slane %v1733_v57, 4 }
 0x21d   : > { %v1699_v7 = vrot.slane %v1698_v11, 2  ;;  %v1735_v39 = vadd.f32 %v1734_v52, %v1733_v57 }
 0x21f   : > { %v1700_v22 = vadd.f32 %v1699_v7, %v1698_v11  ;;  %v1736_v37 = vrot.slane %v1735_v39, 2 }
 0x221   : > { %v1701_v33 = vrot.slane %v1700_v22, 1  ;;  %v1737_v16 = vadd.f32 %v1736_v37, %v1735_v39 }
 0x223   : > { %v1738_v44 = vrot.slane %v1737_v16, 1  ;;  %v1702_v4 = vadd.f32 %v1701_v33, %v1700_v22 }
 0x225   : > { %v1739_v5 = vadd.f32 %v1738_v44, %v1737_v16 }
 0x227   : > { %v1741_v34 = vsel %vm1740_vm0, %v1702_v4, %v1739_v5 }
 0x228   : > { %1742 = vst [vmem:[%s314_s20] sm:$0x3] %v1741_v34 }
 0x229 PF: > { %s18_s24 = sadd.s32 1, %s2114_s24  }
 0x22a   : > { %p15_p5 = scmp.ge.s32.totalorder %s18_s24, 4  }
 0x22c   :  { %17 = sbr.rel (!%p15_p5) target bundleno = 1 (0x1), region = 89 }

// kernel: convmixer_block_forward.3
= control target key start
LH: loop header
LB: loop body
LE: loop exit
PB: predicated region body
PF: predicated region fallthrough
CT: control target
= control target key end

     0   :  { %10 = vsyncpa [#allocation4], 0  ;;  %s4599_s0 = inlined_call_operand.hbm [shape: f32[2,16,16,128], index: 0, kind: input, shape index: {}]   ;;  %s4600_s1 = inlined_call_operand.hbm [shape: f32[9,128], index: 1, kind: input, shape index: {}]   ;;  %s4601_s2 = inlined_call_operand.hbm [shape: f32[1,128], index: 2, kind: input, shape index: {}]   ;;  %s4602_s3 = inlined_call_operand.vmem [shape: f32[2,16,16,128], index: 3, kind: output, shape index: {0}]   ;;  %s4603_s4 = inlined_call_operand.vmem [shape: f32[2,2,128], index: 4, kind: output, shape index: {1}]  }
   0x1   :  { %12 = vsyncpa [#allocation4 + $0x1], 0 }
   0x2   :  { %13 = vsyncpa [#allocation6], 0  ;;  %s2815_s15 = smov 0   ;;  %s2817_s16 = smov 0  }
   0x3   :  { %s2819_s17 = smov 0   ;;  %s2821_s18 = smov 0  }
   0x4 LB: > { %s2834_s19 = sadd.s32 4294967295, %s2781_s18   ;;  %p39_p0 = scmp.ne.s32.totalorder %s2773_s16, %s2769_s15  ;;  %s2781_s18 = sphi %s2821_s18, %s4618_s18   ;;  %s2777_s17 = sphi %s2819_s17, %s4617_s17   ;;  %s2773_s16 = sphi %s2817_s16, %s4616_s16   ;;  %s2769_s15 = sphi %s2815_s15, %s4615_s15  }
   0x5   : > { %p4604_p1 = scmp.eq.s32.totalorder %s2834_s19, 0  ;;  %p2440_p2 = scmp.ge.s32.totalorder %s2781_s18, 1 }
   0x6   : > { %p144_p3 = scmp.lt.s32.totalorder %s2781_s18, 3  ;;  %s2783_s22 = smov [#allocation5]  }
   0x7   : > { %p2842_p4 = por %p4604_p1, %p39_p0  ;;  %s156_s23 = sshll.u32 %s2783_s22, 4  ;;  %s157_s23 = int_to_ptr.vmem [resolvable:$true] %s156_s23 }
   0x8   : > { %p2846_p5 = pnand %p2440_p2, %p144_p3  ;;  %s2784_s25 = smov [#allocation7]  }
   0x9   : > { %s4607_s20 = scalar_select %p2842_p4, 1, 0 }
   0xa   : > { %s4608_s21 = scalar_select %p2846_p5, 1, 0 }
   0xb   : > { %p2470_p6 = pneg %p2846_p5  ;;  %s170_s26 = sshll.u32 %s2784_s25, 4  ;;  %s2858_s26 = int_to_ptr.vmem [resolvable:$true] %s170_s26 }
   0xc   : > { %s2657_s29 = scalar_lea.hbm %s4600_s1, 256 }
   0xd   : > { %p2854_p7 = pnand %p2470_p6, %p4604_p1  ;;  %p2658_p8 = scmp.ne.s32.totalorder %s4600_s1, %s2657_s29 }
   0xe   : > { %p2664_p12 = scmp.lt.u32.totalorder %s2657_s29, %s4600_s1 }
   0xf   : > { %p2659_p9 = pneg %p2854_p7 }
  0x11   : > { %p2660_p10 = pnand %p2659_p9, %p2658_p8 }
  0x13   : > { %p2661_p11 = pneg %p2660_p10 }
  0x15   : > { %p2666_p13 = pnand %p2664_p12, %p2661_p11 }
  0x17   : > { %2669 = shalt.err (!%p2666_p13)
}
  0x18   : > { %s2670_s8 = scalar_lea.vmem %s157_s23, 256  ;;  %p2678_p6 = scmp.lt.s32.totalorder %s157_s23, %s157_s23 }
  0x19   : > { %p2671_p0 = scmp.ne.s32.totalorder %s157_s23, %s2670_s8  ;;  %p2679_p1 = scmp.lt.s32.totalorder %s2670_s8, %s2670_s8 }
  0x1b   : > { %p2673_p2 = pnand %p2671_p0, %p2659_p9  ;;  %p2680_p4 = por %p2679_p1, %p2678_p6 }
  0x1d   : > { %p2674_p3 = pneg %p2673_p2 }
  0x1f   : > { %p2681_p5 = pnand %p2680_p4, %p2674_p3 }
  0x21   : > { %2684 = shalt.err (!%p2681_p5)
}
  0x22   : > { %s2785_s9 = smov 128   ;;  %s2786_s10 = smov 8  }
  0x23   : > { %2473 = dma.hbm_to_vmem [thread:$0]  (!%p2854_p7), %s4600_s1, 256, %s157_s23, [#allocation6], %s2785_s9, %s2785_s9, %s2786_s10  }
  0x24   : > { %s2685_s15 = scalar_lea.hbm %s4601_s2, 16 }
  0x25   : > { %p2686_p1 = scmp.ne.s32.totalorder %s4601_s2, %s2685_s15  ;;  %p2692_p8 = scmp.lt.u32.totalorder %s2685_s15, %s4601_s2 }
  0x27   : > { %p2688_p4 = pnand %p2686_p1, %p2659_p9 }
  0x29   : > { %p2689_p5 = pneg %p2688_p4 }
  0x2b   : > { %p2694_p10 = pnand %p2692_p8, %p2689_p5 }
  0x2d   : > { %2697 = shalt.err (!%p2694_p10)
}
  0x2e   : > { %s2698_s23 = scalar_lea.vmem %s2858_s26, 16  ;;  %s2705_s29 = scalar_lea.vmem %s2858_s26, 32 }
  0x2f   : > { %p2699_p11 = scmp.ne.s32.totalorder %s2858_s26, %s2698_s23  ;;  %p2706_p0 = scmp.lt.s32.totalorder %s2858_s26, %s2858_s26 }
  0x30   : > { %p2707_p2 = scmp.lt.s32.totalorder %s2705_s29, %s2698_s23 }
  0x31   : > { %p2701_p12 = pnand %p2699_p11, %p2659_p9 }
  0x32   : > { %p2708_p3 = por %p2707_p2, %p2706_p0 }
  0x33   : > { %p2702_p13 = pneg %p2701_p12 }
  0x35   : > { %p2709_p6 = pnand %p2708_p3, %p2702_p13 }
  0x37   : > { %2712 = shalt.err (!%p2709_p6)
}
  0x38   : > { %2476 = dma.hbm_to_vmem [thread:$0]  (!%p2854_p7), %s4601_s2, 16, %s2858_s26, [#allocation6]  }
  0x39   : > { %s2912_s6 = sadd.s32 1, %s2781_s18   ;;  %s26_s7 = sadd.s32 1, %s2777_s17 }
  0x3a   : > { %s23_s24 = ssub.s32 %s2781_s18, %s2912_s6  ;;  %p33_p9 = scmp.ne.s32.totalorder %s2777_s17, %s2773_s16 }
  0x3b   : > { %p24_p1 = scmp.eq.s32.totalorder %s23_s24, 0  ;;  %p34_p4 = scmp.eq.s32.totalorder %s2781_s18, 0 }
  0x3c   : > { %p2483_p5 = scmp.lt.s32.totalorder %s2781_s18, 2  ;;  %s181_s8 = sand.u32 1, %s2777_s17  }
  0x3d   : > { %s2923_s11 = scalar_select %p24_p1, %s2777_s17, %s26_s7  }
  0x3e   : > { %p35_p8 = por %p34_p4, %p33_p9  ;;  %s2444_s12 = sshll.u32 %s181_s8, 8 }
  0x3f   : > { %s2458_s13 = sshll.u32 %s2781_s18, 12  ;;  %s185_s26 = scalar_lea.vmem [#allocation3], %s2444_s12 }
  0x40   : > { %s2929_s22 = scalar_lea.hbm %s4599_s0, %s2458_s13  ;;  %s192_s25 = sshll.u32 %s185_s26, 4  ;;  %s2935_s25 = int_to_ptr.vmem [resolvable:$true] %s192_s25 }
  0x41   : > { %p2931_p7 = pnand %p2483_p5, %p35_p8  ;;  %s2937_s18 = scalar_lea.sflag [#allocation4], %s181_s8 }
  0x42   : > { %s2713_s28 = scalar_lea.hbm %s2929_s22, 4096  ;;  %s2718_s30 = scalar_lea.hbm %s4599_s0, 8192 }
  0x43   : > { %p2714_p10 = scmp.ne.s32.totalorder %s2929_s22, %s2713_s28  ;;  %p2715_p11 = pneg %p2931_p7 }
  0x44   : > { %p2719_p0 = scmp.lt.u32.totalorder %s2929_s22, %s4599_s0  ;;  %p2720_p2 = scmp.lt.u32.totalorder %s2718_s30, %s2713_s28 }
  0x45   : > { %p2716_p12 = pnand %p2715_p11, %p2714_p10  ;;  %p2722_p6 = scmp.lt.u32.totalorder %s2713_s28, %s2929_s22 }
  0x46   : > { %p2721_p3 = por %p2720_p2, %p2719_p0 }
  0x47   : > { %p2717_p13 = pneg %p2716_p12 }
  0x48   : > { %p2723_p9 = por %p2722_p6, %p2721_p3 }
  0x4a   : > { %p2724_p1 = pnand %p2723_p9, %p2717_p13 }
  0x4c   : > { %2727 = shalt.err (!%p2724_p1)
}
  0x4d   : > { %s2728_s24 = scalar_lea.vmem %s2935_s25, 4096  ;;  %s2787_s8 = smov [#allocation3]  }
  0x4e   : > { %p2729_p4 = scmp.ne.s32.totalorder %s2935_s25, %s2728_s24  ;;  %s2733_s12 = sshll.u32 %s2787_s8, 4  ;;  %s2734_s12 = int_to_ptr.vmem [resolvable:$false] %s2733_s12 }
  0x4f   : > { %s2735_s13 = scalar_lea.vmem %s2734_s12, 8192  ;;  %p2736_p10 = scmp.lt.s32.totalorder %s2935_s25, %s2734_s12 }
  0x50   : > { %p2731_p5 = pnand %p2729_p4, %p2715_p11  ;;  %p2737_p12 = scmp.lt.s32.totalorder %s2735_s13, %s2728_s24 }
  0x52   : > { %p2732_p8 = pneg %p2731_p5  ;;  %p2738_p0 = por %p2737_p12, %p2736_p10 }
  0x54   : > { %p2739_p2 = pnand %p2738_p0, %p2732_p8 }
  0x56   : > { %2742 = shalt.err (!%p2739_p2)
}
  0x57   : > { %2480 = dma.hbm_to_vmem [thread:$0]  (!%p2931_p7), %s2929_s22, 4096, %s2935_s25, %s2937_s18, %s2785_s9, %s2785_s9, %s2786_s10  }
  0x58   : > { %p4611_p11 = scmp.ne.s32.totalorder %s4608_s21, 0 }
  0x59   : > { %s206_s14 = sand.u32 (!%p4611_p11), 1, %s2773_s16   ;;  %p4612_p13 = scmp.ne.s32.totalorder (!%p4611_p11), %s4607_s20, 0 }
  0x5a   : > { %204 = sbr.rel (%p4611_p11) target bundleno = 559 (0x22f), region = 32  ;;  %s2448_s15 = sshll.u32 (!%p4611_p11), %s206_s14, 8 }
  0x5b   : > { %s207_s26 = scalar_lea.sflag (!%p4611_p11), [#allocation4], %s206_s14  ;;  %s2971_s28 = scalar_lea.vmem (!%p4611_p11), [#allocation3], %s2448_s15 }
  0x61   : > { %2760 = dma.done.wait (%p4612_p13), %s207_s26, 4096  }
  0x62   : > { %2762 = vsyncadd (%p4612_p13), %s207_s26, 4294963200  ;;  %p4613_p3 = scmp.eq.s32.totalorder %s2834_s19, 0 }
  0x64   : > { %2764 = dma.done.wait (%p4613_p3), [#allocation6], 272   ;;  %p4614_p7 = pmov %p4613_p3 }
  0x65   : > { %v2788_v0 = vmov 0.0   ;;  %v409_v1 = vlaneseq  ;;  %v2982_v2 = vld [vmem:[%s2971_s28] sm:$0xff]  ;;  %v2985_v3 = vld [vmem:[%s2971_s28 + $0x8] sm:$0xff]  ;;  %v2988_v4 = vld [vmem:[%s2971_s28 + $0x10] sm:$0xff]  ;;  %p247_p6 = scmp.lt.s32.totalorder %s2834_s19, 1 }
  0x66   : > { %2766 = vsyncadd (%p4614_p7), [#allocation6], 4294967024  ;;  %256 = vst [vmem:[#allocation2] sm:$0xff] %v2788_v0  ;;  %v2994_v5 = vld [vmem:[%s2971_s28 + $0x18] sm:$0xff]  ;;  %v2997_v6 = vld [vmem:[%s2971_s28 + $0x20] sm:$0xff] }
  0x67   : > { %257 = vst [vmem:[#allocation2 + $0x8] sm:$0xff] %v2788_v0  ;;  %258 = vst [vmem:[#allocation2 + $0x10] sm:$0x3] %v2788_v0  ;;  %v3000_v7 = vld [vmem:[%s2971_s28 + $0x28] sm:$0xff]  ;;  %v3006_v8 = vld [vmem:[%s2971_s28 + $0x30] sm:$0xff]  ;;  %v3014_v11 = vshrl.u32 %v409_v1, 7 }
  0x68   : > { %259 = vst [vmem:[#allocation2 + $0x18] sm:$0xff] %v2788_v0  ;;  %260 = vst [vmem:[#allocation2 + $0x20] sm:$0xff] %v2788_v0  ;;  %v3009_v9 = vld [vmem:[%s2971_s28 + $0x38] sm:$0xff]  ;;  %v3012_v10 = vld [vmem:[%s2971_s28 + $0x40] sm:$0xff]  ;;  %s4620_s19 = smov (!%p247_p6, %s2834_s19), 1 }
  0x69   : > { %261 = vst [vmem:[#allocation2 + $0x28] sm:$0x3] %v2788_v0  ;;  %262 = vst [vmem:[#allocation2 + $0x30] sm:$0xff] %v2788_v0  ;;  %v3020_v12 = vld [vmem:[%s2971_s28 + $0x48] sm:$0xff]  ;;  %v320_v13 = vld [vmem:[%s2971_s28 + $0x50] sm:$0xff]  ;;  %v411_v24 = vsub.s32 0, %v3014_v11 }
  0x6a   : > { %263 = vst [vmem:[#allocation2 + $0x38] sm:$0xff] %v2788_v0  ;;  %264 = vst [vmem:[#allocation2 + $0x40] sm:$0x3] %v2788_v0  ;;  %v321_v14 = vld [vmem:[%s2971_s28 + $0x58] sm:$0xff]  ;;  %v322_v15 = vld [vmem:[%s2971_s28 + $0x60] sm:$0xff]  ;;  %v511_v28 = vsub.s32 1, %v3014_v11 }
  0x6b   : > { %265 = vst [vmem:[#allocation2 + $0x48] sm:$0xff] %v2788_v0  ;;  %266 = vst [vmem:[#allocation2 + $0x50] sm:$0xff] %v2788_v0  ;;  %v323_v16 = vld [vmem:[%s2971_s28 + $0x68] sm:$0xff]  ;;  %v324_v17 = vld [vmem:[%s2971_s28 + $0x70] sm:$0xff]  ;;  %v611_v29 = vsub.s32 2, %v3014_v11  ;;  %v711_v30 = vsub.s32 3, %v3014_v11 }
  0x6c   : > { %267 = vst [vmem:[#allocation2 + $0x58] sm:$0x3] %v2788_v0  ;;  %268 = vst [vmem:[#allocation2 + $0x60] sm:$0xff] %v2788_v0  ;;  %v325_v18 = vld [vmem:[%s2971_s28 + $0x78] sm:$0xff]  ;;  %v326_v19 = vld [vmem:[%s2971_s28 + $0x80] sm:$0xff]  ;;  %v811_v34 = vsub.s32 4, %v3014_v11 }
  0x6d   : > { %269 = vst [vmem:[#allocation2 + $0x68] sm:$0xff] %v2788_v0  ;;  %270 = vst [vmem:[#allocation2 + $0x70] sm:$0x3] %v2788_v0  ;;  %v327_v20 = vld [vmem:[%s2971_s28 + $0x88] sm:$0xff]  ;;  %v328_v21 = vld [vmem:[%s2971_s28 + $0x90] sm:$0xff]  ;;  %v911_v38 = vsub.s32 5, %v3014_v11 }
  0x6e   : > { %271 = vst [vmem:[#allocation2 + $0x78] sm:$0xff] %v2788_v0  ;;  %272 = vst [vmem:[#allocation2 + $0x80] sm:$0xff] %v2788_v0  ;;  %v329_v22 = vld [vmem:[%s2971_s28 + $0x98] sm:$0xff]  ;;  %v330_v23 = vld [vmem:[%s2971_s28 + $0xa0] sm:$0xff]  ;;  %v1012_v42 = vsub.s32 6, %v3014_v11  ;;  %v1112_v43 = vsub.s32 7, %v3014_v11 }
  0x6f   : > { %273 = vst [vmem:[#allocation2 + $0x88] sm:$0x3] %v2788_v0  ;;  %274 = vst [vmem:[#allocation2 + $0x90] sm:$0xff] %v2788_v0  ;;  %v331_v25 = vld [vmem:[%s2971_s28 + $0xa8] sm:$0xff]  ;;  %v332_v26 = vld [vmem:[%s2971_s28 + $0xb0] sm:$0xff]  ;;  %s2459_s20 = sshll.u32 %s4620_s19, 8 }
  0x70   : > { %275 = vst [vmem:[#allocation2 + $0x98] sm:$0xff] %v2788_v0  ;;  %276 = vst [vmem:[#allocation2 + $0xa0] sm:$0x3] %v2788_v0  ;;  %v333_v27 = vld [vmem:[%s2971_s28 + $0xb8] sm:$0xff]  ;;  %v334_v31 = vld [vmem:[%s2971_s28 + $0xc0] sm:$0xff]  ;;  %s3301_s10 = scalar_lea.vmem %s4602_s3, %s2459_s20  ;;  %s2453_s22 = sshll.u32 %s4620_s19, 1 }
  0x71   : > { %277 = vst [vmem:[#allocation2 + $0xa8] sm:$0xff] %v2788_v0  ;;  %278 = vst [vmem:[#allocation2 + $0xb0] sm:$0xff] %v2788_v0  ;;  %v335_v32 = vld [vmem:[%s2971_s28 + $0xc8] sm:$0xff]  ;;  %v336_v33 = vld [vmem:[%s2971_s28 + $0xd0] sm:$0xff]  ;;  %s255_s18 = scalar_lea.vmem %s4603_s4, %s2453_s22 }
  0x72   : > { %279 = vst [vmem:[#allocation2 + $0xb8] sm:$0x3] %v2788_v0  ;;  %280 = vst [vmem:[#allocation2 + $0xc0] sm:$0xff] %v2788_v0  ;;  %v337_v35 = vld [vmem:[%s2971_s28 + $0xd8] sm:$0xff]  ;;  %v338_v36 = vld [vmem:[%s2971_s28 + $0xe0] sm:$0xff] }
  0x73   : > { %281 = vst [vmem:[#allocation2 + $0xc8] sm:$0xff] %v2788_v0  ;;  %282 = vst [vmem:[#allocation2 + $0xd0] sm:$0x3] %v2788_v0  ;;  %v339_v37 = vld [vmem:[%s2971_s28 + $0xe8] sm:$0xff]  ;;  %v340_v39 = vld [vmem:[%s2971_s28 + $0xf0] sm:$0xff] }
  0x74   : > { %283 = vst [vmem:[#allocation2 + $0xd8] sm:$0xff] %v2788_v0  ;;  %284 = vst [vmem:[#allocation2 + $0xe0] sm:$0xff] %v2788_v0  ;;  %v341_v40 = vld [vmem:[%s2971_s28 + $0xf8] sm:$0xff]  ;;  %v375_v41 = vld [vmem:[#allocation5] sm:$0xff] }
  0x75   : > { %285 = vst [vmem:[#allocation2 + $0xe8] sm:$0x3] %v2788_v0  ;;  %286 = vst [vmem:[#allocation2 + $0xf0] sm:$0xff] %v2788_v0  ;;  %v3053_v44 = vrot.slane %v375_v41, %v411_v24  ;;  %v477_v45 = vld [vmem:[#allocation2 + $0x1] sm:$0xff]  ;;  %v3055_v46 = vrot.slane %v375_v41, %v511_v28  ;;  %v3057_v48 = vrot.slane %v375_v41, %v611_v29  ;;  %v478_v56 = vld [vmem:[#allocation2 + $0x9] sm:$0xff] }
  0x76   : > { %287 = vst [vmem:[#allocation2 + $0xf8] sm:$0xff] %v2788_v0  ;;  %288 = vst [vmem:[#allocation2 + $0x100] sm:$0x3] %v2788_v0  ;;  %v577_v47 = vld [vmem:[#allocation2 + $0x2] sm:$0xff]  ;;  %v3059_v49 = vrot.slane %v375_v41, %v711_v30  ;;  %v3061_v51 = vrot.slane %v375_v41, %v811_v34  ;;  %v3066_v55 = vrot.slane %v375_v41, %v911_v38  ;;  %v578_v60 = vld [vmem:[#allocation2 + $0xa] sm:$0xff] }
  0x77   : > { %289 = vst [vmem:[#allocation2 + $0x108] sm:$0xff] %v2788_v0  ;;  %290 = vst [vmem:[#allocation2 + $0x110] sm:$0xff] %v2788_v0  ;;  %v413_v52 = vmul.f32 0.0, %v3053_v44  ;;  %v513_v53 = vmul.f32 %v3055_v46, %v477_v45  ;;  %v613_v54 = vmul.f32 %v3057_v48, %v577_v47  ;;  %v3068_v58 = vrot.slane %v375_v41, %v1012_v42 }
  0x78   : > { %291 = vst [vmem:[#allocation2 + $0x118] sm:$0x3] %v2788_v0  ;;  %292 = vst [vmem:[#allocation2 + $0x120] sm:$0xff] %v2788_v0  ;;  %v3070_v59 = vrot.slane %v375_v41, %v1112_v43  ;;  %v514_v1 = vmul.f32 %v3055_v46, %v478_v56  ;;  %v614_v11 = vmul.f32 %v3057_v48, %v578_v60 }
  0x79   : > { %293 = vst [vmem:[#allocation2 + $0x128] sm:$0xff] %v2788_v0  ;;  %294 = vst [vmem:[#allocation2 + $0x130] sm:$0x3] %v2788_v0  ;;  %v545_v62 = vadd.f32 %v513_v53, %v413_v52  ;;  %v515_v24 = vmul.f32 %v3055_v46, %v2982_v2  ;;  %v814_v28 = vmul.f32 %v3061_v51, %v2985_v3 }
  0x7a   : > { %295 = vst [vmem:[#allocation2 + $0x138] sm:$0xff] %v2788_v0  ;;  %296 = vst [vmem:[#allocation2 + $0x140] sm:$0xff] %v2788_v0  ;;  %v1115_v38 = vmul.f32 %v3070_v59, %v2994_v5  ;;  %v815_v41 = vmul.f32 %v3061_v51, %v2988_v4  ;;  %v816_v53 = vmul.f32 %v3061_v51, %v2994_v5 }
  0x7b   : > { %297 = vst [vmem:[#allocation2 + $0x148] sm:$0x3] %v2788_v0  ;;  %298 = vst [vmem:[#allocation2 + $0x150] sm:$0xff] %v2788_v0 }
  0x7c   : > { %299 = vst [vmem:[#allocation2 + $0x158] sm:$0xff] %v2788_v0  ;;  %300 = vst [vmem:[#allocation2 + $0x160] sm:$0x3] %v2788_v0 }
  0x7d   : > { %301 = vst [vmem:[#allocation2 + $0x168] sm:$0xff] %v2788_v0  ;;  %302 = vst [vmem:[#allocation2 + $0x170] sm:$0xff] %v2788_v0 }
  0x7e   : > { %303 = vst [vmem:[#allocation2 + $0x178] sm:$0x3] %v2788_v0  ;;  %304 = vst [vmem:[#allocation2 + $0x180] sm:$0xff] %v2788_v0 }
  0x7f   : > { %305 = vst [vmem:[#allocation2 + $0x188] sm:$0xff] %v2788_v0  ;;  %306 = vst [vmem:[#allocation2 + $0x190] sm:$0x3] %v2788_v0 }
  0x80   : > { %307 = vst [vmem:[#allocation2 + $0x198] sm:$0xff] %v2788_v0  ;;  %308 = vst [vmem:[#allocation2 + $0x1a0] sm:$0xff] %v2788_v0 }
  0x81   : > { %309 = vst [vmem:[#allocation2 + $0x1a8] sm:$0x3] %v2788_v0  ;;  %343 = vst [vmem:[#allocation2 + $0x19] sm:$0xff] %v2982_v2 }
  0x82   : > { %344 = vst [vmem:[#allocation2 + $0x21] sm:$0xff] %v2985_v3  ;;  %345 = vst [vmem:[#allocation2 + $0x31] sm:$0xff] %v2988_v4 }
  0x83   : > { %346 = vst [vmem:[#allocation2 + $0x39] sm:$0xff] %v2994_v5  ;;  %347 = vst [vmem:[#allocation2 + $0x49] sm:$0xff] %v2997_v6 }
  0x84   : > { %348 = vst [vmem:[#allocation2 + $0x51] sm:$0xff] %v3000_v7  ;;  %349 = vst [vmem:[#allocation2 + $0x61] sm:$0xff] %v3006_v8 }
  0x85   : > { %350 = vst [vmem:[#allocation2 + $0x69] sm:$0xff] %v3009_v9  ;;  %351 = vst [vmem:[#allocation2 + $0x79] sm:$0xff] %v3012_v10 }
  0x86   : > { %352 = vst [vmem:[#allocation2 + $0x81] sm:$0xff] %v3020_v12  ;;  %353 = vst [vmem:[#allocation2 + $0x91] sm:$0xff] %v320_v13  ;;  %v3075_v13 = vld [vmem:[#allocation5 + $0x8] ss:$0 sm:$0xff] }
  0x87   : > { %354 = vst [vmem:[#allocation2 + $0x99] sm:$0xff] %v321_v14  ;;  %355 = vst [vmem:[#allocation2 + $0xa9] sm:$0xff] %v322_v15  ;;  %v813_v14 = vmul.f32 %v3061_v51, %v2982_v2 }
  0x88   : > { %356 = vst [vmem:[#allocation2 + $0xb1] sm:$0xff] %v323_v16  ;;  %357 = vst [vmem:[#allocation2 + $0xc1] sm:$0xff] %v324_v17  ;;  %v677_v50 = vld [vmem:[#allocation2 + $0x18] sm:$0xff]  ;;  %v645_v16 = vadd.f32 %v613_v54, %v545_v62 }
  0x89   : > { %358 = vst [vmem:[#allocation2 + $0xc9] sm:$0xff] %v325_v18  ;;  %359 = vst [vmem:[#allocation2 + $0xd9] sm:$0xff] %v326_v19  ;;  %v877_v57 = vld [vmem:[#allocation2 + $0x1a] sm:$0xff]  ;;  %v713_v63 = vmul.f32 %v3059_v49, %v677_v50  ;;  %v978_v0 = vld [vmem:[#allocation2 + $0x30] sm:$0xff]  ;;  %v546_v18 = vadd.f32 %v514_v1, %v413_v52  ;;  %v517_v1 = vmul.f32 %v3055_v46, %v2988_v4 }
  0x8a   : > { %360 = vst [vmem:[#allocation2 + $0xe1] sm:$0xff] %v327_v20  ;;  %361 = vst [vmem:[#allocation2 + $0xf1] sm:$0xff] %v328_v21  ;;  %v678_v61 = vld [vmem:[#allocation2 + $0x20] sm:$0xff]  ;;  %v1178_v15 = vld [vmem:[#allocation2 + $0x32] sm:$0xff]  ;;  %v913_v17 = vmul.f32 %v3066_v55, %v877_v57  ;;  %v1014_v21 = vmul.f32 %v3068_v58, %v978_v0  ;;  %v417_v60 = vmul.f32 %v978_v0, %v3053_v44 }
  0x8b   : > { %362 = vst [vmem:[#allocation2 + $0xf9] sm:$0xff] %v329_v22  ;;  %363 = vst [vmem:[#allocation2 + $0x109] sm:$0xff] %v330_v23  ;;  %v714_v19 = vmul.f32 %v3059_v49, %v678_v61  ;;  %v878_v20 = vld [vmem:[#allocation2 + $0x22] sm:$0xff]  ;;  %v1114_v22 = vmul.f32 %v3070_v59, %v2988_v4  ;;  %v415_v23 = vmul.f32 %v677_v50, %v3053_v44  ;;  %v3090_v29 = vld [vmem:[#allocation2 + $0x38] sm:$0xff] }
  0x8c   : > { %364 = vst [vmem:[#allocation2 + $0x111] sm:$0xff] %v331_v25  ;;  %365 = vst [vmem:[#allocation2 + $0x121] sm:$0xff] %v332_v26  ;;  %v745_v25 = vadd.f32 %v713_v63, %v645_v16  ;;  %v1214_v26 = vmul.f32 %v3075_v13, %v1178_v15  ;;  %v914_v30 = vmul.f32 %v3066_v55, %v878_v20  ;;  %v3096_v2 = vld [vmem:[#allocation2 + $0x3a] sm:$0xff]  ;;  %v3115_v63 = vld [vmem:[#allocation2 + $0x48] sm:$0xff] }
  0x8d   : > { %366 = vst [vmem:[#allocation2 + $0x129] sm:$0xff] %v333_v27  ;;  %367 = vst [vmem:[#allocation2 + $0x139] sm:$0xff] %v334_v31  ;;  %v646_v27 = vadd.f32 %v614_v11, %v546_v18  ;;  %v1015_v31 = vmul.f32 %v3068_v58, %v3090_v29  ;;  %v616_v47 = vmul.f32 %v878_v20, %v3057_v48 }
  0x8e   : > { %368 = vst [vmem:[#allocation2 + $0x141] sm:$0xff] %v335_v32  ;;  %369 = vst [vmem:[#allocation2 + $0x151] sm:$0xff] %v336_v33  ;;  %v547_v32 = vadd.f32 %v515_v24, %v415_v23  ;;  %v615_v33 = vmul.f32 %v877_v57, %v3057_v48  ;;  %v845_v34 = vadd.f32 %v813_v14, %v745_v25 }
  0x8f   : > { %370 = vst [vmem:[#allocation2 + $0x159] sm:$0xff] %v337_v35  ;;  %371 = vst [vmem:[#allocation2 + $0x169] sm:$0xff] %v338_v36  ;;  %v746_v35 = vadd.f32 %v714_v19, %v646_v27  ;;  %v416_v36 = vmul.f32 %v678_v61, %v3053_v44  ;;  %v1215_v50 = vmul.f32 %v3075_v13, %v3096_v2  ;;  %v3122_v19 = vld [vmem:[#allocation7] ss:$0 sm:$0xff]  ;;  %v3130_v27 = vld [vmem:[#allocation2 + $0x50] sm:$0xff] }
  0x90   : > { %372 = vst [vmem:[#allocation2 + $0x171] sm:$0xff] %v339_v37  ;;  %373 = vst [vmem:[#allocation2 + $0x181] sm:$0xff] %v340_v39  ;;  %v516_v37 = vmul.f32 %v3055_v46, %v2985_v3  ;;  %v647_v39 = vadd.f32 %v615_v33, %v547_v32  ;;  %v945_v42 = vadd.f32 %v913_v17, %v845_v34  ;;  %v3137_v34 = vld [vmem:[#allocation2 + $0x4a] sm:$0xff] }
  0x91   : > { %374 = vst [vmem:[#allocation2 + $0x189] sm:$0xff] %v341_v40  ;;  %v715_v40 = vmul.f32 %v978_v0, %v3059_v49  ;;  %v846_v43 = vadd.f32 %v814_v28, %v746_v35  ;;  %v716_v3 = vmul.f32 %v3090_v29, %v3059_v49  ;;  %v915_v62 = vmul.f32 %v1178_v15, %v3066_v55  ;;  %v3132_v28 = vld [vmem:[#allocation2 + $0x52] sm:$0xff] }
  0x92   : > { %v548_v45 = vadd.f32 %v516_v37, %v416_v36  ;;  %v1046_v54 = vadd.f32 %v1014_v21, %v945_v42  ;;  %v617_v11 = vmul.f32 %v1178_v15, %v3057_v48  ;;  %v1016_v17 = vmul.f32 %v3068_v58, %v3115_v63 }
  0x93   : > { %v747_v52 = vadd.f32 %v715_v40, %v647_v39  ;;  %v946_v56 = vadd.f32 %v914_v30, %v846_v43  ;;  %v1116_v0 = vmul.f32 %v3070_v59, %v2997_v6  ;;  %v549_v21 = vadd.f32 %v517_v1, %v417_v60  ;;  %v3159_v1 = vld [vmem:[#allocation2 + $0x62] sm:$0xff] }
  0x94   : > { %v648_v57 = vadd.f32 %v616_v47, %v548_v45  ;;  %v1146_v14 = vadd.f32 %v1114_v22, %v1046_v54  ;;  %v717_v23 = vmul.f32 %v3115_v63, %v3059_v49  ;;  %v916_v15 = vmul.f32 %v3096_v2, %v3066_v55  ;;  %v3148_v45 = vld [vmem:[#allocation2 + $0x60] sm:$0xff] }
  0x95   : > { %v847_v61 = vadd.f32 %v815_v41, %v747_v52  ;;  %v1047_v16 = vadd.f32 %v1015_v31, %v946_v56  ;;  %v649_v30 = vadd.f32 %v617_v11, %v549_v21  ;;  %v817_v31 = vmul.f32 %v3061_v51, %v2997_v6 }
  0x96   : > { %v748_v18 = vadd.f32 %v716_v3, %v648_v57  ;;  %v1246_v24 = vadd.f32 %v1214_v26, %v1146_v14  ;;  %v1017_v35 = vmul.f32 %v3068_v58, %v3130_v27  ;;  %v1216_v37 = vmul.f32 %v3075_v13, %v3137_v34 }
  0x97   : > { %v947_v20 = vadd.f32 %v915_v62, %v847_v61  ;;  %v1147_v4 = vadd.f32 %v1115_v38, %v1047_v16  ;;  %v1117_v38 = vmul.f32 %v3070_v59, %v3000_v7  ;;  %v749_v39 = vadd.f32 %v717_v23, %v649_v30 }
  0x98   : > { %v848_v25 = vadd.f32 %v816_v53, %v748_v18  ;;  %v1285_v32 = vadd.f32 %v3122_v19, %v1246_v24  ;;  %v1217_v43 = vmul.f32 %v3075_v13, %v3132_v28  ;;  %v917_v52 = vmul.f32 %v3137_v34, %v3066_v55 }
  0x99   : > { %v1048_v22 = vadd.f32 %v1016_v17, %v947_v20  ;;  %v1247_v33 = vadd.f32 %v1215_v50, %v1147_v4  ;;  %v849_v50 = vadd.f32 %v817_v31, %v749_v39  ;;  %v1018_v3 = vmul.f32 %v3068_v58, %v3148_v45 }
  0x9a   : > { %v948_v26 = vadd.f32 %v916_v15, %v848_v25  ;;  %v1349_v40 = vmul.f32 0.70710677, %v1285_v32  ;;  %v1118_v56 = vmul.f32 %v3070_v59, %v3006_v8  ;;  %v418_v57 = vmul.f32 %v3090_v29, %v3053_v44 }
  0x9b   : > { %v1148_v36 = vadd.f32 %v1116_v0, %v1048_v22  ;;  %v1286_v41 = vadd.f32 %v3122_v19, %v1247_v33  ;;  %v949_v62 = vadd.f32 %v917_v52, %v849_v50  ;;  %v518_v11 = vmul.f32 %v3055_v46, %v2994_v5 }
  0x9c   : > { %v1049_v42 = vadd.f32 %v1017_v35, %v948_v26  ;;  %v1445_v53 = vand.u32 2147483647, %v1349_v40  ;;  %v1218_v18 = vmul.f32 %v3075_v13, %v3159_v1  ;;  %v618_v29 = vmul.f32 %v3096_v2, %v3057_v48 }
  0x9d   : > { %v1248_v47 = vadd.f32 %v1216_v37, %v1148_v36  ;;  %v1350_v54 = vmul.f32 0.70710677, %v1286_v41  ;;  %v718_v21 = vmul.f32 %v3130_v27, %v3059_v49  ;;  %v1050_v22 = vadd.f32 %v1018_v3, %v949_v62 }
  0x9e   : > { %v1149_v61 = vadd.f32 %v1117_v38, %v1049_v42  ;;  %v1477_v14 = vmul.f32 0.3275911, %v1445_v53  ;;  %v1893_v16 = vsub.f32 0.0, %v1445_v53  ;;  %v550_v30 = vadd.f32 %v518_v11, %v418_v57 }
  0x9f   : > { %v1287_v60 = vadd.f32 %v3122_v19, %v1248_v47  ;;  %v1446_v17 = vand.u32 2147483647, %v1350_v54  ;;  %v3170_v31 = vmul.f32 0.5, %v1285_v32  ;;  %v818_v26 = vmul.f32 %v3061_v51, %v3000_v7 }
  0xa0   : > { %v1249_v0 = vadd.f32 %v1217_v43, %v1149_v61  ;;  %v1509_v23 = vadd.f32 1.0, %v1477_v14  ;;  %v1925_v24 = vmul.f32 %v1893_v16, %v1445_v53  ;;  %vm1381_vm0 = vcmp.ge.f32.partialorder %v1349_v40, 0.0  ;;  %v3192_v16 = vld [vmem:[#allocation2 + $0x68] sm:$0xff] }
  0xa1   : > { %v1351_v20 = vmul.f32 0.70710677, %v1287_v60  ;;  %v1478_v4 = vmul.f32 0.3275911, %v1446_v17  ;;  %v1894_v25 = vsub.f32 0.0, %v1446_v17  ;;  %vm1382_vm1 = vcmp.ge.f32.partialorder %v1350_v54, 0.0 }
  0xa2   : > { %v1288_v5 = vadd.f32 %v3122_v19, %v1249_v0  ;;  %2524 = vrcp.f32 %v1509_v23  ;;  %v1957_v35 = vmul.f32 1.442695, %v1925_v24  ;;  %v1150_v38 = vadd.f32 %v1118_v56, %v1050_v22 }
  0xa3   : > { %v1447_v15 = vand.u32 2147483647, %v1351_v20  ;;  %v1510_v33 = vadd.f32 1.0, %v1478_v4  ;;  %vm1383_vm2 = vcmp.ge.f32.partialorder %v1351_v20, 0.0  ;;  %v1926_v36 = vmul.f32 %v1894_v25, %v1446_v17 }
  0xa4   : > { %v1352_v37 = vmul.f32 0.70710677, %v1288_v5  ;;  %v650_v43 = vadd.f32 %v618_v29, %v550_v30  ;;  %v2789_v47 = vmov -1.0   ;;  %v3177_v50 = vmul.f32 0.5, %v1286_v41 }
  0xa5   : > { %v1479_v2 = vmul.f32 0.3275911, %v1447_v15  ;;  %2526 = vrcp.f32 %v1510_v33  ;;  %v1895_v42 = vsub.f32 0.0, %v1447_v15  ;;  %v3175_v32 = vsel %vm1381_vm0, 1.0, %v2789_v47 }
  0xa6   : > { %v1448_v52 = vand.u32 2147483647, %v1352_v37  ;;  %v1250_v3 = vadd.f32 %v1218_v18, %v1150_v38  ;;  %v3181_v40 = vsel %vm1382_vm1, 1.0, %v2789_v47  ;;  %v3183_v53 = vmul.f32 0.5, %v1287_v60 }
  0xa7   : > { %v1511_v39 = vadd.f32 1.0, %v1479_v2  ;;  %v750_v56 = vadd.f32 %v718_v21, %v650_v43  ;;  %v3187_v57 = vsel %vm1383_vm2, 1.0, %v2789_v47  ;;  %v1959_v41 = vmul.f32 1.442695, %v1926_v36 }
  0xa8   : > { %v1480_v61 = vmul.f32 0.3275911, %v1448_v52  ;;  %v1289_v62 = vadd.f32 %v3122_v19, %v1250_v3  ;;  %v1927_v11 = vmul.f32 %v1895_v42, %v1447_v15  ;;  %v918_v54 = vmul.f32 %v3132_v28, %v3066_v55 }
  0xa9   : > { %2528 = vrcp.f32 %v1511_v39  ;;  %v850_v14 = vadd.f32 %v818_v26, %v750_v56  ;;  %v1896_v17 = vsub.f32 0.0, %v1448_v52  ;;  %v1019_v20 = vmul.f32 %v3068_v58, %v3192_v16 }
  0xaa   : > { %2530 = vpow2.f32 %v1957_v35  ;;  %v1512_v60 = vadd.f32 1.0, %v1480_v61  ;;  %v3194_v18 = vmul.f32 0.70710677, %v1289_v62  ;;  %v1119_v29 = vmul.f32 %v3070_v59, %v3009_v9 }
  0xab   : > { %v950_v0 = vadd.f32 %v918_v54, %v850_v14  ;;  %v419_v21 = vmul.f32 %v3115_v63, %v3053_v44  ;;  %v519_v23 = vmul.f32 %v3055_v46, %v2997_v6  ;;  %v3206_v4 = vmul.f32 0.5, %v1288_v5  ;;  %v3210_v63 = vld [vmem:[#allocation2 + $0x6a] sm:$0xff] }
  0xac   : > { %v3204_v24 = vpop.eup %2524  ;;  %vm1384_vm3 = vcmp.ge.f32.partialorder %v1352_v37, 0.0  ;;  %2532 = vrcp.f32 %v1512_v60  ;;  %v1449_v25 = vand.u32 2147483647, %v3194_v18  ;;  %v1961_v22 = vmul.f32 1.442695, %v1927_v11 }
  0xad   : > { %v1605_v15 = vmul.f32 1.0614054, %v3204_v24  ;;  %v1051_v30 = vadd.f32 %v1019_v20, %v950_v0  ;;  %v551_v33 = vadd.f32 %v519_v23, %v419_v21  ;;  %2534 = vpow2.f32 %v1959_v41 }
  0xae   : > { %v1928_v26 = vmul.f32 %v1896_v17, %v1448_v52  ;;  %v1481_v2 = vmul.f32 0.3275911, %v1449_v25  ;;  %v619_v6 = vmul.f32 %v3137_v34, %v3057_v48  ;;  %v1219_v38 = vmul.f32 %v3075_v13, %v3210_v63 }
  0xaf   : > { %v3214_v35 = vpop.eup %2526  ;;  %v1637_v5 = vadd.f32 -1.4531521, %v1605_v15  ;;  %v1151_v36 = vadd.f32 %v1119_v29, %v1051_v30  ;;  %v719_v39 = vmul.f32 %v3148_v45, %v3059_v49  ;;  %v3223_v43 = vsel %vm1384_vm3, 1.0, %v2789_v47  ;;  %v3239_v15 = vld [vmem:[#allocation2 + $0x78] sm:$0xff] }
  0xb0   : > { %v1606_v42 = vmul.f32 1.0614054, %v3214_v35  ;;  %v1513_v52 = vadd.f32 1.0, %v1481_v2  ;;  %v651_v3 = vadd.f32 %v619_v6, %v551_v33  ;;  %2536 = vpow2.f32 %v1961_v22 }
  0xb1   : > { %v1669_v34 = vmul.f32 %v3204_v24, %v1637_v5  ;;  %v1251_v61 = vadd.f32 %v1219_v38, %v1151_v36  ;;  %v819_v41 = vmul.f32 %v3061_v51, %v3006_v8  ;;  %v3231_v60 = vmul.f32 0.5, %v1289_v62 }
  0xb2   : > { %v1638_v14 = vadd.f32 -1.4531521, %v1606_v42  ;;  %2538 = vrcp.f32 %v1513_v52  ;;  %v1963_v17 = vmul.f32 1.442695, %v1928_v26  ;;  %v751_v0 = vadd.f32 %v719_v39, %v651_v3 }
  0xb3   : > { %v3225_v56 = vpop.eup %2528  ;;  %v1701_v37 = vadd.f32 1.4214138, %v1669_v34  ;;  %v3234_v20 = vadd.f32 %v3122_v19, %v1251_v61  ;;  %v1897_v23 = vsub.f32 0.0, %v1449_v25  ;;  %v919_v8 = vmul.f32 %v3159_v1, %v3066_v55 }
  0xb4   : > { %v2531_v11 = vpop.eup %2530  ;;  %v1607_v54 = vmul.f32 1.0614054, %v3225_v56  ;;  %v1670_v29 = vmul.f32 %v3214_v35, %v1638_v14  ;;  %v851_v30 = vadd.f32 %v819_v41, %v751_v0  ;;  %v1020_v33 = vmul.f32 %v3068_v58, %v3239_v15 }
  0xb5   : > { %v1733_v22 = vmul.f32 %v3204_v24, %v1701_v37  ;;  %v3243_v62 = vmul.f32 0.70710677, %v3234_v20  ;;  %v1120_v5 = vmul.f32 %v3070_v59, %v3012_v10  ;;  %v420_v36 = vmul.f32 %v3130_v27, %v3053_v44  ;;  %v3260_v37 = vld [vmem:[#allocation2 + $0x7a] sm:$0xff] }
  0xb6   : > { %v1639_v21 = vadd.f32 -1.4531521, %v1607_v54  ;;  %v3247_v26 = vpop.eup %2532  ;;  %v1702_v2 = vadd.f32 1.4214138, %v1670_v29  ;;  %v951_v42 = vadd.f32 %v919_v8, %v851_v30  ;;  %v520_v52 = vmul.f32 %v3055_v46, %v3000_v7 }
  0xb7   : > { %v1765_v38 = vadd.f32 -0.28449672, %v1733_v22  ;;  %v1608_v39 = vmul.f32 1.0614054, %v3247_v26  ;;  %v2535_v3 = vpop.eup %2534  ;;  %2540 = vpow2.f32 %v1963_v17  ;;  %v1450_v41 = vand.u32 2147483647, %v3243_v62 }
  0xb8   : > { %v1671_v6 = vmul.f32 %v3225_v56, %v1639_v21  ;;  %v1734_v34 = vmul.f32 %v3214_v35, %v1702_v2  ;;  %v1929_v54 = vmul.f32 %v1897_v23, %v1449_v25  ;;  %v1052_v27 = vadd.f32 %v1020_v33, %v951_v42 }
  0xb9   : > { %v1797_v10 = vmul.f32 %v3204_v24, %v1765_v38  ;;  %v1640_v14 = vadd.f32 -1.4531521, %v1608_v39  ;;  %v1482_v21 = vmul.f32 0.3275911, %v1450_v41  ;;  %v1220_v7 = vmul.f32 %v3075_v13, %v3260_v37 }
  0xba   : > { %v1703_v61 = vadd.f32 1.4214138, %v1671_v6  ;;  %v1766_v0 = vadd.f32 -0.28449672, %v1734_v34  ;;  %v2537_v8 = vpop.eup %2536  ;;  %v1152_v30 = vadd.f32 %v1120_v5, %v1052_v27  ;;  %v552_v2 = vadd.f32 %v520_v52, %v420_v36 }
  0xbb   : > { %v1829_v22 = vadd.f32 0.2548296, %v1797_v10  ;;  %v1672_v17 = vmul.f32 %v3247_v26, %v1640_v14  ;;  %v1514_v6 = vadd.f32 1.0, %v1482_v21  ;;  %v1898_v38 = vsub.f32 0.0, %v1450_v41 }
  0xbc   : > { %v1735_v29 = vmul.f32 %v3225_v56, %v1703_v61  ;;  %v3267_v25 = vpop.eup %2538  ;;  %v1798_v23 = vmul.f32 %v3214_v35, %v1766_v0  ;;  %v1252_v61 = vadd.f32 %v1220_v7, %v1152_v30  ;;  %v620_v5 = vmul.f32 %v3132_v28, %v3057_v48 }
  0xbd   : > { %v1861_v39 = vmul.f32 %v3204_v24, %v1829_v22  ;;  %v1704_v42 = vadd.f32 1.4214138, %v1672_v17  ;;  %v1609_v34 = vmul.f32 1.0614054, %v3267_v25  ;;  %2542 = vrcp.f32 %v1514_v6 }
  0xbe   : > { %v1767_v33 = vadd.f32 -0.28449672, %v1735_v29  ;;  %v1830_v10 = vadd.f32 0.2548296, %v1798_v23  ;;  %v3282_v24 = vadd.f32 %v3122_v19, %v1252_v61  ;;  %vm1385_vm4 = vcmp.ge.f32.partialorder %v3194_v18, 0.0 }
  0xbf   : > { %v2021_v36 = vmul.f32 %v2531_v11, %v1861_v39  ;;  %v1736_v52 = vmul.f32 %v3247_v26, %v1704_v42  ;;  %v1641_v27 = vadd.f32 -1.4531521, %v1609_v34  ;;  %v1965_v21 = vmul.f32 1.442695, %v1929_v54 }
  0xc0   : > { %v1799_v14 = vmul.f32 %v3225_v56, %v1767_v33  ;;  %v1862_v0 = vmul.f32 %v3214_v35, %v1830_v10  ;;  %v1930_v17 = vmul.f32 %v1898_v38, %v1450_v41  ;;  %v3289_v33 = vmul.f32 0.70710677, %v3282_v24 }
  0xc1   : > { %v2053_v7 = vsub.f32 1.0, %v2021_v36  ;;  %v1768_v22 = vadd.f32 -0.28449672, %v1736_v52  ;;  %v1673_v28 = vmul.f32 %v3267_v25, %v1641_v27  ;;  %v2541_v30 = vpop.eup %2540  ;;  %v652_v6 = vadd.f32 %v620_v5, %v552_v2 }
  0xc2   : > { %v1831_v29 = vadd.f32 0.2548296, %v1799_v14  ;;  %v2022_v11 = vmul.f32 %v2535_v3, %v1862_v0  ;;  %v720_v54 = vmul.f32 %v3192_v16, %v3059_v49  ;;  %2544 = vpow2.f32 %v1965_v21 }
  0xc3   : > { %v2085_v35 = vmul.f32 %v2053_v7, %v3175_v32  ;;  %v1800_v39 = vmul.f32 %v3247_v26, %v1768_v22  ;;  %v1705_v42 = vadd.f32 1.4214138, %v1673_v28  ;;  %v1451_v3 = vand.u32 2147483647, %v3289_v33 }
  0xc4   : > { %v1863_v23 = vmul.f32 %v3225_v56, %v1831_v29  ;;  %v2054_v34 = vsub.f32 1.0, %v2022_v11  ;;  %v1967_v10 = vmul.f32 1.442695, %v1930_v17  ;;  %v752_v27 = vadd.f32 %v720_v54, %v652_v6 }
  0xc5   : > { %v2117_v41 = vadd.f32 1.0, %v2085_v35  ;;  %v1832_v56 = vadd.f32 0.2548296, %v1800_v39  ;;  %v1737_v38 = vmul.f32 %v3267_v25, %v1705_v42  ;;  %v1483_v14 = vmul.f32 0.3275911, %v1451_v3 }
  0xc6   : > { %v2023_v61 = vmul.f32 %v2537_v8, %v1863_v23  ;;  %v2086_v32 = vmul.f32 %v2054_v34, %v3181_v40  ;;  %v820_v8 = vmul.f32 %v3061_v51, %v3009_v9  ;;  %v1899_v22 = vsub.f32 0.0, %v1451_v3 }
  0xc7   : > { %v2149_v5 = vmul.f32 %v2117_v41, %v3170_v31  ;;  %v1864_v36 = vmul.f32 %v3247_v26, %v1832_v56  ;;  %v1769_v52 = vadd.f32 -0.28449672, %v1737_v38  ;;  %v3308_v0 = vpop.eup %2542  ;;  %v1515_v7 = vadd.f32 1.0, %v1483_v14  ;;  %v485_v41 = vld [vmem:[#allocation2 + $0x61] sm:$0xff] }
  0xc8   : > { %v2055_v2 = vsub.f32 1.0, %v2023_v61  ;;  %v2118_v29 = vadd.f32 1.0, %v2086_v32  ;;  %v1610_v9 = vmul.f32 1.0614054, %v3308_v0  ;;  %2546 = vpow2.f32 %v1967_v10 }
  0xc9   : > { %2181 = vst [vmem:[%s3301_s10] sm:$0xff] %v2149_v5  ;;  %v2024_v40 = vmul.f32 %v2541_v30, %v1864_v36  ;;  %v1801_v28 = vmul.f32 %v3267_v25, %v1769_v52  ;;  %v1417_v17 = vsel %vm1385_vm4, 1.0, %v2789_v47  ;;  %2548 = vrcp.f32 %v1515_v7 }
  0xca   : > { %v2087_v21 = vmul.f32 %v2055_v2, %v3187_v57  ;;  %v2150_v31 = vmul.f32 %v2118_v29, %v3177_v50  ;;  %v1642_v23 = vadd.f32 -1.4531521, %v1610_v9  ;;  %v852_v6 = vadd.f32 %v820_v8, %v752_v27  ;;  %v3322_v50 = vld [vmem:[#allocation2 + $0x80] sm:$0xff] }
  0xcb   : > { %v2056_v11 = vsub.f32 1.0, %v2024_v40  ;;  %v1833_v57 = vadd.f32 0.2548296, %v1801_v28  ;;  %v2213_v35 = vmul.f32 %v2149_v5, %v2149_v5  ;;  %v1931_v39 = vmul.f32 %v1899_v22, %v1451_v3 }
  0xcc   : > { %v2119_v26 = vadd.f32 1.0, %v2087_v21  ;;  %2182 = vst [vmem:[%s3301_s10 + $0x8] sm:$0xff] %v2150_v31  ;;  %v920_v42 = vmul.f32 %v3210_v63, %v3066_v55  ;;  %v1674_v34 = vmul.f32 %v3308_v0, %v1642_v23  ;;  %v1021_v61 = vmul.f32 %v3068_v58, %v3322_v50  ;;  %v2545_v56 = vpop.eup %2544  ;;  %v3337_v21 = vld [vmem:[#allocation2 + $0x82] sm:$0xff] }
  0xcd   : > { %v2088_v54 = vmul.f32 %v2056_v11, %v3223_v43  ;;  %v1865_v18 = vmul.f32 %v3267_v25, %v1833_v57  ;;  %v1121_v10 = vmul.f32 %v3070_v59, %v3020_v12  ;;  %v2214_v32 = vmul.f32 %v2150_v31, %v2150_v31  ;;  %v3348_v57 = vld [vmem:[#allocation2 + $0x79] sm:$0xff] }
  0xce   : > { %v2151_v30 = vmul.f32 %v2119_v26, %v3183_v53  ;;  %v952_v3 = vadd.f32 %v920_v42, %v852_v6  ;;  %v1706_v43 = vadd.f32 1.4214138, %v1674_v34  ;;  %v421_v36 = vmul.f32 %v3148_v45, %v3053_v44 }
  0xcf   : > { %v2120_v2 = vadd.f32 1.0, %v2088_v54  ;;  %v2025_v14 = vmul.f32 %v2545_v56, %v1865_v18  ;;  %v521_v52 = vmul.f32 %v3055_v46, %v485_v41  ;;  %v621_v12 = vmul.f32 %v3159_v1, %v3057_v48 }
  0xd0   : > { %2183 = vst [vmem:[%s3301_s10 + $0x10] sm:$0xff] %v2151_v30  ;;  %v2215_v38 = vmul.f32 %v2151_v30, %v2151_v30  ;;  %v2245_v53 = vadd.f32 %v2151_v30, %v2149_v5  ;;  %v1053_v8 = vadd.f32 %v1021_v61, %v952_v3  ;;  %v1738_v5 = vmul.f32 %v3308_v0, %v1706_v43 }
  0xd1   : > { %v2152_v27 = vmul.f32 %v2120_v2, %v3206_v4  ;;  %v2057_v29 = vsub.f32 1.0, %v2025_v14  ;;  %v1221_v22 = vmul.f32 %v3075_v13, %v3337_v21  ;;  %v553_v40 = vadd.f32 %v521_v52, %v421_v36 }
  0xd2   : > { %v2275_v25 = vadd.f32 %v2215_v38, %v2213_v35  ;;  %v1153_v7 = vadd.f32 %v1121_v10, %v1053_v8  ;;  %v721_v45 = vmul.f32 %v3239_v15, %v3059_v49  ;;  %v2547_v28 = vpop.eup %2546  ;;  %v1770_v11 = vadd.f32 -0.28449672, %v1738_v5  ;;  %v3365_v10 = vld [vmem:[#allocation2 + $0x90] sm:$0xff] }
  0xd3   : > { %2184 = vst [vmem:[%s3301_s10 + $0x18] sm:$0xff] %v2152_v27  ;;  %v2216_v9 = vmul.f32 %v2152_v27, %v2152_v27  ;;  %v3346_v4 = vadd.f32 %v2152_v27, %v2150_v31  ;;  %v2089_v26 = vmul.f32 %v2057_v29, %v1417_v17  ;;  %v3350_v23 = vpop.eup %2548  ;;  %vm1386_vm5 = vcmp.ge.f32.partialorder %v3243_v62, 0.0  ;;  %v486_v17 = vld [vmem:[#allocation2 + $0x69] sm:$0xff] }
  0xd4   : > { %v1253_v1 = vadd.f32 %v1221_v22, %v1153_v7  ;;  %v653_v6 = vadd.f32 %v621_v12, %v553_v40  ;;  %v821_v35 = vmul.f32 %v3061_v51, %v3348_v57  ;;  %v1802_v54 = vmul.f32 %v3308_v0, %v1770_v11  ;;  %v3386_v40 = vld [vmem:[#allocation2 + $0x91] sm:$0xff] }
  0xd5   : > { %v3355_v30 = vadd.f32 %v2216_v9, %v2214_v32  ;;  %v2121_v42 = vadd.f32 1.0, %v2089_v26  ;;  %v1611_v31 = vmul.f32 1.0614054, %v3350_v23  ;;  %v1969_v18 = vmul.f32 1.442695, %v1931_v39  ;;  %v3390_v9 = vld [vmem:[#allocation2 + $0x92] sm:$0xff] }
  0xd6   : > { %v3360_v34 = vadd.f32 %v3122_v19, %v1253_v1  ;;  %v753_v61 = vadd.f32 %v721_v45, %v653_v6  ;;  %v921_v41 = vmul.f32 %v3260_v37, %v3066_v55  ;;  %v1834_v38 = vadd.f32 0.2548296, %v1802_v54  ;;  %v3399_v1 = vld [vmem:[#allocation2 + $0x81] sm:$0xff] }
  0xd7   : > { %v2153_v56 = vmul.f32 %v2121_v42, %v3231_v60  ;;  %v1643_v3 = vadd.f32 -1.4531521, %v1611_v31  ;;  %v422_v32 = vmul.f32 %v3192_v16, %v3053_v44  ;;  %v1022_v14 = vmul.f32 %v3068_v58, %v3365_v10 }
  0xd8   : > { %v3370_v2 = vmul.f32 0.70710677, %v3360_v34  ;;  %v853_v39 = vadd.f32 %v821_v35, %v753_v61  ;;  %v522_v43 = vmul.f32 %v3055_v46, %v486_v17  ;;  %v1866_v60 = vmul.f32 %v3308_v0, %v1834_v38 }
  0xd9   : > { %2185 = vst [vmem:[%s3301_s10 + $0x20] sm:$0xff] %v2153_v56  ;;  %v2217_v8 = vmul.f32 %v2153_v56, %v2153_v56  ;;  %v3376_v36 = vadd.f32 %v2245_v53, %v2153_v56  ;;  %v1675_v52 = vmul.f32 %v3350_v23, %v1643_v3  ;;  %v1418_v16 = vsel %vm1386_vm5, 1.0, %v2789_v47 }
  0xda   : > { %v1452_v27 = vand.u32 2147483647, %v3370_v2  ;;  %v953_v29 = vadd.f32 %v921_v41, %v853_v39  ;;  %v554_v5 = vadd.f32 %v522_v43, %v422_v32  ;;  %v2026_v7 = vmul.f32 %v2547_v28, %v1866_v60  ;;  %v3408_v32 = vld [vmem:[#allocation2 + $0x98] sm:$0xff] }
  0xdb   : > { %v3384_v12 = vadd.f32 %v2275_v25, %v2217_v8  ;;  %v1707_v22 = vadd.f32 1.4214138, %v1675_v52  ;;  %2550 = vpow2.f32 %v1969_v18  ;;  %v1122_v0 = vmul.f32 %v3070_v59, %v3386_v40 }
  0xdc   : > { %v1484_v53 = vmul.f32 0.3275911, %v1452_v27  ;;  %v1054_v45 = vadd.f32 %v1022_v14, %v953_v29  ;;  %v622_v62 = vmul.f32 %v3210_v63, %v3057_v48  ;;  %v2058_v26 = vsub.f32 1.0, %v2026_v7 }
  0xdd   : > { %v1739_v11 = vmul.f32 %v3350_v23, %v1707_v22  ;;  %v1222_v25 = vmul.f32 %v3075_v13, %v3390_v9  ;;  %v722_v28 = vmul.f32 %v3322_v50, %v3059_v49  ;;  %v822_v54 = vmul.f32 %v3061_v51, %v3399_v1 }
  0xde   : > { %v1516_v6 = vadd.f32 1.0, %v1484_v53  ;;  %v1154_v35 = vadd.f32 %v1122_v0, %v1054_v45  ;;  %v654_v42 = vadd.f32 %v622_v62, %v554_v5  ;;  %v2090_v31 = vmul.f32 %v2058_v26, %v1418_v16 }
  0xdf   : > { %v1771_v17 = vadd.f32 -0.28449672, %v1739_v11  ;;  %v922_v61 = vmul.f32 %v3337_v21, %v3066_v55  ;;  %v1322_v41 = vmul.f32 0.5, %v3234_v20  ;;  %v1323_v38 = vmul.f32 0.5, %v3282_v24 }
  0xe0   : > { %2552 = vrcp.f32 %v1516_v6  ;;  %v1254_v63 = vadd.f32 %v1222_v25, %v1154_v35  ;;  %v754_v18 = vadd.f32 %v722_v28, %v654_v42  ;;  %v2122_v56 = vadd.f32 1.0, %v2090_v31  ;;  %v3440_v28 = vld [vmem:[#allocation2 + $0x9a] sm:$0xff] }
  0xe1   : > { %v1803_v3 = vmul.f32 %v3350_v23, %v1771_v17  ;;  %v1023_v43 = vmul.f32 %v3068_v58, %v3408_v32  ;;  %v423_v8 = vmul.f32 %v3239_v15, %v3053_v44  ;;  %v523_v24 = vmul.f32 %v3348_v57, %v3055_v46  ;;  %v3431_v57 = vld [vmem:[#allocation2 + $0x99] sm:$0xff] }
  0xe2   : > { %v3411_v39 = vadd.f32 %v3122_v19, %v1254_v63  ;;  %v854_v14 = vadd.f32 %v822_v54, %v754_v18  ;;  %v2154_v60 = vmul.f32 %v2122_v56, %v1322_v41  ;;  %v623_v52 = vmul.f32 %v3260_v37, %v3057_v48  ;;  %v3449_v63 = vld [vmem:[#allocation2 + $0xa8] sm:$0xff] }
  0xe3   : > { %v1835_v20 = vadd.f32 0.2548296, %v1803_v3  ;;  %v1900_v16 = vsub.f32 0.0, %v1452_v27  ;;  %v723_v7 = vmul.f32 %v3365_v10, %v3059_v49  ;;  %v555_v0 = vadd.f32 %v523_v24, %v423_v8 }
  0xe4   : > { %v3422_v29 = vmul.f32 0.70710677, %v3411_v39  ;;  %v954_v5 = vadd.f32 %v922_v61, %v854_v14  ;;  %2186 = vst [vmem:[%s3301_s10 + $0x28] sm:$0xff] %v2154_v60  ;;  %v2218_v53 = vmul.f32 %v2154_v60, %v2154_v60  ;;  %v3428_v15 = vadd.f32 %v3346_v4, %v2154_v60 }
  0xe5   : > { %v2551_v22 = vpop.eup %2550  ;;  %v1867_v45 = vmul.f32 %v3350_v23, %v1835_v20  ;;  %vm1387_vm6 = vcmp.ge.f32.partialorder %v3289_v33, 0.0  ;;  %v1123_v26 = vmul.f32 %v3070_v59, %v3431_v57  ;;  %v655_v4 = vadd.f32 %v623_v52, %v555_v0 }
  0xe6   : > { %v1453_v37 = vand.u32 2147483647, %v3422_v29  ;;  %v1055_v62 = vadd.f32 %v1023_v43, %v954_v5  ;;  %v3438_v11 = vadd.f32 %v3355_v30, %v2218_v53  ;;  %v823_v23 = vmul.f32 %v3386_v40, %v3061_v51  ;;  %v3466_v5 = vld [vmem:[#allocation2 + $0xa9] sm:$0xff] }
  0xe7   : > { %v2027_v25 = vmul.f32 %v2551_v22, %v1867_v45  ;;  %v1932_v6 = vmul.f32 %v1900_v16, %v1452_v27  ;;  %v1223_v33 = vmul.f32 %v3075_v13, %v3440_v28  ;;  %v1419_v54 = vsel %vm1387_vm6, 1.0, %v2789_v47 }
  0xe8   : > { %v1485_v35 = vmul.f32 0.3275911, %v1453_v37  ;;  %v1155_v42 = vadd.f32 %v1123_v26, %v1055_v62  ;;  %v755_v17 = vadd.f32 %v723_v7, %v655_v4  ;;  %v923_v30 = vmul.f32 %v3390_v9, %v3066_v55 }
  0xe9   : > { %v2059_v31 = vsub.f32 1.0, %v2027_v25  ;;  %v3454_v61 = vmul.f32 0.5, %v3360_v34  ;;  %v1024_v56 = vmul.f32 %v3068_v58, %v3449_v63  ;;  %v424_v8 = vmul.f32 %v3322_v50, %v3053_v44 }
  0xea   : > { %v3451_v18 = vpop.eup %2552  ;;  %v1517_v27 = vadd.f32 1.0, %v1485_v35  ;;  %v1255_v41 = vadd.f32 %v1223_v33, %v1155_v42  ;;  %v855_v43 = vadd.f32 %v823_v23, %v755_v17  ;;  %v1971_v60 = vmul.f32 1.442695, %v1932_v6  ;;  %v3486_v35 = vld [vmem:[#allocation2 + $0xaa] sm:$0xff] }
  0xeb   : > { %v2091_v3 = vmul.f32 %v2059_v31, %v1419_v54  ;;  %v1612_v14 = vmul.f32 1.0614054, %v3451_v18  ;;  %v524_v34 = vmul.f32 %v3399_v1, %v3055_v46  ;;  %v624_v7 = vmul.f32 %v3337_v21, %v3057_v48 }
  0xec   : > { %2554 = vrcp.f32 %v1517_v27  ;;  %v3462_v20 = vadd.f32 %v3122_v19, %v1255_v41  ;;  %v955_v16 = vadd.f32 %v923_v30, %v855_v43  ;;  %v1901_v22 = vsub.f32 0.0, %v1453_v37  ;;  %v3496_v41 = vld [vmem:[#allocation2 + $0xb0] sm:$0xff] }
  0xed   : > { %v2123_v24 = vadd.f32 1.0, %v2091_v3  ;;  %v1644_v52 = vadd.f32 -1.4531521, %v1612_v14  ;;  %v1124_v53 = vmul.f32 %v3070_v59, %v3466_v5  ;;  %v556_v45 = vadd.f32 %v524_v34, %v424_v8  ;;  %v3503_v34 = vld [vmem:[#allocation2 + $0xb1] sm:$0xff] }
  0xee   : > { %v3471_v50 = vmul.f32 0.70710677, %v3462_v20  ;;  %v1056_v62 = vadd.f32 %v1024_v56, %v955_v16  ;;  %v724_v26 = vmul.f32 %v3408_v32, %v3059_v49  ;;  %vm1388_vm7 = vcmp.ge.f32.partialorder %v3370_v2, 0.0 }
  0xef   : > { %v2155_v0 = vmul.f32 %v2123_v24, %v1323_v38  ;;  %v1676_v1 = vmul.f32 %v3451_v18, %v1644_v52  ;;  %v656_v21 = vadd.f32 %v624_v7, %v556_v45  ;;  %v824_v4 = vmul.f32 %v3431_v57, %v3061_v51 }
  0xf0   : > { %v1454_v25 = vand.u32 2147483647, %v3471_v50  ;;  %2556 = vpow2.f32 %v1971_v60  ;;  %v1156_v33 = vadd.f32 %v1124_v53, %v1056_v62  ;;  %v1224_v54 = vmul.f32 %v3075_v13, %v3486_v35 }
  0xf1   : > { %2187 = vst [vmem:[%s3301_s10 + $0x30] sm:$0xff] %v2155_v0  ;;  %v2219_v23 = vmul.f32 %v2155_v0, %v2155_v0  ;;  %v3484_v6 = vadd.f32 %v3376_v36, %v2155_v0  ;;  %v1708_v38 = vadd.f32 1.4214138, %v1676_v1  ;;  %v756_v31 = vadd.f32 %v724_v26, %v656_v21  ;;  %v3524_v21 = vld [vmem:[#allocation2 + $0xb2] sm:$0xff] }
  0xf2   : > { %v1486_v42 = vmul.f32 0.3275911, %v1454_v25  ;;  %v1933_v27 = vmul.f32 %v1901_v22, %v1453_v37  ;;  %v924_v36 = vmul.f32 %v3440_v28, %v3066_v55  ;;  %v1256_v3 = vadd.f32 %v1224_v54, %v1156_v33 }
  0xf3   : > { %v3491_v17 = vadd.f32 %v3384_v12, %v2219_v23  ;;  %v1740_v30 = vmul.f32 %v3451_v18, %v1708_v38  ;;  %v856_v14 = vadd.f32 %v824_v4, %v756_v31  ;;  %v1025_v43 = vmul.f32 %v3068_v58, %v3496_v41 }
  0xf4   : > { %v1518_v56 = vadd.f32 1.0, %v1486_v42  ;;  %v1420_v8 = vsel %vm1388_vm7, 1.0, %v2789_v47  ;;  %v1902_v60 = vsub.f32 0.0, %v1454_v25  ;;  %v425_v37 = vmul.f32 %v3365_v10, %v3053_v44 }
  0xf5   : > { %v1772_v12 = vadd.f32 -0.28449672, %v1740_v30  ;;  %v3510_v52 = vadd.f32 %v3122_v19, %v1256_v3  ;;  %v956_v16 = vadd.f32 %v924_v36, %v856_v14  ;;  %v1125_v7 = vmul.f32 %v3070_v59, %v3503_v34 }
  0xf6   : > { %v3507_v24 = vpop.eup %2554  ;;  %2558 = vrcp.f32 %v1518_v56  ;;  %v525_v53 = vmul.f32 %v3386_v40, %v3055_v46  ;;  %v625_v10 = vmul.f32 %v3390_v9, %v3057_v48  ;;  %vm1389_vm8 = vcmp.ge.f32.partialorder %v3422_v29, 0.0 }
  0xf7   : > { %v1804_v2 = vmul.f32 %v3451_v18, %v1772_v12  ;;  %v1613_v22 = vmul.f32 1.0614054, %v3507_v24  ;;  %v1973_v45 = vmul.f32 1.442695, %v1933_v27  ;;  %v3522_v0 = vmul.f32 0.70710677, %v3510_v52 }
  0xf8   : > { %v1057_v1 = vadd.f32 %v1025_v43, %v956_v16  ;;  %v557_v4 = vadd.f32 %v525_v53, %v425_v37  ;;  %v725_v23 = vmul.f32 %v3449_v63, %v3059_v49  ;;  %v1934_v38 = vmul.f32 %v1902_v60, %v1454_v25 }
  0xf9   : > { %v1836_v62 = vadd.f32 0.2548296, %v1804_v2  ;;  %v1645_v26 = vadd.f32 -1.4531521, %v1613_v22  ;;  %v1455_v40 = vand.u32 2147483647, %v3522_v0  ;;  %v1225_v9 = vmul.f32 %v3075_v13, %v3524_v21 }
  0xfa   : > { %v1157_v42 = vadd.f32 %v1125_v7, %v1057_v1  ;;  %v2557_v33 = vpop.eup %2556  ;;  %v657_v30 = vadd.f32 %v625_v10, %v557_v4  ;;  %v825_v27 = vmul.f32 %v3466_v5, %v3061_v51  ;;  %v3536_v36 = vmul.f32 0.5, %v3411_v39  ;;  %v3552_v2 = vld [vmem:[#allocation2 + $0xc0] sm:$0xff] }
  0xfb   : > { %v1868_v54 = vmul.f32 %v3451_v18, %v1836_v62  ;;  %v1677_v31 = vmul.f32 %v3507_v24, %v1645_v26  ;;  %v3541_v25 = vsel %vm1389_vm8, 1.0, %v2789_v47  ;;  %v1487_v56 = vmul.f32 0.3275911, %v1455_v40  ;;  %v3563_v62 = vld [vmem:[#allocation2 + $0xc1] sm:$0xff] }
  0xfc   : > { %v1257_v3 = vadd.f32 %v1225_v9, %v1157_v42  ;;  %v757_v43 = vadd.f32 %v725_v23, %v657_v30  ;;  %v925_v18 = vmul.f32 %v3486_v35, %v3066_v55  ;;  %2560 = vpow2.f32 %v1973_v45  ;;  %v3573_v30 = vld [vmem:[#allocation5 + $0x8] ss:$0 sm:$0xff] }
  0xfd   : > { %v2028_v13 = vmul.f32 %v2557_v33, %v1868_v54  ;;  %v1709_v14 = vadd.f32 1.4214138, %v1677_v31  ;;  %v3546_v12 = vmul.f32 0.5, %v3462_v20  ;;  %v1519_v60 = vadd.f32 1.0, %v1487_v56 }
  0xfe   : > { %v3549_v39 = vadd.f32 %v3122_v19, %v1257_v3  ;;  %v1975_v16 = vmul.f32 1.442695, %v1934_v38  ;;  %v857_v7 = vadd.f32 %v825_v27, %v757_v43  ;;  %vm1390_vm9 = vcmp.ge.f32.partialorder %v3471_v50, 0.0 }
  0xff   : > { %v2060_v37 = vsub.f32 1.0, %v2028_v13  ;;  %v1741_v29 = vmul.f32 %v3507_v24, %v1709_v14  ;;  %2562 = vrcp.f32 %v1519_v60  ;;  %v1026_v20 = vmul.f32 %v3068_v58, %v3552_v2 }
 0x100   : > { %v3554_v22 = vpop.eup %2558  ;;  %v3558_v53 = vmul.f32 0.70710677, %v3549_v39  ;;  %v957_v1 = vadd.f32 %v925_v18, %v857_v7  ;;  %v1903_v26 = vsub.f32 0.0, %v1455_v40  ;;  %v1126_v23 = vmul.f32 %v3070_v59, %v3563_v62 }
 0x101   : > { %v2092_v19 = vmul.f32 %v2060_v37, %v1420_v8  ;;  %v1773_v10 = vadd.f32 -0.28449672, %v1741_v29  ;;  %v1614_v45 = vmul.f32 1.0614054, %v3554_v22  ;;  %v426_v38 = vmul.f32 %v3408_v32, %v3053_v44  ;;  %v3571_v8 = vld [vmem:[#allocation2 + $0xc2] sm:$0xff] }
 0x102   : > { %v1456_v4 = vand.u32 2147483647, %v3558_v53  ;;  %2564 = vpow2.f32 %v1975_v16  ;;  %v1058_v31 = vadd.f32 %v1026_v20, %v957_v1  ;;  %v1226_v27 = vmul.f32 %v3573_v30, %v3571_v8 }
 0x103   : > { %v2124_v42 = vadd.f32 1.0, %v2092_v19  ;;  %v1805_v9 = vmul.f32 %v3507_v24, %v1773_v10  ;;  %v1646_v33 = vadd.f32 -1.4531521, %v1614_v45  ;;  %v526_v56 = vmul.f32 %v3431_v57, %v3055_v46 }
 0x104   : > { %v1488_v54 = vmul.f32 0.3275911, %v1456_v4  ;;  %v626_v14 = vmul.f32 %v3440_v28, %v3057_v48  ;;  %v1935_v43 = vmul.f32 %v1903_v26, %v1455_v40  ;;  %v1158_v60 = vadd.f32 %v1126_v23, %v1058_v31  ;;  %v3601_v23 = vld [vmem:[#allocation7] ss:$0 sm:$0xff] }
 0x105   : > { %v2156_v32 = vmul.f32 %v2124_v42, %v3454_v61  ;;  %v1837_v3 = vadd.f32 0.2548296, %v1805_v9  ;;  %v1678_v13 = vmul.f32 %v3554_v22, %v1646_v33  ;;  %v558_v37 = vadd.f32 %v526_v56, %v426_v38 }
 0x106   : > { %v1520_v18 = vadd.f32 1.0, %v1488_v54  ;;  %v2561_v20 = vpop.eup %2560  ;;  %v3591_v61 = vsel %vm1390_vm9, 1.0, %v2789_v47  ;;  %v1258_v28 = vadd.f32 %v1226_v27, %v1158_v60  ;;  %v1977_v1 = vmul.f32 1.442695, %v1935_v43  ;;  %v3620_v43 = vld [vmem:[#allocation2 + $0xc8] sm:$0xff] }
 0x107   : > { %2188 = vst [vmem:[%s3301_s10 + $0x38] sm:$0xff] %v2156_v32  ;;  %v2220_v29 = vmul.f32 %v2156_v32, %v2156_v32  ;;  %v3585_v16 = vadd.f32 %v3428_v15, %v2156_v32  ;;  %v1869_v7 = vmul.f32 %v3507_v24, %v1837_v3  ;;  %v1710_v57 = vadd.f32 1.4214138, %v1678_v13 }
 0x108   : > { %2566 = vrcp.f32 %v1520_v18  ;;  %v658_v40 = vadd.f32 %v626_v14, %v558_v37  ;;  %v726_v15 = vmul.f32 %v3496_v41, %v3059_v49  ;;  %v1904_v26 = vsub.f32 0.0, %v1456_v4 }
 0x109   : > { %v3594_v19 = vadd.f32 %v3438_v11, %v2220_v29  ;;  %v2029_v10 = vmul.f32 %v2561_v20, %v1869_v7  ;;  %v1742_v45 = vmul.f32 %v3554_v22, %v1710_v57  ;;  %v3599_v24 = vpop.eup %2562  ;;  %v3604_v50 = vadd.f32 %v3601_v23, %v1258_v28  ;;  %v3630_v57 = vld [vmem:[#allocation2 + $0xc9] sm:$0xff] }
 0x10a   : > { %v826_v38 = vmul.f32 %v3503_v34, %v3061_v51  ;;  %v1615_v9 = vmul.f32 1.0614054, %v3599_v24  ;;  %v758_v33 = vadd.f32 %v726_v15, %v658_v40  ;;  %v3610_v54 = vmul.f32 0.5, %v3510_v52 }
 0x10b   : > { %v2061_v11 = vsub.f32 1.0, %v2029_v10  ;;  %v1774_v42 = vadd.f32 -0.28449672, %v1742_v45  ;;  %vm1391_vm10 = vcmp.ge.f32.partialorder %v3522_v0, 0.0  ;;  %v3614_v31 = vmul.f32 0.70710677, %v3604_v50 }
 0x10c   : > { %v926_v27 = vmul.f32 %v3524_v21, %v3066_v55  ;;  %v2565_v56 = vpop.eup %2564  ;;  %v1647_v13 = vadd.f32 -1.4531521, %v1615_v9  ;;  %v858_v14 = vadd.f32 %v826_v38, %v758_v33  ;;  %2568 = vpow2.f32 %v1977_v1  ;;  %v3639_v1 = vld [vmem:[#allocation2 + $0xca] sm:$0xff] }
 0x10d   : > { %v2093_v32 = vmul.f32 %v2061_v11, %v3541_v25  ;;  %v1806_v3 = vmul.f32 %v3554_v22, %v1774_v42  ;;  %v3623_v52 = vand.u32 2147483647, %v3614_v31  ;;  %v1027_v18 = vmul.f32 %v3068_v58, %v3620_v43 }
 0x10e   : > { %v427_v60 = vmul.f32 %v3449_v63, %v3053_v44  ;;  %v1679_v25 = vmul.f32 %v3599_v24, %v1647_v13  ;;  %v1936_v7 = vmul.f32 %v1904_v26, %v1456_v4  ;;  %v958_v28 = vadd.f32 %v926_v27, %v858_v14 }
 0x10f   : > { %v2125_v37 = vadd.f32 1.0, %v2093_v32  ;;  %v1838_v29 = vadd.f32 0.2548296, %v1806_v3  ;;  %v1489_v20 = vmul.f32 0.3275911, %v3623_v52  ;;  %v1127_v40 = vmul.f32 %v3070_v59, %v3630_v57 }
 0x110   : > { %v527_v10 = vmul.f32 %v3466_v5, %v3055_v46  ;;  %v1711_v15 = vadd.f32 1.4214138, %v1679_v25  ;;  %v627_v4 = vmul.f32 %v3486_v35, %v3057_v48  ;;  %v1059_v11 = vadd.f32 %v1027_v18, %v958_v28 }
 0x111   : > { %v2157_v45 = vmul.f32 %v2125_v37, %v3536_v36  ;;  %v1870_v63 = vmul.f32 %v3554_v22, %v1838_v29  ;;  %v1521_v38 = vadd.f32 1.0, %v1489_v20  ;;  %v1227_v42 = vmul.f32 %v3573_v30, %v3639_v1 }
 0x112   : > { %v3643_v26 = vpop.eup %2566  ;;  %v559_v9 = vadd.f32 %v527_v10, %v427_v60  ;;  %v1743_v33 = vmul.f32 %v3599_v24, %v1711_v15  ;;  %v1979_v32 = vmul.f32 1.442695, %v1936_v7  ;;  %v1159_v35 = vadd.f32 %v1127_v40, %v1059_v11 }
 0x113   : > { %2189 = vst [vmem:[%s3301_s10 + $0x40] sm:$0xff] %v2157_v45  ;;  %v2221_v5 = vmul.f32 %v2157_v45, %v2157_v45  ;;  %v3649_v36 = vadd.f32 %v3484_v6, %v2157_v45  ;;  %v2030_v22 = vmul.f32 %v2565_v56, %v1870_v63  ;;  %v1616_v27 = vmul.f32 1.0614054, %v3643_v26  ;;  %v3675_v63 = vld [vmem:[#allocation2 + $0xd8] sm:$0xff] }
 0x114   : > { %2570 = vrcp.f32 %v1521_v38  ;;  %v1775_v14 = vadd.f32 -0.28449672, %v1743_v33  ;;  %v659_v18 = vadd.f32 %v627_v4, %v559_v9  ;;  %v1423_v60 = vsel %vm1391_vm10, 1.0, %v2789_v47 }
 0x115   : > { %v3654_v3 = vadd.f32 %v3491_v17, %v2221_v5  ;;  %v2062_v13 = vsub.f32 1.0, %v2030_v22  ;;  %v1648_v6 = vadd.f32 -1.4531521, %v1616_v27  ;;  %v1259_v37 = vadd.f32 %v1227_v42, %v1159_v35  ;;  %v3684_v5 = vld [vmem:[#allocation2 + $0xd9] sm:$0xff] }
 0x116   : > { %v727_v56 = vmul.f32 %v3552_v2, %v3059_v49  ;;  %v1807_v25 = vmul.f32 %v3599_v24, %v1775_v14  ;;  %v3664_v7 = vmul.f32 0.5, %v3549_v39  ;;  %v827_v17 = vmul.f32 %v3563_v62, %v3061_v51  ;;  %v2569_v20 = vpop.eup %2568 }
 0x117   : > { %v2094_v29 = vmul.f32 %v2062_v13, %v3591_v61  ;;  %v1680_v28 = vmul.f32 %v3643_v26, %v1648_v6  ;;  %v3670_v0 = vadd.f32 %v3601_v23, %v1259_v37  ;;  %v927_v10 = vmul.f32 %v3571_v8, %v3066_v55 }
 0x118   : > { %v759_v40 = vadd.f32 %v727_v56, %v659_v18  ;;  %v1839_v61 = vadd.f32 0.2548296, %v1807_v25  ;;  %2572 = vpow2.f32 %v1979_v32  ;;  %v1905_v39 = vsub.f32 0.0, %v3623_v52 }
 0x119   : > { %v2126_v45 = vadd.f32 1.0, %v2094_v29  ;;  %v1712_v15 = vadd.f32 1.4214138, %v1680_v28  ;;  %v3678_v4 = vmul.f32 0.70710677, %v3670_v0  ;;  %v1028_v11 = vmul.f32 %v3068_v58, %v3675_v63 }
 0x11a   : > { %v859_v38 = vadd.f32 %v827_v17, %v759_v40  ;;  %v1871_v9 = vmul.f32 %v3599_v24, %v1839_v61  ;;  %v428_v22 = vmul.f32 %v3496_v41, %v3053_v44  ;;  %v528_v33 = vmul.f32 %v3503_v34, %v3055_v46  ;;  %v3699_v41 = vld [vmem:[#allocation2 + $0xda] sm:$0xff] }
 0x11b   : > { %v2158_v42 = vmul.f32 %v2126_v45, %v3546_v12  ;;  %v1744_v27 = vmul.f32 %v3643_v26, %v1712_v15  ;;  %v1458_v32 = vand.u32 2147483647, %v3678_v4  ;;  %v1128_v13 = vmul.f32 %v3070_v59, %v3684_v5 }
 0x11c   : > { %v959_v35 = vadd.f32 %v927_v10, %v859_v38  ;;  %v2031_v14 = vmul.f32 %v2569_v20, %v1871_v9  ;;  %v1937_v18 = vmul.f32 %v1905_v39, %v3623_v52  ;;  %v1228_v29 = vmul.f32 %v3573_v30, %v3699_v41 }
 0x11d   : > { %2190 = vst [vmem:[%s3301_s10 + $0x48] sm:$0xff] %v2158_v42  ;;  %v2222_v12 = vmul.f32 %v2158_v42, %v2158_v42  ;;  %v3696_v24 = vadd.f32 %v3585_v16, %v2158_v42  ;;  %v1776_v34 = vadd.f32 -0.28449672, %v1744_v27  ;;  %v1490_v37 = vmul.f32 0.3275911, %v1458_v32 }
 0x11e   : > { %v3701_v6 = vpop.eup %2570  ;;  %v1060_v56 = vadd.f32 %v1028_v11, %v959_v35  ;;  %v2063_v17 = vsub.f32 1.0, %v2031_v14  ;;  %v560_v28 = vadd.f32 %v528_v33, %v428_v22  ;;  %vm1392_vm11 = vcmp.ge.f32.partialorder %v3558_v53, 0.0 }
 0x11f   : > { %v3706_v25 = vadd.f32 %v3594_v19, %v2222_v12  ;;  %v1617_v16 = vmul.f32 1.0614054, %v3701_v6  ;;  %v1808_v52 = vmul.f32 %v3643_v26, %v1776_v34  ;;  %v1522_v20 = vadd.f32 1.0, %v1490_v37  ;;  %v3728_v34 = vld [vmem:[#allocation2 + $0xe0] sm:$0xff] }
 0x120   : > { %v1160_v40 = vadd.f32 %v1128_v13, %v1060_v56  ;;  %v2095_v10 = vmul.f32 %v2063_v17, %v1423_v60  ;;  %v628_v61 = vmul.f32 %v3524_v21, %v3057_v48  ;;  %v728_v39 = vmul.f32 %v3620_v43, %v3059_v49 }
 0x121   : > { %v1649_v45 = vadd.f32 -1.4531521, %v1617_v16  ;;  %v1840_v19 = vadd.f32 0.2548296, %v1808_v52  ;;  %v1981_v15 = vmul.f32 1.442695, %v1937_v18  ;;  %2574 = vrcp.f32 %v1522_v20 }
 0x122   : > { %v1260_v38 = vadd.f32 %v1228_v29, %v1160_v40  ;;  %v2573_v11 = vpop.eup %2572  ;;  %v2127_v42 = vadd.f32 1.0, %v2095_v10  ;;  %v660_v22 = vadd.f32 %v628_v61, %v560_v28  ;;  %v828_v60 = vmul.f32 %v3630_v57, %v3061_v51  ;;  %v3744_v40 = vld [vmem:[#allocation2 + $0xe1] sm:$0xff] }
 0x123   : > { %v1681_v9 = vmul.f32 %v3701_v6, %v1649_v45  ;;  %v1424_v21 = vsel %vm1392_vm11, 1.0, %v2789_v47  ;;  %v1872_v33 = vmul.f32 %v3643_v26, %v1840_v19  ;;  %v1906_v27 = vsub.f32 0.0, %v1458_v32 }
 0x124   : > { %v3723_v35 = vadd.f32 %v3601_v23, %v1260_v38  ;;  %v2159_v13 = vmul.f32 %v2127_v42, %v3610_v54  ;;  %v760_v14 = vadd.f32 %v728_v39, %v660_v22  ;;  %v928_v18 = vmul.f32 %v3639_v1, %v3066_v55  ;;  %v3751_v39 = vld [vmem:[#allocation2 + $0xe2] sm:$0xff] }
 0x125   : > { %v1713_v12 = vadd.f32 1.4214138, %v1681_v9  ;;  %v2032_v37 = vmul.f32 %v2573_v11, %v1872_v33  ;;  %2576 = vpow2.f32 %v1981_v15  ;;  %v1029_v26 = vmul.f32 %v3068_v58, %v3728_v34 }
 0x126   : > { %v3731_v53 = vmul.f32 0.70710677, %v3723_v35  ;;  %2191 = vst [vmem:[%s3301_s10 + $0x50] sm:$0xff] %v2159_v13  ;;  %v2223_v56 = vmul.f32 %v2159_v13, %v2159_v13  ;;  %v3737_v29 = vadd.f32 %v3649_v36, %v2159_v13  ;;  %v860_v17 = vadd.f32 %v828_v60, %v760_v14 }
 0x127   : > { %v1745_v54 = vmul.f32 %v3701_v6, %v1713_v12  ;;  %v2064_v16 = vsub.f32 1.0, %v2032_v37  ;;  %v3741_v28 = vmul.f32 0.5, %v3604_v50  ;;  %v1938_v52 = vmul.f32 %v1906_v27, %v1458_v32 }
 0x128   : > { %v1459_v20 = vand.u32 2147483647, %v3731_v53  ;;  %v3747_v10 = vadd.f32 %v3654_v3, %v2223_v56  ;;  %v960_v61 = vadd.f32 %v928_v18, %v860_v17  ;;  %v1129_v36 = vmul.f32 %v3070_v59, %v3744_v40 }
 0x129   : > { %v1777_v45 = vadd.f32 -0.28449672, %v1745_v54  ;;  %v2096_v19 = vmul.f32 %v2064_v16, %v1424_v21  ;;  %v1229_v50 = vmul.f32 %v3573_v30, %v3751_v39  ;;  %v429_v32 = vmul.f32 %v3552_v2, %v3053_v44 }
 0x12a   : > { %v1491_v15 = vmul.f32 0.3275911, %v1459_v20  ;;  %v1061_v11 = vadd.f32 %v1029_v26, %v960_v61  ;;  %v529_v3 = vmul.f32 %v3563_v62, %v3055_v46  ;;  %v629_v42 = vmul.f32 %v3571_v8, %v3057_v48 }
 0x12b   : > { %v1809_v38 = vmul.f32 %v3701_v6, %v1777_v45  ;;  %v3762_v9 = vpop.eup %2574  ;;  %v2128_v22 = vadd.f32 1.0, %v2096_v19  ;;  %v1907_v21 = vsub.f32 0.0, %v1459_v20  ;;  %v729_v33 = vmul.f32 %v3675_v63, %v3059_v49 }
 0x12c   : > { %v1523_v60 = vadd.f32 1.0, %v1491_v15  ;;  %v1618_v2 = vmul.f32 1.0614054, %v3762_v9  ;;  %v1161_v13 = vadd.f32 %v1129_v36, %v1061_v11  ;;  %v561_v12 = vadd.f32 %v529_v3, %v429_v32 }
 0x12d   : > { %v1841_v27 = vadd.f32 0.2548296, %v1809_v38  ;;  %v2160_v14 = vmul.f32 %v2128_v22, %v3664_v7  ;;  %vm1393_vm12 = vcmp.ge.f32.partialorder %v3614_v31, 0.0  ;;  %v1983_v62 = vmul.f32 1.442695, %v1938_v52 }
 0x12e   : > { %2578 = vrcp.f32 %v1523_v60  ;;  %v1650_v18 = vadd.f32 -1.4531521, %v1618_v2  ;;  %v1261_v37 = vadd.f32 %v1229_v50, %v1161_v13  ;;  %v661_v26 = vadd.f32 %v629_v42, %v561_v12  ;;  %v3807_v13 = vld [vmem:[#allocation2 + $0xf2] sm:$0xff] }
 0x12f   : > { %v1873_v8 = vmul.f32 %v3701_v6, %v1841_v27  ;;  %v2577_v56 = vpop.eup %2576  ;;  %2192 = vst [vmem:[%s3301_s10 + $0x58] sm:$0xff] %v2160_v14  ;;  %v2224_v54 = vmul.f32 %v2160_v14, %v2160_v14  ;;  %v3772_v17 = vadd.f32 %v3696_v24, %v2160_v14  ;;  %v1939_v16 = vmul.f32 %v1907_v21, %v1459_v20  ;;  %v3788_v20 = vld [vmem:[#allocation2 + $0xf0] sm:$0xff] }
 0x130   : > { %v829_v45 = vmul.f32 %v3684_v5, %v3061_v51  ;;  %v1682_v61 = vmul.f32 %v3762_v9, %v1650_v18  ;;  %v3778_v52 = vadd.f32 %v3601_v23, %v1261_v37  ;;  %v761_v6 = vadd.f32 %v729_v33, %v661_v26  ;;  %v3803_v33 = vld [vmem:[#allocation2 + $0xf1] sm:$0xff] }
 0x131   : > { %v2033_v7 = vmul.f32 %v2577_v56, %v1873_v8  ;;  %v3781_v36 = vadd.f32 %v3706_v25, %v2224_v54  ;;  %v1425_v19 = vsel %vm1393_vm12, 1.0, %v2789_v47  ;;  %2580 = vpow2.f32 %v1983_v62 }
 0x132   : > { %v929_v24 = vmul.f32 %v3699_v41, %v3066_v55  ;;  %v1714_v50 = vadd.f32 1.4214138, %v1682_v61  ;;  %v3791_v32 = vmul.f32 0.70710677, %v3778_v52  ;;  %v1030_v38 = vmul.f32 %v3068_v58, %v3788_v20 }
 0x133   : > { %v2065_v15 = vsub.f32 1.0, %v2033_v7  ;;  %v861_v25 = vadd.f32 %v829_v45, %v761_v6  ;;  %v430_v11 = vmul.f32 %v3620_v43, %v3053_v44  ;;  %v530_v31 = vmul.f32 %v3630_v57, %v3055_v46 }
 0x134   : > { %v630_v3 = vmul.f32 %v3639_v1, %v3057_v48  ;;  %v1746_v22 = vmul.f32 %v3762_v9, %v1714_v50  ;;  %v1985_v60 = vmul.f32 1.442695, %v1939_v16  ;;  %v1460_v21 = vand.u32 2147483647, %v3791_v32 }
 0x135   : > { %v2097_v42 = vmul.f32 %v2065_v15, %v1425_v19  ;;  %v961_v27 = vadd.f32 %v929_v24, %v861_v25  ;;  %v1130_v2 = vmul.f32 %v3070_v59, %v3803_v33  ;;  %v562_v43 = vadd.f32 %v530_v31, %v430_v11 }
 0x136   : > { %v730_v57 = vmul.f32 %v3728_v34, %v3059_v49  ;;  %vm1394_vm13 = vcmp.ge.f32.partialorder %v3678_v4, 0.0  ;;  %v1778_v1 = vadd.f32 -0.28449672, %v1746_v22  ;;  %v1492_v14 = vmul.f32 0.3275911, %v1460_v21 }
 0x137   : > { %v2129_v12 = vadd.f32 1.0, %v2097_v42  ;;  %v1062_v8 = vadd.f32 %v1030_v38, %v961_v27  ;;  %v1230_v18 = vmul.f32 %v3573_v30, %v3807_v13  ;;  %v662_v37 = vadd.f32 %v630_v3, %v562_v43 }
 0x138   : > { %v3812_v62 = vpop.eup %2578  ;;  %v830_v26 = vmul.f32 %v3744_v40, %v3061_v51  ;;  %v1810_v54 = vmul.f32 %v3762_v9, %v1778_v1  ;;  %v1524_v4 = vadd.f32 1.0, %v1492_v14  ;;  %v1426_v45 = vsel %vm1394_vm13, 1.0, %v2789_v47  ;;  %v3844_v14 = vld [vmem:[#allocation2 + $0xfa] sm:$0xff] }
 0x139   : > { %v2161_v56 = vmul.f32 %v2129_v12, %v3741_v28  ;;  %v1619_v16 = vmul.f32 1.0614054, %v3812_v62  ;;  %v1162_v7 = vadd.f32 %v1130_v2, %v1062_v8  ;;  %v762_v61 = vadd.f32 %v730_v57, %v662_v37  ;;  %v3828_v28 = vld [vmem:[#allocation2 + $0xf8] sm:$0xff] }
 0x13a   : > { %v930_v6 = vmul.f32 %v3751_v39, %v3066_v55  ;;  %v1842_v15 = vadd.f32 0.2548296, %v1810_v54  ;;  %2582 = vrcp.f32 %v1524_v4  ;;  %v1031_v31 = vmul.f32 %v3068_v58, %v3828_v28 }
 0x13b   : > { %2193 = vst [vmem:[%s3301_s10 + $0x60] sm:$0xff] %v2161_v56  ;;  %v2225_v19 = vmul.f32 %v2161_v56, %v2161_v56  ;;  %v3826_v24 = vadd.f32 %v3737_v29, %v2161_v56  ;;  %v1651_v50 = vadd.f32 -1.4531521, %v1619_v16  ;;  %v2581_v38 = vpop.eup %2580  ;;  %v1262_v25 = vadd.f32 %v1230_v18, %v1162_v7  ;;  %v3837_v29 = vld [vmem:[#allocation2 + $0xf9] sm:$0xff] }
 0x13c   : > { %v862_v11 = vadd.f32 %v830_v26, %v762_v61  ;;  %v1874_v42 = vmul.f32 %v3762_v9, %v1842_v15  ;;  %2584 = vpow2.f32 %v1985_v60  ;;  %v1908_v27 = vsub.f32 0.0, %v1460_v21 }
 0x13d   : > { %v3833_v3 = vadd.f32 %v3747_v10, %v2225_v19  ;;  %v1683_v22 = vmul.f32 %v3812_v62, %v1651_v50  ;;  %v3840_v2 = vadd.f32 %v3601_v23, %v1262_v25  ;;  %v1131_v57 = vmul.f32 %v3070_v59, %v3837_v29 }
 0x13e   : > { %v962_v43 = vadd.f32 %v930_v6, %v862_v11  ;;  %v2034_v12 = vmul.f32 %v2581_v38, %v1874_v42  ;;  %v431_v10 = vmul.f32 %v3675_v63, %v3053_v44  ;;  %v531_v9 = vmul.f32 %v3684_v5, %v3055_v46 }
 0x13f   : > { %v1715_v1 = vadd.f32 1.4214138, %v1683_v22  ;;  %v3851_v60 = vmul.f32 0.70710677, %v3840_v2  ;;  %v1231_v18 = vmul.f32 %v3573_v30, %v3844_v14  ;;  %v631_v37 = vmul.f32 %v3699_v41, %v3057_v48 }
 0x140   : > { %v1063_v8 = vadd.f32 %v1031_v31, %v962_v43  ;;  %v2066_v26 = vsub.f32 1.0, %v2034_v12  ;;  %v563_v54 = vadd.f32 %v531_v9, %v431_v10  ;;  %v731_v63 = vmul.f32 %v3788_v20, %v3059_v49 }
 0x141   : > { %v1747_v56 = vmul.f32 %v3812_v62, %v1715_v1  ;;  %vm1395_vm14 = vcmp.ge.f32.partialorder %v3731_v53, 0.0  ;;  %v1940_v5 = vmul.f32 %v1908_v27, %v1460_v21  ;;  %v1461_v16 = vand.u32 2147483647, %v3851_v60  ;;  %v3875_v1 = vld [vmem:[#allocation2 + $0x108] sm:$0xff] }
 0x142   : > { %v1163_v4 = vadd.f32 %v1131_v57, %v1063_v8  ;;  %v2098_v7 = vmul.f32 %v2066_v26, %v1426_v45  ;;  %v663_v6 = vadd.f32 %v631_v37, %v563_v54  ;;  %v831_v19 = vmul.f32 %v3803_v33, %v3061_v51  ;;  %v3887_v54 = vld [vmem:[#allocation2 + $0x109] sm:$0xff] }
 0x143   : > { %v1779_v61 = vadd.f32 -0.28449672, %v1747_v56  ;;  %v1330_v41 = vmul.f32 0.5, %v3670_v0  ;;  %v1493_v15 = vmul.f32 0.3275911, %v1461_v16  ;;  %v1427_v25 = vsel %vm1395_vm14, 1.0, %v2789_v47 }
 0x144   : > { %v1263_v50 = vadd.f32 %v1231_v18, %v1163_v4  ;;  %v2130_v38 = vadd.f32 1.0, %v2098_v7  ;;  %v763_v53 = vadd.f32 %v731_v63, %v663_v6  ;;  %v3867_v21 = vpop.eup %2582  ;;  %v1987_v31 = vmul.f32 1.442695, %v1940_v5  ;;  %v3897_v6 = vld [vmem:[#allocation2 + $0x10a] sm:$0xff] }
 0x145   : > { %v1811_v11 = vmul.f32 %v3812_v62, %v1779_v61  ;;  %v1525_v45 = vadd.f32 1.0, %v1493_v15  ;;  %v931_v22 = vmul.f32 %v3807_v13, %v3066_v55  ;;  %v1620_v57 = vmul.f32 1.0614054, %v3867_v21 }
 0x146   : > { %v3870_v42 = vadd.f32 %v3601_v23, %v1263_v50  ;;  %v2585_v0 = vpop.eup %2584  ;;  %v2162_v27 = vmul.f32 %v2130_v38, %v1330_v41  ;;  %v863_v12 = vadd.f32 %v831_v19, %v763_v53  ;;  %v1909_v10 = vsub.f32 0.0, %v1461_v16 }
 0x147   : > { %v1843_v43 = vadd.f32 0.2548296, %v1811_v11  ;;  %2586 = vrcp.f32 %v1525_v45  ;;  %v1032_v8 = vmul.f32 %v3068_v58, %v3875_v1  ;;  %v1652_v56 = vadd.f32 -1.4531521, %v1620_v57 }
 0x148   : > { %v3878_v9 = vmul.f32 0.70710677, %v3870_v42  ;;  %2194 = vst [vmem:[%s3301_s10 + $0x68] sm:$0xff] %v2162_v27  ;;  %v2226_v18 = vmul.f32 %v2162_v27, %v2162_v27  ;;  %v3884_v37 = vadd.f32 %v3772_v17, %v2162_v27  ;;  %vm1396_vm15 = vcmp.ge.f32.partialorder %v3791_v32, 0.0 }
 0x149   : > { %v1875_v26 = vmul.f32 %v3812_v62, %v1843_v43  ;;  %v963_v5 = vadd.f32 %v931_v22, %v863_v12  ;;  %v1132_v4 = vmul.f32 %v3070_v59, %v3887_v54  ;;  %v1684_v17 = vmul.f32 %v3867_v21, %v1652_v56 }
 0x14a   : > { %v1462_v63 = vand.u32 2147483647, %v3878_v9  ;;  %v3894_v7 = vadd.f32 %v3781_v36, %v2226_v18  ;;  %2588 = vpow2.f32 %v1987_v31  ;;  %v1941_v62 = vmul.f32 %v1909_v10, %v1461_v16 }
 0x14b   : > { %v2035_v61 = vmul.f32 %v2585_v0, %v1875_v26  ;;  %v1064_v41 = vadd.f32 %v1032_v8, %v963_v5  ;;  %v1232_v15 = vmul.f32 %v3573_v30, %v3897_v6  ;;  %v1716_v38 = vadd.f32 1.4214138, %v1684_v17 }
 0x14c   : > { %v1494_v19 = vmul.f32 0.3275911, %v1462_v63  ;;  %v432_v11 = vmul.f32 %v3728_v34, %v3053_v44  ;;  %v532_v36 = vmul.f32 %v3744_v40, %v3055_v46  ;;  %v1910_v45 = vsub.f32 0.0, %v1462_v63 }
 0x14d   : > { %v2067_v50 = vsub.f32 1.0, %v2035_v61  ;;  %v1164_v22 = vadd.f32 %v1132_v4, %v1064_v41  ;;  %v632_v31 = vmul.f32 %v3751_v39, %v3057_v48  ;;  %v1748_v0 = vmul.f32 %v3867_v21, %v1716_v38  ;;  %v3938_v38 = vld [vmem:[#allocation2 + $0x110] sm:$0xff] }
 0x14e   : > { %v1526_v53 = vadd.f32 1.0, %v1494_v19  ;;  %v564_v27 = vadd.f32 %v532_v36, %v432_v11  ;;  %v732_v43 = vmul.f32 %v3828_v28, %v3059_v49  ;;  %v1331_v57 = vmul.f32 0.5, %v3723_v35 }
 0x14f   : > { %v2099_v16 = vmul.f32 %v2067_v50, %v1427_v25  ;;  %v1989_v12 = vmul.f32 1.442695, %v1941_v62  ;;  %v1264_v34 = vadd.f32 %v1232_v15, %v1164_v22  ;;  %v3912_v40 = vmul.f32 0.5, %v3778_v52 }
 0x150   : > { %2590 = vrcp.f32 %v1526_v53  ;;  %v1780_v8 = vadd.f32 -0.28449672, %v1748_v0  ;;  %v664_v18 = vadd.f32 %v632_v31, %v564_v27  ;;  %v1428_v25 = vsel %vm1396_vm15, 1.0, %v2789_v47 }
 0x151   : > { %v2131_v10 = vadd.f32 1.0, %v2099_v16  ;;  %v3914_v39 = vpop.eup %2586  ;;  %v1942_v26 = vmul.f32 %v1910_v45, %v1462_v63  ;;  %v3920_v56 = vadd.f32 %v3601_v23, %v1264_v34  ;;  %v832_v35 = vmul.f32 %v3837_v29, %v3061_v51  ;;  %v3952_v16 = vld [vmem:[#allocation2 + $0x111] sm:$0xff] }
 0x152   : > { %v1812_v52 = vmul.f32 %v3867_v21, %v1780_v8  ;;  %vm1397_vm0 = vcmp.ge.f32.partialorder %v3851_v60, 0.0  ;;  %v1621_v4 = vmul.f32 1.0614054, %v3914_v39  ;;  %v764_v61 = vadd.f32 %v732_v43, %v664_v18 }
 0x153   : > { %v2163_v5 = vmul.f32 %v2131_v10, %v1331_v57  ;;  %2592 = vpow2.f32 %v1989_v12  ;;  %v3928_v17 = vmul.f32 0.70710677, %v3920_v56  ;;  %v932_v32 = vmul.f32 %v3844_v14, %v3066_v55 }
 0x154   : > { %v433_v63 = vmul.f32 %v3788_v20, %v3053_v44  ;;  %v2589_v62 = vpop.eup %2588  ;;  %v1844_v15 = vadd.f32 0.2548296, %v1812_v52  ;;  %v1653_v50 = vadd.f32 -1.4531521, %v1621_v4  ;;  %v864_v36 = vadd.f32 %v832_v35, %v764_v61 }
 0x155   : > { %2195 = vst [vmem:[%s3301_s10 + $0x70] sm:$0xff] %v2163_v5  ;;  %v2227_v19 = vmul.f32 %v2163_v5, %v2163_v5  ;;  %v3936_v41 = vadd.f32 %v3826_v24, %v2163_v5  ;;  %v3941_v11 = vand.u32 2147483647, %v3928_v17  ;;  %v1033_v53 = vmul.f32 %v3068_v58, %v3938_v38 }
 0x156   : > { %v533_v20 = vmul.f32 %v3803_v33, %v3055_v46  ;;  %v1876_v24 = vmul.f32 %v3867_v21, %v1844_v15  ;;  %v1685_v22 = vmul.f32 %v3914_v39, %v1653_v50  ;;  %v1991_v31 = vmul.f32 1.442695, %v1942_v26  ;;  %v3957_v33 = vld [vmem:[#allocation2 + $0x112] sm:$0xff] }
 0x157   : > { %v3948_v45 = vadd.f32 %v3833_v3, %v2227_v19  ;;  %v1495_v0 = vmul.f32 0.3275911, %v3941_v11  ;;  %v964_v27 = vadd.f32 %v932_v32, %v864_v36  ;;  %v1133_v43 = vmul.f32 %v3070_v59, %v3952_v16 }
 0x158   : > { %v565_v57 = vadd.f32 %v533_v20, %v433_v63  ;;  %v2036_v12 = vmul.f32 %v2589_v62, %v1876_v24  ;;  %v1717_v34 = vadd.f32 1.4214138, %v1685_v22  ;;  %v633_v3 = vmul.f32 %v3807_v13, %v3057_v48 }
 0x159   : > { %v733_v21 = vmul.f32 %v3875_v1, %v3059_v49  ;;  %v1527_v8 = vadd.f32 1.0, %v1495_v0  ;;  %v1065_v18 = vadd.f32 %v1033_v53, %v964_v27  ;;  %v1233_v26 = vmul.f32 %v3573_v30, %v3957_v33 }
 0x15a   : > { %v3963_v10 = vpop.eup %2590  ;;  %v833_v35 = vmul.f32 %v3887_v54, %v3061_v51  ;;  %v2068_v5 = vsub.f32 1.0, %v2036_v12  ;;  %v1749_v52 = vmul.f32 %v3914_v39, %v1717_v34  ;;  %v665_v61 = vadd.f32 %v633_v3, %v565_v57 }
 0x15b   : > { %v1622_v4 = vmul.f32 1.0614054, %v3963_v10  ;;  %v3972_v13 = vmul.f32 0.5, %v3840_v2  ;;  %2594 = vrcp.f32 %v1527_v8  ;;  %v1165_v32 = vadd.f32 %v1133_v43, %v1065_v18  ;;  %v3994_v8 = vld [vmem:[#allocation2 + $0x121] sm:$0xff] }
 0x15c   : > { %v933_v63 = vmul.f32 %v3897_v6, %v3066_v55  ;;  %v2100_v62 = vmul.f32 %v2068_v5, %v1428_v25  ;;  %v1781_v19 = vadd.f32 -0.28449672, %v1749_v52  ;;  %v765_v50 = vadd.f32 %v733_v21, %v665_v61  ;;  %v3982_v25 = vld [vmem:[#allocation2 + $0x120] sm:$0xff] }
 0x15d   : > { %v1654_v15 = vadd.f32 -1.4531521, %v1622_v4  ;;  %v2593_v36 = vpop.eup %2592  ;;  %v1429_v53 = vsel %vm1397_vm0, 1.0, %v2789_v47  ;;  %2596 = vpow2.f32 %v1991_v31  ;;  %v1911_v20 = vsub.f32 0.0, %v3941_v11  ;;  %v4009_v4 = vld [vmem:[#allocation2 + $0x122] sm:$0xff] }
 0x15e   : > { %v1265_v24 = vadd.f32 %v1233_v26, %v1165_v32  ;;  %v2132_v2 = vadd.f32 1.0, %v2100_v62  ;;  %v1813_v22 = vmul.f32 %v3914_v39, %v1781_v19  ;;  %v865_v27 = vadd.f32 %v833_v35, %v765_v50 }
 0x15f   : > { %v1686_v0 = vmul.f32 %v3963_v10, %v1654_v15  ;;  %v1034_v60 = vmul.f32 %v3068_v58, %v3982_v25  ;;  %v434_v31 = vmul.f32 %v3828_v28, %v3053_v44  ;;  %v534_v57 = vmul.f32 %v3837_v29, %v3055_v46 }
 0x160   : > { %v3985_v43 = vadd.f32 %v3601_v23, %v1265_v24  ;;  %v2164_v12 = vmul.f32 %v2132_v2, %v3912_v40  ;;  %v1845_v34 = vadd.f32 0.2548296, %v1813_v22  ;;  %v965_v21 = vadd.f32 %v933_v63, %v865_v27 }
 0x161   : > { %v1718_v3 = vadd.f32 1.4214138, %v1686_v0  ;;  %v1134_v26 = vmul.f32 %v3070_v59, %v3994_v8  ;;  %v566_v35 = vadd.f32 %v534_v57, %v434_v31  ;;  %v634_v28 = vmul.f32 %v3844_v14, %v3057_v48 }
 0x162   : > { %v3997_v18 = vmul.f32 0.70710677, %v3985_v43  ;;  %2196 = vst [vmem:[%s3301_s10 + $0x78] sm:$0xff] %v2164_v12  ;;  %v2228_v5 = vmul.f32 %v2164_v12, %v2164_v12  ;;  %v4005_v29 = vadd.f32 %v3884_v37, %v2164_v12  ;;  %v1877_v40 = vmul.f32 %v3914_v39, %v1845_v34 }
 0x163   : > { %v1750_v52 = vmul.f32 %v3963_v10, %v1718_v3  ;;  %v1066_v32 = vadd.f32 %v1034_v60, %v965_v21  ;;  %v1234_v63 = vmul.f32 %v3573_v30, %v4009_v4  ;;  %v666_v62 = vadd.f32 %v634_v28, %v566_v35  ;;  %v4035_v35 = vld [vmem:[#allocation2 + $0x128] sm:$0xff] }
 0x164   : > { %v1464_v61 = vand.u32 2147483647, %v3997_v18  ;;  %v4015_v14 = vadd.f32 %v3894_v7, %v2228_v5  ;;  %v2037_v19 = vmul.f32 %v2593_v36, %v1877_v40  ;;  %v4018_v37 = vmul.f32 0.5, %v3870_v42 }
 0x165   : > { %v1782_v15 = vadd.f32 -0.28449672, %v1750_v52  ;;  %v4020_v39 = vpop.eup %2594  ;;  %v1943_v50 = vmul.f32 %v1911_v20, %v3941_v11  ;;  %v1166_v2 = vadd.f32 %v1134_v26, %v1066_v32  ;;  %v734_v22 = vmul.f32 %v3938_v38, %v3059_v49 }
 0x166   : > { %v1496_v24 = vmul.f32 0.3275911, %v1464_v61  ;;  %v2069_v0 = vsub.f32 1.0, %v2037_v19  ;;  %v1623_v7 = vmul.f32 1.0614054, %v4020_v39  ;;  %v834_v36 = vmul.f32 %v3952_v16, %v3061_v51  ;;  %v4047_v19 = vld [vmem:[#allocation2 + $0x129] sm:$0xff] }
 0x167   : > { %v1814_v27 = vmul.f32 %v3963_v10, %v1782_v15  ;;  %v2597_v42 = vpop.eup %2596  ;;  %vm1398_vm1 = vcmp.ge.f32.partialorder %v3878_v9, 0.0  ;;  %v1266_v31 = vadd.f32 %v1234_v63, %v1166_v2  ;;  %v766_v57 = vadd.f32 %v734_v22, %v666_v62  ;;  %v4052_v2 = vld [vmem:[#allocation2 + $0x12a] sm:$0xff] }
 0x168   : > { %v1528_v60 = vadd.f32 1.0, %v1496_v24  ;;  %v2101_v11 = vmul.f32 %v2069_v0, %v1429_v53  ;;  %v1655_v12 = vadd.f32 -1.4531521, %v1623_v7  ;;  %v934_v34 = vmul.f32 %v3957_v33, %v3066_v55 }
 0x169   : > { %v1846_v20 = vadd.f32 0.2548296, %v1814_v27  ;;  %v1993_v3 = vmul.f32 1.442695, %v1943_v50  ;;  %v4033_v21 = vadd.f32 %v3601_v23, %v1266_v31  ;;  %v866_v26 = vadd.f32 %v834_v36, %v766_v57 }
 0x16a   : > { %2598 = vrcp.f32 %v1528_v60  ;;  %v2133_v28 = vadd.f32 1.0, %v2101_v11  ;;  %v1687_v40 = vmul.f32 %v4020_v39, %v1655_v12  ;;  %v1035_v53 = vmul.f32 %v3068_v58, %v4035_v35 }
 0x16b   : > { %v1878_v5 = vmul.f32 %v3963_v10, %v1846_v20  ;;  %v1430_v52 = vsel %vm1398_vm1, 1.0, %v2789_v47  ;;  %v1912_v32 = vsub.f32 0.0, %v1464_v61  ;;  %v4045_v63 = vmul.f32 0.70710677, %v4033_v21 }
 0x16c   : > { %v966_v62 = vadd.f32 %v934_v34, %v866_v26  ;;  %v2165_v15 = vmul.f32 %v2133_v28, %v3972_v13  ;;  %v1719_v50 = vadd.f32 1.4214138, %v1687_v40  ;;  %v1135_v24 = vmul.f32 %v3070_v59, %v4047_v19 }
 0x16d   : > { %v2038_v10 = vmul.f32 %v2597_v42, %v1878_v5  ;;  %2600 = vpow2.f32 %v1993_v3  ;;  %v1465_v9 = vand.u32 2147483647, %v4045_v63  ;;  %v1235_v0 = vmul.f32 %v3573_v30, %v4052_v2 }
 0x16e   : > { %v1067_v22 = vadd.f32 %v1035_v53, %v966_v62  ;;  %2197 = vst [vmem:[%s3301_s10 + $0x80] sm:$0xff] %v2165_v15  ;;  %v2229_v27 = vmul.f32 %v2165_v15, %v2165_v15  ;;  %v4059_v7 = vadd.f32 %v3936_v41, %v2165_v15  ;;  %v1751_v36 = vmul.f32 %v4020_v39, %v1719_v50 }
 0x16f   : > { %v2070_v13 = vsub.f32 1.0, %v2038_v10  ;;  %v4063_v42 = vmul.f32 0.5, %v3920_v56  ;;  %v1944_v60 = vmul.f32 %v1912_v32, %v1464_v61  ;;  %v1497_v31 = vmul.f32 0.3275911, %v1465_v9 }
 0x170   : > { %v1167_v57 = vadd.f32 %v1135_v24, %v1067_v22  ;;  %v4066_v11 = vadd.f32 %v3948_v45, %v2229_v27  ;;  %v1783_v12 = vadd.f32 -0.28449672, %v1751_v36  ;;  %v435_v30 = vmul.f32 %v3875_v1, %v3053_v44 }
 0x171   : > { %v2102_v20 = vmul.f32 %v2070_v13, %v1430_v52  ;;  %v1529_v34 = vadd.f32 1.0, %v1497_v31  ;;  %v1913_v41 = vsub.f32 0.0, %v1465_v9  ;;  %v535_v26 = vmul.f32 %v3887_v54, %v3055_v46  ;;  %v4108_v31 = vld [vmem:[#allocation2 + $0x138] sm:$0xff] }
 0x172   : > { %v1267_v3 = vadd.f32 %v1235_v0, %v1167_v57  ;;  %vm1399_vm2 = vcmp.ge.f32.partialorder %v3928_v17, 0.0  ;;  %v1815_v56 = vmul.f32 %v4020_v39, %v1783_v12  ;;  %v635_v45 = vmul.f32 %v3897_v6, %v3057_v48 }
 0x173   : > { %v2134_v28 = vadd.f32 1.0, %v2102_v20  ;;  %2602 = vrcp.f32 %v1529_v34  ;;  %v567_v5 = vadd.f32 %v535_v26, %v435_v30  ;;  %v735_v40 = vmul.f32 %v3982_v25, %v3059_v49 }
 0x174   : > { %v4076_v61 = vpop.eup %2598  ;;  %v4079_v1 = vadd.f32 %v3601_v23, %v1267_v3  ;;  %v1847_v53 = vadd.f32 0.2548296, %v1815_v56  ;;  %v1995_v32 = vmul.f32 1.442695, %v1944_v60  ;;  %v1945_v62 = vmul.f32 %v1913_v41, %v1465_v9 }
 0x175   : > { %v2166_v54 = vmul.f32 %v2134_v28, %v4018_v37  ;;  %v1624_v52 = vmul.f32 1.0614054, %v4076_v61  ;;  %v667_v6 = vadd.f32 %v635_v45, %v567_v5  ;;  %v835_v10 = vmul.f32 %v3994_v8, %v3061_v51  ;;  %v4119_v5 = vld [vmem:[#allocation2 + $0x13a] sm:$0xff] }
 0x176   : > { %v4086_v15 = vmul.f32 0.70710677, %v4079_v1  ;;  %v1879_v24 = vmul.f32 %v4020_v39, %v1847_v53  ;;  %v1431_v9 = vsel %vm1399_vm2, 1.0, %v2789_v47  ;;  %v935_v13 = vmul.f32 %v4009_v4, %v3066_v55 }
 0x177   : > { %2198 = vst [vmem:[%s3301_s10 + $0x88] sm:$0xff] %v2166_v54  ;;  %v2230_v23 = vmul.f32 %v2166_v54, %v2166_v54  ;;  %v4092_v50 = vadd.f32 %v4005_v29, %v2166_v54  ;;  %v1656_v37 = vadd.f32 -1.4531521, %v1624_v52  ;;  %v2601_v22 = vpop.eup %2600  ;;  %v767_v27 = vadd.f32 %v735_v40, %v667_v6 }
 0x178   : > { %v1466_v0 = vand.u32 2147483647, %v4086_v15  ;;  %v2039_v60 = vmul.f32 %v2601_v22, %v1879_v24  ;;  %v4105_v29 = vmul.f32 0.5, %v3985_v43  ;;  %v1036_v12 = vmul.f32 %v3068_v58, %v4108_v31 }
 0x179   : > { %v4102_v36 = vadd.f32 %v4015_v14, %v2230_v23  ;;  %v1688_v39 = vmul.f32 %v4076_v61, %v1656_v37  ;;  %v867_v20 = vadd.f32 %v835_v10, %v767_v27  ;;  %2604 = vpow2.f32 %v1995_v32  ;;  %v4112_v14 = vld [vmem:[#allocation2 + $0x139] sm:$0xff] }
 0x17a   : > { %v1498_v57 = vmul.f32 0.3275911, %v1466_v0  ;;  %v1914_v17 = vsub.f32 0.0, %v1466_v0  ;;  %v2071_v30 = vsub.f32 1.0, %v2039_v60  ;;  %v1997_v41 = vmul.f32 1.442695, %v1945_v62 }
 0x17b   : > { %v1720_v34 = vadd.f32 1.4214138, %v1688_v39  ;;  %v967_v26 = vadd.f32 %v935_v13, %v867_v20  ;;  %v1136_v43 = vmul.f32 %v3070_v59, %v4112_v14  ;;  %v436_v28 = vmul.f32 %v3938_v38, %v3053_v44  ;;  %v4127_v62 = vld [vmem:[#allocation5 + $0x8] ss:$0 sm:$0xff] }
 0x17c   : > { %v1530_v3 = vadd.f32 1.0, %v1498_v57  ;;  %v2103_v56 = vmul.f32 %v2071_v30, %v1431_v9  ;;  %v536_v40 = vmul.f32 %v3952_v16, %v3055_v46  ;;  %v636_v54 = vmul.f32 %v3957_v33, %v3057_v48 }
 0x17d   : > { %v1752_v45 = vmul.f32 %v4076_v61, %v1720_v34  ;;  %v4125_v53 = vpop.eup %2602  ;;  %v1946_v52 = vmul.f32 %v1914_v17, %v1466_v0  ;;  %v1068_v32 = vadd.f32 %v1036_v12, %v967_v26  ;;  %v1236_v38 = vmul.f32 %v4127_v62, %v4119_v5  ;;  %v4146_v12 = vld [vmem:[#allocation7] ss:$0 sm:$0xff] }
 0x17e   : > { %2606 = vrcp.f32 %v1530_v3  ;;  %v2135_v6 = vadd.f32 1.0, %v2103_v56  ;;  %v1625_v23 = vmul.f32 1.0614054, %v4125_v53  ;;  %v568_v24 = vadd.f32 %v536_v40, %v436_v28  ;;  %v4159_v56 = vld [vmem:[#allocation2 + $0x140] sm:$0xff] }
 0x17f   : > { %v1784_v10 = vadd.f32 -0.28449672, %v1752_v45  ;;  %vm1400_vm3 = vcmp.ge.f32.partialorder %v3997_v18, 0.0  ;;  %2608 = vpow2.f32 %v1997_v41  ;;  %v1168_v16 = vadd.f32 %v1136_v43, %v1068_v32 }
 0x180   : > { %v736_v33 = vmul.f32 %v4035_v35, %v3059_v49  ;;  %v2167_v37 = vmul.f32 %v2135_v6, %v4063_v42  ;;  %v1657_v9 = vadd.f32 -1.4531521, %v1625_v23  ;;  %v668_v0 = vadd.f32 %v636_v54, %v568_v24  ;;  %v4178_v23 = vld [vmem:[#allocation2 + $0x142] sm:$0xff] }
 0x181   : > { %v1816_v22 = vmul.f32 %v4076_v61, %v1784_v10  ;;  %v1999_v27 = vmul.f32 1.442695, %v1946_v52  ;;  %v1268_v13 = vadd.f32 %v1236_v38, %v1168_v16  ;;  %v836_v60 = vmul.f32 %v4047_v19, %v3061_v51 }
 0x182   : > { %v936_v39 = vmul.f32 %v4052_v2, %v3066_v55  ;;  %2199 = vst [vmem:[%s3301_s10 + $0x90] sm:$0xff] %v2167_v37  ;;  %v2231_v57 = vmul.f32 %v2167_v37, %v2167_v37  ;;  %v4143_v17 = vadd.f32 %v4059_v7, %v2167_v37  ;;  %v1689_v42 = vmul.f32 %v4125_v53, %v1657_v9 }
 0x183   : > { %v1848_v20 = vadd.f32 0.2548296, %v1816_v22  ;;  %v4149_v30 = vadd.f32 %v4146_v12, %v1268_v13  ;;  %v768_v34 = vadd.f32 %v736_v33, %v668_v0  ;;  %v437_v41 = vmul.f32 %v3982_v25, %v3053_v44  ;;  %v2605_v26 = vpop.eup %2604 }
 0x184   : > { %v537_v3 = vmul.f32 %v3994_v8, %v3055_v46  ;;  %v4156_v43 = vadd.f32 %v4066_v11, %v2231_v57  ;;  %v1721_v28 = vadd.f32 1.4214138, %v1689_v42  ;;  %v637_v45 = vmul.f32 %v4009_v4, %v3057_v48  ;;  %v4168_v8 = vld [vmem:[#allocation2 + $0x141] sm:$0xff] }
 0x185   : > { %v1880_v7 = vmul.f32 %v4076_v61, %v1848_v20  ;;  %v4164_v40 = vmul.f32 0.70710677, %v4149_v30  ;;  %v868_v54 = vadd.f32 %v836_v60, %v768_v34  ;;  %v1037_v25 = vmul.f32 %v3068_v58, %v4159_v56 }
 0x186   : > { %v569_v52 = vadd.f32 %v537_v3, %v437_v41  ;;  %v1753_v32 = vmul.f32 %v4125_v53, %v1721_v28  ;;  %v1137_v61 = vmul.f32 %v3070_v59, %v4168_v8  ;;  %v737_v38 = vmul.f32 %v4108_v31, %v3059_v49 }
 0x187   : > { %v2040_v11 = vmul.f32 %v2605_v26, %v1880_v7  ;;  %v1467_v6 = vand.u32 2147483647, %v4164_v40  ;;  %v968_v10 = vadd.f32 %v936_v39, %v868_v54  ;;  %v837_v16 = vmul.f32 %v4112_v14, %v3061_v51  ;;  %v4191_v7 = vld [vmem:[#allocation2 + $0x150] sm:$0xff] }
 0x188   : > { %v4175_v4 = vpop.eup %2606  ;;  %v669_v24 = vadd.f32 %v637_v45, %v569_v52  ;;  %v1432_v33 = vsel %vm1400_vm3, 1.0, %v2789_v47  ;;  %v1785_v22 = vadd.f32 -0.28449672, %v1753_v32  ;;  %v1237_v39 = vmul.f32 %v4127_v62, %v4178_v23  ;;  %v4197_v32 = vld [vmem:[#allocation2 + $0x151] sm:$0xff] }
 0x189   : > { %v2072_v37 = vsub.f32 1.0, %v2040_v11  ;;  %v1626_v9 = vmul.f32 1.0614054, %v4175_v4  ;;  %v2609_v0 = vpop.eup %2608  ;;  %v1499_v13 = vmul.f32 0.3275911, %v1467_v6  ;;  %v1069_v60 = vadd.f32 %v1037_v25, %v968_v10 }
 0x18a   : > { %v769_v57 = vadd.f32 %v737_v38, %v669_v24  ;;  %v1817_v42 = vmul.f32 %v4125_v53, %v1785_v22  ;;  %v937_v41 = vmul.f32 %v4119_v5, %v3066_v55  ;;  %2610 = vpow2.f32 %v1999_v27  ;;  %v4203_v24 = vld [vmem:[#allocation2 + $0x152] sm:$0xff] }
 0x18b   : > { %v2104_v20 = vmul.f32 %v2072_v37, %v1432_v33  ;;  %v1658_v34 = vadd.f32 -1.4531521, %v1626_v9  ;;  %v1531_v18 = vadd.f32 1.0, %v1499_v13  ;;  %v1169_v3 = vadd.f32 %v1137_v61, %v1069_v60 }
 0x18c   : > { %v869_v26 = vadd.f32 %v837_v16, %v769_v57  ;;  %v1849_v45 = vadd.f32 0.2548296, %v1817_v42  ;;  %v1038_v25 = vmul.f32 %v3068_v58, %v4191_v7  ;;  %vm1401_vm4 = vcmp.ge.f32.partialorder %v4045_v63, 0.0 }
 0x18d   : > { %v2136_v28 = vadd.f32 1.0, %v2104_v20  ;;  %v1690_v54 = vmul.f32 %v4175_v4, %v1658_v34  ;;  %2612 = vrcp.f32 %v1531_v18  ;;  %v1269_v52 = vadd.f32 %v1237_v39, %v1169_v3 }
 0x18e   : > { %v969_v11 = vadd.f32 %v937_v41, %v869_v26  ;;  %v1881_v61 = vmul.f32 %v4125_v53, %v1849_v45  ;;  %v1138_v10 = vmul.f32 %v3070_v59, %v4197_v32  ;;  %v1915_v16 = vsub.f32 0.0, %v1467_v6 }
 0x18f   : > { %v2168_v27 = vmul.f32 %v2136_v28, %v4105_v29  ;;  %v1722_v38 = vadd.f32 1.4214138, %v1690_v54  ;;  %v4206_v33 = vadd.f32 %v4146_v12, %v1269_v52  ;;  %v1238_v22 = vmul.f32 %v4127_v62, %v4203_v24 }
 0x190   : > { %v1070_v37 = vadd.f32 %v1038_v25, %v969_v11  ;;  %v2041_v53 = vmul.f32 %v2609_v0, %v1881_v61  ;;  %v438_v57 = vmul.f32 %v4035_v35, %v3053_v44  ;;  %v538_v41 = vmul.f32 %v4047_v19, %v3055_v46 }
 0x191   : > { %2200 = vst [vmem:[%s3301_s10 + $0x98] sm:$0xff] %v2168_v27  ;;  %v2232_v9 = vmul.f32 %v2168_v27, %v2168_v27  ;;  %v4212_v29 = vadd.f32 %v4092_v50, %v2168_v27  ;;  %v1754_v13 = vmul.f32 %v4175_v4, %v1722_v38  ;;  %v4216_v60 = vmul.f32 0.70710677, %v4206_v33 }
 0x192   : > { %v1170_v39 = vadd.f32 %v1138_v10, %v1070_v37  ;;  %v2073_v42 = vsub.f32 1.0, %v2041_v53  ;;  %v1433_v50 = vsel %vm1401_vm4, 1.0, %v2789_v47  ;;  %v638_v3 = vmul.f32 %v4052_v2, %v3057_v48 }
 0x193   : > { %v4221_v20 = vadd.f32 %v4102_v36, %v2232_v9  ;;  %v1786_v34 = vadd.f32 -0.28449672, %v1754_v13  ;;  %v1468_v0 = vand.u32 2147483647, %v4216_v60  ;;  %v1947_v36 = vmul.f32 %v1915_v16, %v1467_v6 }
 0x194   : > { %v1270_v18 = vadd.f32 %v1238_v22, %v1170_v39  ;;  %v2105_v26 = vmul.f32 %v2073_v42, %v1433_v50  ;;  %v570_v28 = vadd.f32 %v538_v41, %v438_v57  ;;  %v2611_v45 = vpop.eup %2610  ;;  %v738_v63 = vmul.f32 %v4159_v56, %v3059_v49 }
 0x195   : > { %v1818_v35 = vmul.f32 %v4175_v4, %v1786_v34  ;;  %v1500_v54 = vmul.f32 0.3275911, %v1468_v0  ;;  %v1916_v25 = vsub.f32 0.0, %v1468_v0  ;;  %v1337_v52 = vmul.f32 0.5, %v4033_v21 }
 0x196   : > { %v4233_v19 = vadd.f32 %v4146_v12, %v1270_v18  ;;  %v2137_v11 = vadd.f32 1.0, %v2105_v26  ;;  %v670_v2 = vadd.f32 %v638_v3, %v570_v28  ;;  %vm1402_vm5 = vcmp.ge.f32.partialorder %v4086_v15, 0.0 }
 0x197   : > { %v1850_v27 = vadd.f32 0.2548296, %v1818_v35  ;;  %v4238_v61 = vpop.eup %2612  ;;  %v1532_v6 = vadd.f32 1.0, %v1500_v54  ;;  %v838_v10 = vmul.f32 %v4168_v8, %v3061_v51  ;;  %v2001_v9 = vmul.f32 1.442695, %v1947_v36 }
 0x198   : > { %v4242_v38 = vmul.f32 0.70710677, %v4233_v19  ;;  %v2169_v16 = vmul.f32 %v2137_v11, %v1337_v52  ;;  %v1627_v21 = vmul.f32 1.0614054, %v4238_v61  ;;  %v770_v22 = vadd.f32 %v738_v63, %v670_v2 }
 0x199   : > { %v1882_v37 = vmul.f32 %v4175_v4, %v1850_v27  ;;  %2614 = vrcp.f32 %v1532_v6  ;;  %v1948_v53 = vmul.f32 %v1916_v25, %v1468_v0  ;;  %v1338_v41 = vmul.f32 0.5, %v4079_v1  ;;  %v4280_v6 = vld [vmem:[#allocation2 + $0x15a] sm:$0xff] }
 0x19a   : > { %v1469_v13 = vand.u32 2147483647, %v4242_v38  ;;  %2201 = vst [vmem:[%s3301_s10 + $0xa0] sm:$0xff] %v2169_v16  ;;  %v2233_v39 = vmul.f32 %v2169_v16, %v2169_v16  ;;  %v4251_v57 = vadd.f32 %v4143_v17, %v2169_v16  ;;  %v1659_v34 = vadd.f32 -1.4531521, %v1627_v21  ;;  %v4262_v17 = vld [vmem:[#allocation2 + $0x158] sm:$0xff] }
 0x19b   : > { %v2042_v42 = vmul.f32 %v2611_v45, %v1882_v37  ;;  %v1434_v4 = vsel %vm1402_vm5, 1.0, %v2789_v47  ;;  %vm1403_vm6 = vcmp.ge.f32.partialorder %v4164_v40, 0.0  ;;  %v870_v26 = vadd.f32 %v838_v10, %v770_v22 }
 0x19c   : > { %v1501_v50 = vmul.f32 0.3275911, %v1469_v13  ;;  %v4259_v0 = vadd.f32 %v4156_v43, %v2233_v39  ;;  %v1691_v3 = vmul.f32 %v4238_v61, %v1659_v34  ;;  %v2003_v35 = vmul.f32 1.442695, %v1948_v53  ;;  %v4268_v43 = vld [vmem:[#allocation2 + $0x159] sm:$0xff] }
 0x19d   : > { %v2074_v18 = vsub.f32 1.0, %v2042_v42  ;;  %v938_v1 = vmul.f32 %v4178_v23, %v3066_v55  ;;  %v1039_v15 = vmul.f32 %v3068_v58, %v4262_v17  ;;  %2616 = vpow2.f32 %v2001_v9 }
 0x19e   : > { %v1533_v36 = vadd.f32 1.0, %v1501_v50  ;;  %v1723_v45 = vadd.f32 1.4214138, %v1691_v3  ;;  %v1917_v54 = vsub.f32 0.0, %v1469_v13  ;;  %v1139_v63 = vmul.f32 %v3070_v59, %v4268_v43 }
 0x19f   : > { %v2106_v28 = vmul.f32 %v2074_v18, %v1434_v4  ;;  %v970_v25 = vadd.f32 %v938_v1, %v870_v26  ;;  %v439_v52 = vmul.f32 %v4108_v31, %v3053_v44  ;;  %v4277_v27 = vsel %vm1403_vm6, 1.0, %v2789_v47 }
 0x1a0   : > { %2618 = vrcp.f32 %v1533_v36  ;;  %v1755_v2 = vmul.f32 %v4238_v61, %v1723_v45  ;;  %v539_v10 = vmul.f32 %v4112_v14, %v3055_v46  ;;  %v1239_v37 = vmul.f32 %v4127_v62, %v4280_v6  ;;  %v4314_v45 = vld [vmem:[#allocation2 + $0x168] sm:$0xff] }
 0x1a1   : > { %v2138_v11 = vadd.f32 1.0, %v2106_v28  ;;  %2620 = vpow2.f32 %v2003_v35  ;;  %v1071_v16 = vadd.f32 %v1039_v15, %v970_v25  ;;  %v639_v31 = vmul.f32 %v4119_v5, %v3057_v48 }
 0x1a2   : > { %v1787_v40 = vadd.f32 -0.28449672, %v1755_v2  ;;  %v1949_v22 = vmul.f32 %v1917_v54, %v1469_v13  ;;  %v571_v9 = vadd.f32 %v539_v10, %v439_v52  ;;  %v739_v42 = vmul.f32 %v4191_v7, %v3059_v49  ;;  %v4327_v10 = vld [vmem:[#allocation2 + $0x169] sm:$0xff] }
 0x1a3   : > { %v2170_v21 = vmul.f32 %v2138_v11, %v1338_v41  ;;  %v4288_v53 = vpop.eup %2614  ;;  %v1171_v39 = vadd.f32 %v1139_v63, %v1071_v16  ;;  %v839_v14 = vmul.f32 %v4197_v32, %v3061_v51  ;;  %v939_v34 = vmul.f32 %v4203_v24, %v3066_v55 }
 0x1a4   : > { %v1819_v13 = vmul.f32 %v4238_v61, %v1787_v40  ;;  %v1628_v41 = vmul.f32 1.0614054, %v4288_v53  ;;  %v671_v18 = vadd.f32 %v639_v31, %v571_v9  ;;  %v440_v3 = vmul.f32 %v4159_v56, %v3053_v44 }
 0x1a5   : > { %2202 = vst [vmem:[%s3301_s10 + $0xa8] sm:$0xff] %v2170_v21  ;;  %v2234_v4 = vmul.f32 %v2170_v21, %v2170_v21  ;;  %v4298_v5 = vadd.f32 %v4212_v29, %v2170_v21  ;;  %v1271_v50 = vadd.f32 %v1239_v37, %v1171_v39  ;;  %v540_v26 = vmul.f32 %v4168_v8, %v3055_v46 }
 0x1a6   : > { %v1851_v36 = vadd.f32 0.2548296, %v1819_v13  ;;  %v1660_v1 = vadd.f32 -1.4531521, %v1628_v41  ;;  %v640_v29 = vmul.f32 %v4178_v23, %v3057_v48  ;;  %v771_v28 = vadd.f32 %v739_v42, %v671_v18  ;;  %v4335_v42 = vld [vmem:[#allocation2 + $0x16a] sm:$0xff] }
 0x1a7   : > { %v4307_v35 = vadd.f32 %v4221_v20, %v2234_v4  ;;  %v4312_v15 = vadd.f32 %v4146_v12, %v1271_v50  ;;  %v572_v54 = vadd.f32 %v540_v26, %v440_v3  ;;  %v740_v56 = vmul.f32 %v4262_v17, %v3059_v49  ;;  %v2617_v25 = vpop.eup %2616  ;;  %v4342_v3 = vld [vmem:[#allocation2 + $0x170] sm:$0xff] }
 0x1a8   : > { %v1883_v8 = vmul.f32 %v4238_v61, %v1851_v36  ;;  %v1692_v20 = vmul.f32 %v4288_v53, %v1660_v1  ;;  %v2005_v63 = vmul.f32 1.442695, %v1949_v22  ;;  %v1040_v52 = vmul.f32 %v3068_v58, %v4314_v45 }
 0x1a9   : > { %v4325_v11 = vmul.f32 0.70710677, %v4312_v15  ;;  %v871_v2 = vadd.f32 %v839_v14, %v771_v28  ;;  %v672_v16 = vadd.f32 %v640_v29, %v572_v54  ;;  %v840_v37 = vmul.f32 %v4268_v43, %v3061_v51 }
 0x1aa   : > { %v4322_v23 = vpop.eup %2618  ;;  %v2043_v31 = vmul.f32 %v2617_v25, %v1883_v8  ;;  %v1724_v61 = vadd.f32 1.4214138, %v1692_v20  ;;  %v1140_v40 = vmul.f32 %v3070_v59, %v4327_v10  ;;  %v940_v4 = vmul.f32 %v4280_v6, %v3066_v55  ;;  %v4349_v25 = vld [vmem:[#allocation2 + $0x171] sm:$0xff] }
 0x1ab   : > { %v1629_v21 = vmul.f32 1.0614054, %v4322_v23  ;;  %v2621_v22 = vpop.eup %2620  ;;  %v1470_v9 = vand.u32 2147483647, %v4325_v11  ;;  %v971_v39 = vadd.f32 %v939_v34, %v871_v2  ;;  %v772_v14 = vadd.f32 %v740_v56, %v672_v16 }
 0x1ac   : > { %v2075_v13 = vsub.f32 1.0, %v2043_v31  ;;  %v1756_v41 = vmul.f32 %v4288_v53, %v1724_v61  ;;  %v1240_v18 = vmul.f32 %v4127_v62, %v4335_v42  ;;  %v1041_v34 = vmul.f32 %v3068_v58, %v4342_v3 }
 0x1ad   : > { %v1661_v50 = vadd.f32 -1.4531521, %v1629_v21  ;;  %v1502_v26 = vmul.f32 0.3275911, %v1470_v9  ;;  %v1072_v36 = vadd.f32 %v1040_v52, %v971_v39  ;;  %v872_v1 = vadd.f32 %v840_v37, %v772_v14 }
 0x1ae   : > { %v1339_v29 = vmul.f32 0.5, %v4149_v30  ;;  %v2107_v28 = vmul.f32 %v2075_v13, %v4277_v27  ;;  %v1788_v54 = vadd.f32 -0.28449672, %v1756_v41  ;;  %v1141_v16 = vmul.f32 %v3070_v59, %v4349_v25  ;;  %v4354_v30 = vld [vmem:[#allocation2 + $0x172] sm:$0xff] }
 0x1af   : > { %v1693_v56 = vmul.f32 %v4322_v23, %v1661_v50  ;;  %v1534_v8 = vadd.f32 1.0, %v1502_v26  ;;  %v1172_v20 = vadd.f32 %v1140_v40, %v1072_v36  ;;  %v972_v2 = vadd.f32 %v940_v4, %v872_v1 }
 0x1b0   : > { %v2139_v52 = vadd.f32 1.0, %v2107_v28  ;;  %v1820_v37 = vmul.f32 %v4288_v53, %v1788_v54  ;;  %2622 = vpow2.f32 %v2005_v63  ;;  %v1241_v21 = vmul.f32 %v4127_v62, %v4354_v30 }
 0x1b1   : > { %v1725_v31 = vadd.f32 1.4214138, %v1693_v56  ;;  %2624 = vrcp.f32 %v1534_v8  ;;  %v1272_v27 = vadd.f32 %v1240_v18, %v1172_v20  ;;  %v1073_v61 = vadd.f32 %v1041_v34, %v972_v2 }
 0x1b2   : > { %v2171_v39 = vmul.f32 %v2139_v52, %v1339_v29  ;;  %v1852_v40 = vadd.f32 0.2548296, %v1820_v37  ;;  %v441_v4 = vmul.f32 %v4191_v7, %v3053_v44  ;;  %v1918_v13 = vsub.f32 0.0, %v1470_v9 }
 0x1b3   : > { %v1757_v14 = vmul.f32 %v4322_v23, %v1725_v31  ;;  %v4362_v41 = vadd.f32 %v4146_v12, %v1272_v27  ;;  %v1173_v63 = vadd.f32 %v1141_v16, %v1073_v61  ;;  %v541_v50 = vmul.f32 %v4197_v32, %v3055_v46 }
 0x1b4   : > { %2203 = vst [vmem:[%s3301_s10 + $0xb0] sm:$0xff] %v2171_v39  ;;  %v2235_v18 = vmul.f32 %v2171_v39, %v2171_v39  ;;  %v4368_v26 = vadd.f32 %v4251_v57, %v2171_v39  ;;  %v1884_v36 = vmul.f32 %v4288_v53, %v1852_v40  ;;  %vm1404_vm7 = vcmp.ge.f32.partialorder %v4216_v60, 0.0 }
 0x1b5   : > { %v1789_v1 = vadd.f32 -0.28449672, %v1757_v14  ;;  %v4373_v7 = vmul.f32 0.70710677, %v4362_v41  ;;  %v1273_v34 = vadd.f32 %v1241_v21, %v1173_v63  ;;  %v573_v29 = vadd.f32 %v541_v50, %v441_v4 }
 0x1b6   : > { %v4376_v28 = vadd.f32 %v4259_v0, %v2235_v18  ;;  %v2044_v54 = vmul.f32 %v2621_v22, %v1884_v36  ;;  %v641_v57 = vmul.f32 %v4203_v24, %v3057_v48  ;;  %v1950_v56 = vmul.f32 %v1918_v13, %v1470_v9 }
 0x1b7   : > { %v1821_v32 = vmul.f32 %v4322_v23, %v1789_v1  ;;  %v1471_v53 = vand.u32 2147483647, %v4373_v7  ;;  %v4383_v8 = vadd.f32 %v4146_v12, %v1273_v34  ;;  %v741_v20 = vmul.f32 %v4314_v45, %v3059_v49 }
 0x1b8   : > { %v1340_v2 = vmul.f32 0.5, %v4206_v33  ;;  %v2076_v16 = vsub.f32 1.0, %v2044_v54  ;;  %v673_v52 = vadd.f32 %v641_v57, %v573_v29  ;;  %v1436_v22 = vsel %vm1404_vm7, 1.0, %v2789_v47 }
 0x1b9   : > { %v1853_v0 = vadd.f32 0.2548296, %v1821_v32  ;;  %vm1405_vm8 = vcmp.ge.f32.partialorder %v4242_v38, 0.0  ;;  %v1503_v24 = vmul.f32 0.3275911, %v1471_v53  ;;  %v841_v33 = vmul.f32 %v4327_v10, %v3061_v51 }
 0x1ba   : > { %v4393_v9 = vmul.f32 0.70710677, %v4383_v8  ;;  %v2623_v37 = vpop.eup %2622  ;;  %v2108_v31 = vmul.f32 %v2076_v16, %v1436_v22  ;;  %v773_v61 = vadd.f32 %v741_v20, %v673_v52  ;;  %v2007_v39 = vmul.f32 1.442695, %v1950_v56  ;;  %v1006_v16 = vld [vmem:[#allocation2 + $0x180] sm:$0xff] }
 0x1bb   : > { %v1885_v27 = vmul.f32 %v4322_v23, %v1853_v0  ;;  %v4398_v21 = vpop.eup %2624  ;;  %v1535_v40 = vadd.f32 1.0, %v1503_v24  ;;  %v1919_v60 = vsub.f32 0.0, %v1471_v53  ;;  %v1341_v13 = vmul.f32 0.5, %v4233_v19  ;;  %v1106_v22 = vld [vmem:[#allocation2 + $0x181] sm:$0xff] }
 0x1bc   : > { %v1472_v14 = vand.u32 2147483647, %v4393_v9  ;;  %v2140_v4 = vadd.f32 1.0, %v2108_v31  ;;  %v1630_v50 = vmul.f32 1.0614054, %v4398_v21  ;;  %v1437_v23 = vsel %vm1405_vm8, 1.0, %v2789_v47 }
 0x1bd   : > { %v2045_v63 = vmul.f32 %v2623_v37, %v1885_v27  ;;  %vm1406_vm9 = vcmp.ge.f32.partialorder %v4325_v11, 0.0  ;;  %2626 = vrcp.f32 %v1535_v40  ;;  %v873_v29 = vadd.f32 %v841_v33, %v773_v61 }
 0x1be   : > { %v1504_v18 = vmul.f32 0.3275911, %v1472_v14  ;;  %v2172_v36 = vmul.f32 %v2140_v4, %v1340_v2  ;;  %v1662_v34 = vadd.f32 -1.4531521, %v1630_v50  ;;  %2628 = vpow2.f32 %v2007_v39 }
 0x1bf   : > { %v2077_v1 = vsub.f32 1.0, %v2045_v63  ;;  %v1951_v54 = vmul.f32 %v1919_v60, %v1471_v53  ;;  %v941_v19 = vmul.f32 %v4335_v42, %v3066_v55  ;;  %v1920_v2 = vsub.f32 0.0, %v1472_v14 }
 0x1c0   : > { %v1536_v32 = vadd.f32 1.0, %v1504_v18  ;;  %2204 = vst [vmem:[%s3301_s10 + $0xb8] sm:$0xff] %v2172_v36  ;;  %v2236_v57 = vmul.f32 %v2172_v36, %v2172_v36  ;;  %v4411_v56 = vadd.f32 %v4298_v5, %v2172_v36  ;;  %v1694_v20 = vmul.f32 %v4398_v21, %v1662_v34  ;;  %v1206_v5 = vld [vmem:[#allocation2 + $0x182] sm:$0xff] }
 0x1c1   : > { %v2109_v38 = vmul.f32 %v2077_v1, %v1437_v23  ;;  %v973_v0 = vadd.f32 %v941_v19, %v873_v29  ;;  %v1042_v52 = vmul.f32 %v3068_v58, %v1006_v16  ;;  %v1142_v31 = vmul.f32 %v3070_v59, %v1106_v22 }
 0x1c2   : > { %2630 = vrcp.f32 %v1536_v32  ;;  %v4416_v53 = vadd.f32 %v4307_v35, %v2236_v57  ;;  %v1726_v37 = vadd.f32 1.4214138, %v1694_v20  ;;  %v2009_v27 = vmul.f32 1.442695, %v1951_v54 }
 0x1c3   : > { %v2141_v24 = vadd.f32 1.0, %v2109_v38  ;;  %v1074_v61 = vadd.f32 %v1042_v52, %v973_v0  ;;  %v1242_v33 = vmul.f32 %v4127_v62, %v1206_v5  ;;  %v442_v39 = vmul.f32 %v4262_v17, %v3053_v44 }
 0x1c4   : > { %v1758_v60 = vmul.f32 %v4398_v21, %v1726_v37  ;;  %v542_v35 = vmul.f32 %v4268_v43, %v3055_v46  ;;  %v642_v4 = vmul.f32 %v4280_v6, %v3057_v48  ;;  %v1952_v63 = vmul.f32 %v1920_v2, %v1472_v14 }
 0x1c5   : > { %v2173_v40 = vmul.f32 %v2141_v24, %v1341_v13  ;;  %v1174_v50 = vadd.f32 %v1142_v31, %v1074_v61  ;;  %v742_v23 = vmul.f32 %v4342_v3, %v3059_v49  ;;  %v1438_v43 = vsel %vm1406_vm9, 1.0, %v2789_v47 }
 0x1c6   : > { %v1790_v17 = vadd.f32 -0.28449672, %v1758_v60  ;;  %v574_v13 = vadd.f32 %v542_v35, %v442_v39  ;;  %2632 = vpow2.f32 %v2009_v27  ;;  %v842_v14 = vmul.f32 %v4349_v25, %v3061_v51  ;;  %v4472_v60 = vld [vmem:[#allocation2 + $0x189] sm:$0xff] }
 0x1c7   : > { %2205 = vst [vmem:[%s3301_s10 + $0xc0] sm:$0xff] %v2173_v40  ;;  %v2237_v18 = vmul.f32 %v2173_v40, %v2173_v40  ;;  %v4431_v36 = vadd.f32 %v4368_v26, %v2173_v40  ;;  %v4433_v1 = vpop.eup %2626  ;;  %v1274_v6 = vadd.f32 %v1242_v33, %v1174_v50  ;;  %v443_v11 = vmul.f32 %v4314_v45, %v3053_v44  ;;  %v4465_v33 = vld [vmem:[#allocation2 + $0x188] sm:$0xff] }
 0x1c8   : > { %v1822_v29 = vmul.f32 %v4398_v21, %v1790_v17  ;;  %v1631_v26 = vmul.f32 1.0614054, %v4433_v1  ;;  %v674_v54 = vadd.f32 %v642_v4, %v574_v13  ;;  %v2629_v32 = vpop.eup %2628  ;;  %v543_v57 = vmul.f32 %v4327_v10, %v3055_v46  ;;  %v4478_v17 = vld [vmem:[#allocation2 + $0x18a] sm:$0xff] }
 0x1c9   : > { %v4441_v34 = vadd.f32 %v4376_v28, %v2237_v18  ;;  %v4446_v19 = vadd.f32 %v4146_v12, %v1274_v6  ;;  %v643_v38 = vmul.f32 %v4335_v42, %v3057_v48  ;;  %v2011_v2 = vmul.f32 1.442695, %v1952_v63 }
 0x1ca   : > { %v1854_v28 = vadd.f32 0.2548296, %v1822_v29  ;;  %v1663_v20 = vadd.f32 -1.4531521, %v1631_v26  ;;  %v774_v0 = vadd.f32 %v742_v23, %v674_v54  ;;  %v942_v37 = vmul.f32 %v4354_v30, %v3066_v55  ;;  %v1108_v54 = vld [vmem:[#allocation2 + $0x199] sm:$0xff] }
 0x1cb   : > { %v4457_v24 = vmul.f32 0.70710677, %v4446_v19  ;;  %v575_v31 = vadd.f32 %v543_v57, %v443_v11  ;;  %v743_v45 = vmul.f32 %v1006_v16, %v3059_v49  ;;  %v1043_v40 = vmul.f32 %v3068_v58, %v4465_v33 }
 0x1cc   : > { %v4454_v52 = vpop.eup %2630  ;;  %v1886_v10 = vmul.f32 %v4398_v21, %v1854_v28  ;;  %v1695_v27 = vmul.f32 %v4433_v1, %v1663_v20  ;;  %v874_v61 = vadd.f32 %v842_v14, %v774_v0  ;;  %v843_v16 = vmul.f32 %v1106_v22, %v3061_v51  ;;  %v2656_v28 = vld [vmem:[#allocation2] sm:$0xff] }
 0x1cd   : > { %v1632_v42 = vmul.f32 1.0614054, %v4454_v52  ;;  %v4468_v39 = vand.u32 2147483647, %v4457_v24  ;;  %v675_v35 = vadd.f32 %v643_v38, %v575_v31  ;;  %v1143_v50 = vmul.f32 %v3070_v59, %v4472_v60  ;;  %v1208_v31 = vld [vmem:[#allocation2 + $0x19a] sm:$0xff] }
 0x1ce   : > { %v2046_v4 = vmul.f32 %v2629_v32, %v1886_v10  ;;  %v1727_v21 = vadd.f32 1.4214138, %v1695_v27  ;;  %v974_v18 = vadd.f32 %v942_v37, %v874_v61  ;;  %v943_v6 = vmul.f32 %v1206_v5, %v3066_v55 }
 0x1cf   : > { %v1664_v63 = vadd.f32 -1.4531521, %v1632_v42  ;;  %v1505_v23 = vmul.f32 0.3275911, %v4468_v39  ;;  %v775_v13 = vadd.f32 %v743_v45, %v675_v35  ;;  %v1243_v22 = vmul.f32 %v4127_v62, %v4478_v17 }
 0x1d0   : > { %v2078_v14 = vsub.f32 1.0, %v2046_v4  ;;  %v1759_v29 = vmul.f32 %v4433_v1, %v1727_v21  ;;  %v2633_v32 = vpop.eup %2632  ;;  %v1075_v57 = vadd.f32 %v1043_v40, %v974_v18  ;;  %v4486_v20 = vmul.f32 %v2656_v28, %v3068_v58 }
 0x1d1   : > { %v1696_v26 = vmul.f32 %v4454_v52, %v1664_v63  ;;  %v1537_v11 = vadd.f32 1.0, %v1505_v23  ;;  %v875_v38 = vadd.f32 %v843_v16, %v775_v13  ;;  %2634 = vpow2.f32 %v2011_v2 }
 0x1d2   : > { %v2110_v0 = vmul.f32 %v2078_v14, %v1438_v43  ;;  %v1791_v37 = vadd.f32 -0.28449672, %v1759_v29  ;;  %v1175_v45 = vadd.f32 %v1143_v50, %v1075_v57  ;;  %v1144_v27 = vmul.f32 %v3070_v59, %v1108_v54 }
 0x1d3   : > { %v1728_v5 = vadd.f32 1.4214138, %v1696_v26  ;;  %2636 = vrcp.f32 %v1537_v11  ;;  %v975_v10 = vadd.f32 %v943_v6, %v875_v38  ;;  %v1342_v42 = vmul.f32 0.5, %v4312_v15 }
 0x1d4   : > { %v2142_v61 = vadd.f32 1.0, %v2110_v0  ;;  %v1823_v40 = vmul.f32 %v4433_v1, %v1791_v37  ;;  %v1275_v58 = vadd.f32 %v1243_v22, %v1175_v45  ;;  %v1244_v16 = vmul.f32 %v4127_v62, %v1208_v31 }
 0x1d5   : > { %v1760_v35 = vmul.f32 %v4454_v52, %v1728_v5  ;;  %v1076_v43 = vadd.f32 %v4486_v20, %v975_v10  ;;  %v444_v2 = vmul.f32 %v4342_v3, %v3053_v44  ;;  %v544_v15 = vmul.f32 %v4349_v25, %v3055_v46 }
 0x1d6   : > { %v2174_v4 = vmul.f32 %v2142_v61, %v1342_v42  ;;  %v1855_v21 = vadd.f32 0.2548296, %v1823_v40  ;;  %v1921_v50 = vsub.f32 0.0, %v4468_v39  ;;  %v4500_v23 = vadd.f32 %v4146_v12, %v1275_v58 }
 0x1d7   : > { %v1792_v63 = vadd.f32 -0.28449672, %v1760_v35  ;;  %v1176_v18 = vadd.f32 %v1144_v27, %v1076_v43  ;;  %v644_v13 = vmul.f32 %v4354_v30, %v3057_v48  ;;  %vm1407_vm10 = vcmp.ge.f32.partialorder %v4373_v7, 0.0 }
 0x1d8   : > { %2206 = vst [vmem:[%s3301_s10 + $0xc8] sm:$0xff] %v2174_v4  ;;  %v2238_v6 = vmul.f32 %v2174_v4, %v2174_v4  ;;  %v4506_v14 = vadd.f32 %v4411_v56, %v2174_v4  ;;  %v1887_v44 = vmul.f32 %v4433_v1, %v1855_v21  ;;  %v4512_v46 = vmul.f32 0.70710677, %v4500_v23 }
 0x1d9   : > { %v1824_v3 = vmul.f32 %v4454_v52, %v1792_v63  ;;  %v1276_v25 = vadd.f32 %v1244_v16, %v1176_v18  ;;  %v576_v29 = vadd.f32 %v544_v15, %v444_v2  ;;  %v744_v56 = vmul.f32 %v4465_v33, %v3059_v49  ;;  %v1109_v16 = vld [vmem:[#allocation2 + $0x1a1] sm:$0xff] }
 0x1da   : > { %v4515_v26 = vadd.f32 %v4416_v53, %v2238_v6  ;;  %v2047_v48 = vmul.f32 %v2633_v32, %v1887_v44  ;;  %v1953_v22 = vmul.f32 %v1921_v50, %v4468_v39  ;;  %v1474_v1 = vand.u32 2147483647, %v4512_v46  ;;  %v1209_v63 = vld [vmem:[#allocation2 + $0x1a2] sm:$0xff] }
 0x1db   : > { %v1856_v30 = vadd.f32 0.2548296, %v1824_v3  ;;  %v4522_v54 = vadd.f32 %v4146_v12, %v1276_v25  ;;  %v676_v7 = vadd.f32 %v644_v13, %v576_v29  ;;  %v2635_v11 = vpop.eup %2634  ;;  %v1439_v57 = vsel %vm1407_vm10, 1.0, %v2789_v47 }
 0x1dc   : > { %v2079_v38 = vsub.f32 1.0, %v2047_v48  ;;  %vm1408_vm11 = vcmp.ge.f32.partialorder %v4393_v9, 0.0  ;;  %v1506_v32 = vmul.f32 0.3275911, %v1474_v1  ;;  %v844_v33 = vmul.f32 %v4472_v60, %v3061_v51 }
 0x1dd   : > { %v1888_v53 = vmul.f32 %v4454_v52, %v1856_v30  ;;  %v2637_v28 = vpop.eup %2636  ;;  %v4528_v49 = vmul.f32 0.70710677, %v4522_v54  ;;  %v776_v5 = vadd.f32 %v744_v56, %v676_v7  ;;  %v2013_v31 = vmul.f32 1.442695, %v1953_v22 }
 0x1de   : > { %v2111_v39 = vmul.f32 %v2079_v38, %v1439_v57  ;;  %v1633_v37 = vmul.f32 1.0614054, %v2637_v28  ;;  %v1538_v45 = vadd.f32 1.0, %v1506_v32  ;;  %v1343_v52 = vmul.f32 0.5, %v4362_v41 }
 0x1df   : > { %v2048_v0 = vmul.f32 %v2635_v11, %v1888_v53  ;;  %v1475_v10 = vand.u32 2147483647, %v4528_v49  ;;  %v1440_v61 = vsel %vm1408_vm11, 1.0, %v2789_v47  ;;  %v944_v51 = vmul.f32 %v4478_v17, %v3066_v55 }
 0x1e0   : > { %v2143_v27 = vadd.f32 1.0, %v2111_v39  ;;  %v1665_v42 = vadd.f32 -1.4531521, %v1633_v37  ;;  %2638 = vrcp.f32 %v1538_v45  ;;  %v876_v43 = vadd.f32 %v844_v33, %v776_v5 }
 0x1e1   : > { %v2080_v9 = vsub.f32 1.0, %v2048_v0  ;;  %v1507_v40 = vmul.f32 0.3275911, %v1475_v10  ;;  %2640 = vpow2.f32 %v2013_v31  ;;  %v1344_v41 = vmul.f32 0.5, %v4383_v8 }
 0x1e2   : > { %v4537_v60 = vmul.f32 %v2143_v27, %v1343_v52  ;;  %v1697_v58 = vmul.f32 %v2637_v28, %v1665_v42  ;;  %v1922_v15 = vsub.f32 0.0, %v1474_v1  ;;  %v976_v50 = vadd.f32 %v944_v51, %v876_v43 }
 0x1e3   : > { %v2112_v35 = vmul.f32 %v2080_v9, %v1440_v61  ;;  %v1539_v2 = vadd.f32 1.0, %v1507_v40  ;;  %v1145_v55 = vmul.f32 %v3070_v59, %v1109_v16  ;;  %v1245_v6 = vmul.f32 %v4127_v62, %v1209_v63 }
 0x1e4   : > { %2207 = vst [vmem:[%s3301_s10 + $0xd0] sm:$0xff] %v4537_v60  ;;  %v1729_v21 = vadd.f32 1.4214138, %v1697_v58  ;;  %v1077_v13 = vadd.f32 %v4486_v20, %v976_v50  ;;  %v1954_v3 = vmul.f32 %v1922_v15, %v1474_v1  ;;  %v1923_v8 = vsub.f32 0.0, %v1475_v10 }
 0x1e5   : > { %v2144_v4 = vadd.f32 1.0, %v2112_v35  ;;  %2642 = vrcp.f32 %v1539_v2  ;;  %vm1409_vm12 = vcmp.ge.f32.partialorder %v4457_v24, 0.0  ;;  %v1345_v24 = vmul.f32 0.5, %v4446_v19 }
 0x1e6   : > { %v1761_v18 = vmul.f32 %v2637_v28, %v1729_v21  ;;  %v1177_v25 = vadd.f32 %v1145_v55, %v1077_v13  ;;  %v2015_v59 = vmul.f32 1.442695, %v1954_v3  ;;  %v1955_v11 = vmul.f32 %v1923_v8, %v1475_v10 }
 0x1e7   : > { %v4543_v17 = vmul.f32 %v2144_v4, %v1344_v41  ;;  %vm1410_vm13 = vcmp.ge.f32.partialorder %v4512_v46, 0.0  ;;  %vm1411_vm14 = vcmp.ge.f32.partialorder %v4528_v49, 0.0  ;;  %vm2319_vm0 = vcmask 1040384  }
 0x1e8   : > { %v1793_v44 = vadd.f32 -0.28449672, %v1761_v18  ;;  %v1277_v30 = vadd.f32 %v1245_v6, %v1177_v25  ;;  %2644 = vpow2.f32 %v2015_v59  ;;  %v2017_v39 = vmul.f32 1.442695, %v1955_v11 }
 0x1e9   : > { %2208 = vst [vmem:[%s3301_s10 + $0xd8] sm:$0xff] %v4543_v17  ;;  %v1442_v13 = vsel %vm1410_vm13, 1.0, %v2789_v47  ;;  %v1346_v25 = vmul.f32 0.5, %v4500_v23  ;;  %v1347_v59 = vmul.f32 0.5, %v4522_v54 }
 0x1ea   : > { %v1825_v29 = vmul.f32 %v2637_v28, %v1793_v44  ;;  %v2639_v48 = vpop.eup %2638  ;;  %v4550_v57 = vadd.f32 %v4146_v12, %v1277_v30  ;;  %v1441_v12 = vsel %vm1409_vm12, 1.0, %v2789_v47  ;;  %2646 = vpow2.f32 %v2017_v39 }
 0x1eb   : > { %v1634_v22 = vmul.f32 1.0614054, %v2639_v48  ;;  %v2641_v7 = vpop.eup %2640  ;;  %v1443_v30 = vsel %vm1411_vm14, 1.0, %v2789_v47  ;;  %v2239_v39 = vmul.f32 %v4537_v60, %v4537_v60 }
 0x1ec   : > { %v1857_v56 = vadd.f32 0.2548296, %v1825_v29  ;;  %v4553_v53 = vmul.f32 0.70710677, %v4550_v57 }
 0x1ed   : > { %v1666_v38 = vadd.f32 -1.4531521, %v1634_v22  ;;  %v2287_v54 = vadd.f32 %v4441_v34, %v2239_v39 }
 0x1ee   : > { %v1889_v20 = vmul.f32 %v2637_v28, %v1857_v56  ;;  %v1476_v0 = vand.u32 2147483647, %v4553_v53  ;;  %vm1412_vm15 = vcmp.ge.f32.partialorder %v4553_v53, 0.0 }
 0x1ef   : > { %v2643_v62 = vpop.eup %2642  ;;  %v1698_v32 = vmul.f32 %v2639_v48, %v1666_v38 }
 0x1f0   : > { %v2049_v1 = vmul.f32 %v2641_v7, %v1889_v20  ;;  %v1635_v33 = vmul.f32 1.0614054, %v2643_v62  ;;  %v1508_v28 = vmul.f32 0.3275911, %v1476_v0  ;;  %v1924_v2 = vsub.f32 0.0, %v1476_v0 }
 0x1f1   : > { %v1730_v5 = vadd.f32 1.4214138, %v1698_v32 }
 0x1f2   : > { %v2081_v37 = vsub.f32 1.0, %v2049_v1  ;;  %v1667_v31 = vadd.f32 -1.4531521, %v1635_v33  ;;  %v1540_v27 = vadd.f32 1.0, %v1508_v28  ;;  %v2645_v16 = vpop.eup %2644  ;;  %v1956_v19 = vmul.f32 %v1924_v2, %v1476_v0 }
 0x1f3   : > { %v1762_v10 = vmul.f32 %v2639_v48, %v1730_v5  ;;  %v2257_v0 = vadd.f32 %v4431_v36, %v4537_v60  ;;  %v2240_v5 = vmul.f32 %v4543_v17, %v4543_v17  ;;  %v1444_v28 = vsel %vm1412_vm15, 1.0, %v2789_v47 }
 0x1f4   : > { %v2113_v45 = vmul.f32 %v2081_v37, %v1441_v12  ;;  %v1699_v52 = vmul.f32 %v2643_v62, %v1667_v31  ;;  %2648 = vrcp.f32 %v1540_v27  ;;  %v2647_v15 = vpop.eup %2646  ;;  %v2019_v8 = vmul.f32 1.442695, %v1956_v19 }
 0x1f5   : > { %v1794_v42 = vadd.f32 -0.28449672, %v1762_v10  ;;  %v2272_v31 = vadd.f32 %v4506_v14, %v4543_v17  ;;  %v1348_v60 = vmul.f32 0.5, %v4550_v57 }
 0x1f6   : > { %v2145_v9 = vadd.f32 1.0, %v2113_v45  ;;  %v1731_v61 = vadd.f32 1.4214138, %v1699_v52  ;;  %2650 = vpow2.f32 %v2019_v8  ;;  %v2302_v45 = vadd.f32 %v4515_v26, %v2240_v5 }
 0x1f7   : > { %v1826_v51 = vmul.f32 %v2639_v48, %v1794_v42 }
 0x1f8   : > { %v2177_v40 = vmul.f32 %v2145_v9, %v1345_v24  ;;  %v1763_v35 = vmul.f32 %v2643_v62, %v1731_v61 }
 0x1f9   : > { %v1858_v58 = vadd.f32 0.2548296, %v1826_v51 }
 0x1fa   : > { %2209 = vst [vmem:[%s3301_s10 + $0xe0] sm:$0xff] %v2177_v40  ;;  %v1795_v43 = vadd.f32 -0.28449672, %v1763_v35  ;;  %v2241_v10 = vmul.f32 %v2177_v40, %v2177_v40  ;;  %v2258_v52 = vadd.f32 %v2257_v0, %v2177_v40 }
 0x1fb   : > { %v1890_v41 = vmul.f32 %v2639_v48, %v1858_v58 }
 0x1fc   : > { %v1827_v4 = vmul.f32 %v2643_v62, %v1795_v43  ;;  %v2288_v53 = vadd.f32 %v2287_v54, %v2241_v10 }
 0x1fd   : > { %v2050_v21 = vmul.f32 %v2645_v16, %v1890_v41 }
 0x1fe   : > { %v1859_v63 = vadd.f32 0.2548296, %v1827_v4  ;;  %v2649_v18 = vpop.eup %2648 }
 0x1ff   : > { %v2082_v50 = vsub.f32 1.0, %v2050_v21  ;;  %v1636_v3 = vmul.f32 1.0614054, %v2649_v18 }
 0x200   : > { %v1891_v55 = vmul.f32 %v2643_v62, %v1859_v63  ;;  %v2651_v32 = vpop.eup %2650 }
 0x201   : > { %v2114_v6 = vmul.f32 %v2082_v50, %v1442_v13  ;;  %v1668_v48 = vadd.f32 -1.4531521, %v1636_v3 }
 0x202   : > { %v2051_v44 = vmul.f32 %v2647_v15, %v1891_v55 }
 0x203   : > { %v2146_v46 = vadd.f32 1.0, %v2114_v6  ;;  %v1700_v7 = vmul.f32 %v2649_v18, %v1668_v48 }
 0x204   : > { %v2083_v29 = vsub.f32 1.0, %v2051_v44 }
 0x205   : > { %v2178_v56 = vmul.f32 %v2146_v46, %v1346_v25  ;;  %v1732_v49 = vadd.f32 1.4214138, %v1700_v7 }
 0x206   : > { %v2115_v22 = vmul.f32 %v2083_v29, %v1443_v30 }
 0x207   : > { %2210 = vst [vmem:[%s3301_s10 + $0xe8] sm:$0xff] %v2178_v56  ;;  %v1764_v38 = vmul.f32 %v2649_v18, %v1732_v49  ;;  %v2242_v27 = vmul.f32 %v2178_v56, %v2178_v56  ;;  %v2273_v34 = vadd.f32 %v2272_v31, %v2178_v56 }
 0x208   : > { %v2147_v11 = vadd.f32 1.0, %v2115_v22 }
 0x209   : > { %v1796_v62 = vadd.f32 -0.28449672, %v1764_v38  ;;  %v2303_v9 = vadd.f32 %v2302_v45, %v2242_v27 }
 0x20a   : > { %v2179_v20 = vmul.f32 %v2147_v11, %v1347_v59 }
 0x20b   : > { %v1828_v1 = vmul.f32 %v2649_v18, %v1796_v62 }
 0x20c   : > { %2211 = vst [vmem:[%s3301_s10 + $0xf0] sm:$0xff] %v2179_v20  ;;  %v2243_v42 = vmul.f32 %v2179_v20, %v2179_v20  ;;  %v2259_v61 = vadd.f32 %v2258_v52, %v2179_v20 }
 0x20d   : > { %v1860_v23 = vadd.f32 0.2548296, %v1828_v1 }
 0x20e   : > { %v2289_v14 = vadd.f32 %v2288_v53, %v2243_v42 }
 0x20f   : > { %v1892_v33 = vmul.f32 %v2649_v18, %v1860_v23 }
 0x211   : > { %v2052_v37 = vmul.f32 %v2651_v32, %v1892_v33 }
 0x213   : > { %v2084_v12 = vsub.f32 1.0, %v2052_v37 }
 0x215   : > { %v2116_v36 = vmul.f32 %v2084_v12, %v1444_v28 }
 0x217   : > { %v2148_v24 = vadd.f32 1.0, %v2116_v36 }
 0x219   : > { %v2180_v51 = vmul.f32 %v2148_v24, %v1348_v60 }
 0x21b   : > { %2212 = vst [vmem:[%s3301_s10 + $0xf8] sm:$0xff] %v2180_v51  ;;  %v2244_v17 = vmul.f32 %v2180_v51, %v2180_v51  ;;  %v2274_v47 = vadd.f32 %v2273_v34, %v2180_v51 }
 0x21d   : > { %v2304_v35 = vadd.f32 %v2303_v9, %v2244_v17  ;;  %v2305_v26 = vadd.f32 %v2274_v47, %v2259_v61 }
 0x21f   : > { %v2306_v58 = vrot.slane %v2305_v26, 4  ;;  %v2312_v40 = vadd.f32 %v2304_v35, %v2289_v14 }
 0x221   : > { %v2307_v43 = vadd.f32 %v2306_v58, %v2305_v26  ;;  %v2313_v16 = vrot.slane %v2312_v40, 4 }
 0x223   : > { %v2308_v57 = vrot.slane %v2307_v43, 2  ;;  %v2314_v2 = vadd.f32 %v2313_v16, %v2312_v40 }
 0x225   : > { %v2309_v41 = vadd.f32 %v2308_v57, %v2307_v43  ;;  %v2315_v4 = vrot.slane %v2314_v2, 2 }
 0x227   : > { %v2310_v21 = vrot.slane %v2309_v41, 1  ;;  %v2316_v63 = vadd.f32 %v2315_v4, %v2314_v2 }
 0x229   : > { %v2317_v15 = vrot.slane %v2316_v63, 1  ;;  %v2311_v19 = vadd.f32 %v2310_v21, %v2309_v41 }
 0x22b   : > { %v2318_v50 = vadd.f32 %v2317_v15, %v2316_v63 }
 0x22d   : > { %v2320_v55 = vsel %vm2319_vm0, %v2311_v19, %v2318_v50 }
 0x22e   : > { %2321 = vst [vmem:[%s255_s18] sm:$0x3] %v2320_v55 }
 0x22f PF: > { %p16_p9 = scmp.ge.s32.totalorder %s2912_s6, 4   ;;  %s4615_s15 = smov %s2773_s16 }
 0x230   : > { %s4616_s16 = smov %s2777_s17  ;;  %s4617_s17 = smov %s2923_s11 }
 0x231   : > { %s4618_s18 = smov %s2912_s6  ;;  %18 = sbr.rel (!%p16_p9) target bundleno = 4 (0x4), region = 94 }
 0x238   :  { %2357 = vsyncpa [#allocation4], 1 }
 0x239   :  { %2359 = vsyncpa [#allocation4 + $0x1], 1 }
 0x23a   :  { %2360 = vsyncpa [#allocation6], 1 }

</bundles_post_ra>
